<compile_context>
chip_gen: v5e
topology: v5e:2x2
jax: 0.10.0
libtpu: 0.0.40
codegen_flags: <defaults>
</compile_context>

<pallas_src>
import math

import jax
import jax.numpy as jnp
from jax import lax
from jax.experimental import pallas as pl
from jax.experimental.pallas import tpu as pltpu


# ----------------------------- model constants ------------------------------

D_IN, D_MODEL, N_HEADS, N_LAYERS, D_FF, D_OUT = 64, 128, 4, 3, 256, 24 * 6
HEAD_DIM = D_MODEL // N_HEADS
LN_EPS = 1e-5


# ------------------------------ fused kernel --------------------------------

def _layernorm(h, g, b):
    m = jnp.mean(h, axis=-1, keepdims=True)
    v = jnp.mean((h - m) ** 2, axis=-1, keepdims=True)
    return (h - m) * lax.rsqrt(v + LN_EPS) * g + b


def _pose_decoder_kernel(
        x_ref, pe_ref,
        in_w_ref, in_b_ref,
        qkv_w_ref, qkv_b_ref,
        proj_w_ref, proj_b_ref,
        ln1_g_ref, ln1_b_ref,
        ff1_w_ref, ff1_b_ref,
        ff2_w_ref, ff2_b_ref,
        ln2_g_ref, ln2_b_ref,
        out_w_ref, out_b_ref,
        o_ref):
    scale = 1.0 / math.sqrt(HEAD_DIM)

    # input_fc -> ReLU -> + positional encoding (pe broadcast per batch block)
    x = x_ref[0]                                                  # (T, D_IN)
    h = jnp.dot(x, in_w_ref[...], preferred_element_type=jnp.float32)
    h = jnp.maximum(h + in_b_ref[...], 0.0) + pe_ref[...]         # (T, D_MODEL)

    for l in range(N_LAYERS):                                     # unrolled
        # -------- self attention (post-norm; dropout = identity) ----------
        w_qkv = qkv_w_ref[l]                                      # (D, 3D)
        w_out = proj_w_ref[l]                                     # (D, D)
        qkv = jnp.dot(h, w_qkv, preferred_element_type=jnp.float32)
        qkv = qkv + qkv_b_ref[l]                                  # (T, 3D)

        att = None
        for hd in range(N_HEADS):                                 # unrolled
            lo, hi = hd * HEAD_DIM, (hd + 1) * HEAD_DIM
            q = qkv[:, lo:hi]                                     # (T, Dh)
            k = qkv[:, D_MODEL + lo:D_MODEL + hi]                 # (T, Dh)
            v = qkv[:, 2 * D_MODEL + lo:2 * D_MODEL + hi]         # (T, Dh)
            # q @ k^T without materializing the transpose
            s = lax.dot_general(q, k, (((1,), (1,)), ((), ())),
                                preferred_element_type=jnp.float32) * scale
            s = s - jnp.max(s, axis=-1, keepdims=True)
            p = jnp.exp(s)
            p = p / jnp.sum(p, axis=-1, keepdims=True)
            o_h = jnp.dot(p, v, preferred_element_type=jnp.float32)   # (T, Dh)
            # split-K accumulation of the output projection
            part = jnp.dot(o_h, w_out[lo:hi, :],
                           preferred_element_type=jnp.float32)        # (T, D)
            att = part if att is None else att + part
        att = att + proj_b_ref[l]
        h = _layernorm(h + att, ln1_g_ref[l], ln1_b_ref[l])

        # ----------------------------- feed forward -----------------------
        f = jnp.dot(h, ff1_w_ref[l], preferred_element_type=jnp.float32)
        f = jnp.maximum(f + ff1_b_ref[l], 0.0)
        f = jnp.dot(f, ff2_w_ref[l], preferred_element_type=jnp.float32)
        f = f + ff2_b_ref[l]
        h = _layernorm(h + f, ln2_g_ref[l], ln2_b_ref[l])

    # output_fc  (D_OUT = 144; lane-masked store accepted at this tiny size)
    y = jnp.dot(h, out_w_ref[...], preferred_element_type=jnp.float32)
    o_ref[0] = y + out_b_ref[...]


def pose_decoder_forward(params, pe, x):
    """x: (B, T, 64) f32 -> (B, T, 24, 6) f32. Single fused pallas_call."""
    B, T, _ = x.shape
    pe_t = pe[:T]                                   # (T, D_MODEL), tiny slice
    L = params["layers"]

    wspec = pl.BlockSpec(memory_space=pltpu.MemorySpace.VMEM)   # whole array

    out = pl.pallas_call(
        _pose_decoder_kernel,
        out_shape=jax.ShapeDtypeStruct((B, T, D_OUT), jnp.float32),
        grid=(B,),
        in_specs=[
            pl.BlockSpec((1, T, D_IN), lambda b: (b, 0, 0)),    # x
            wspec,                                              # pe[:T]
            wspec, wspec,                                       # in_w, in_b
            wspec, wspec,                                       # qkv w, b
            wspec, wspec,                                       # out_proj w, b
            wspec, wspec,                                       # ln1 g, b
            wspec, wspec,                                       # ff1 w, b
            wspec, wspec,                                       # ff2 w, b
            wspec, wspec,                                       # ln2 g, b
            wspec, wspec,                                       # out_w, out_b
        ],
        out_specs=pl.BlockSpec((1, T, D_OUT), lambda b: (b, 0, 0)),
        compiler_params=pltpu.CompilerParams(
            dimension_semantics=("parallel",)),
    )(x, pe_t,
      params["in_w"], params["in_b"],
      L["in_proj_w"], L["in_proj_b"],
      L["out_proj_w"], L["out_proj_b"],
      L["ln1_g"], L["ln1_b"],
      L["ff1_w"], L["ff1_b"],
      L["ff2_w"], L["ff2_b"],
      L["ln2_g"], L["ln2_b"],
      params["out_w"], params["out_b"])
    return out.reshape(B, T, 24, 6)


# --------------------------- parameters & helpers ---------------------------

def make_positional_encoding(max_len, d_model):
    position = jnp.arange(max_len, dtype=jnp.float32)[:, None]
    div_term = jnp.exp(jnp.arange(0, d_model, 2, dtype=jnp.float32)
                       * (-math.log(10000.0) / d_model))
    pe = jnp.zeros((max_len, d_model), jnp.float32)
    pe = pe.at[:, 0::2].set(jnp.sin(position * div_term))
    pe = pe.at[:, 1::2].set(jnp.cos(position * div_term))
    return pe


def init_params(key):
    """Deterministic synthetic weights, already transposed to (K, N); layer
    weights are stacked with a leading (N_LAYERS,) axis so they are single
    VMEM inputs to the fused kernel."""
    keys = iter(jax.random.split(key, 64))

    def w(shape, scale=0.02):
        return (scale * jax.random.normal(next(keys), shape)).astype(jnp.float32)

    def stack(make):
        return jnp.stack([make() for _ in range(N_LAYERS)])

    params = {
        "in_w": w((D_IN, D_MODEL)),
        "in_b": w((1, D_MODEL), 0.01),
        "out_w": w((D_MODEL, D_OUT)),
        "out_b": w((1, D_OUT), 0.01),
        "layers": {
            "in_proj_w": stack(lambda: w((D_MODEL, 3 * D_MODEL))),
            "in_proj_b": stack(lambda: w((1, 3 * D_MODEL), 0.01)),
            "out_proj_w": stack(lambda: w((D_MODEL, D_MODEL))),
            "out_proj_b": stack(lambda: w((1, D_MODEL), 0.01)),
            "ln1_g": jnp.ones((N_LAYERS, 1, D_MODEL), jnp.float32),
            "ln1_b": jnp.zeros((N_LAYERS, 1, D_MODEL), jnp.float32),
            "ff1_w": stack(lambda: w((D_MODEL, D_FF))),
            "ff1_b": stack(lambda: w((1, D_FF), 0.01)),
            "ff2_w": stack(lambda: w((D_FF, D_MODEL))),
            "ff2_b": stack(lambda: w((1, D_MODEL), 0.01)),
            "ln2_g": jnp.ones((N_LAYERS, 1, D_MODEL), jnp.float32),
            "ln2_b": jnp.zeros((N_LAYERS, 1, D_MODEL), jnp.float32),
        },
    }
    return params


# ------------------------------ reference -----------------------------------

def _ln_ref(x, g, b, eps=LN_EPS):
    m = jnp.mean(x, axis=-1, keepdims=True)
    v = jnp.mean((x - m) ** 2, axis=-1, keepdims=True)
    return (x - m) * lax.rsqrt(v + eps) * g + b


def reference_forward(params, pe, x):
    B, T, _ = x.shape
    h = jnp.maximum(x @ params["in_w"] + params["in_b"], 0.0) + pe[:T][None]
    L = params["layers"]
    for l in range(N_LAYERS):
        qkv = h @ L["in_proj_w"][l] + L["in_proj_b"][l]
        q, k, v = jnp.split(qkv, 3, axis=-1)

        def heads(t):
            return t.reshape(B, T, N_HEADS, HEAD_DIM).transpose(0, 2, 1, 3)

        s = jnp.einsum("bhqd,bhkd->bhqk", heads(q), heads(k)) / math.sqrt(HEAD_DIM)
        p = jax.nn.softmax(s, axis=-1)
        o = (jnp.einsum("bhqk,bhkd->bhqd", p, heads(v))
             .transpose(0, 2, 1, 3).reshape(B, T, D_MODEL))
        a = o @ L["out_proj_w"][l] + L["out_proj_b"][l]
        h = _ln_ref(h + a, L["ln1_g"][l], L["ln1_b"][l])
        f = (jnp.maximum(h @ L["ff1_w"][l] + L["ff1_b"][l], 0.0)
             @ L["ff2_w"][l] + L["ff2_b"][l])
        h = _ln_ref(h + f, L["ln2_g"][l], L["ln2_b"][l])
    y = h @ params["out_w"] + params["out_b"]
    return y.reshape(B, T, 24, 6)


# --------------------------------- main --------------------------------------

if __name__ == "__main__":
    key = jax.random.PRNGKey(0)
    k_params, k_x = jax.random.split(key)

    params = init_params(k_params)
    pe = make_positional_encoding(max_len=5000, d_model=D_MODEL)

    B, T = 2, 8
    x = jax.random.normal(k_x, (B, T, D_IN), dtype=jnp.float32)

    fwd = jax.jit(pose_decoder_forward)
    out = jax.block_until_ready(fwd(params, pe, x))

    assert out.shape == (B, T, 24, 6), out.shape

    ref = reference_forward(params, pe, x)
    err = jnp.max(jnp.abs(out - ref))
    assert jnp.allclose(out, ref, atol=1e-4, rtol=1e-4), f"max err {err}"

    print("KERNEL_OK")
</pallas_src>

<mosaic_0001>
module attributes {stable_mosaic.version = 11 : i64} {
  func.func @_pose_decoder_kernel(%arg0: i32, %arg1: memref<1x8x64xf32, #tpu.memory_space<vmem>>, %arg2: memref<8x128xf32, #tpu.memory_space<vmem>>, %arg3: memref<64x128xf32, #tpu.memory_space<vmem>>, %arg4: memref<1x128xf32, #tpu.memory_space<vmem>>, %arg5: memref<3x128x384xf32, #tpu.memory_space<vmem>>, %arg6: memref<3x1x384xf32, #tpu.memory_space<vmem>>, %arg7: memref<3x128x128xf32, #tpu.memory_space<vmem>>, %arg8: memref<3x1x128xf32, #tpu.memory_space<vmem>>, %arg9: memref<3x1x128xf32, #tpu.memory_space<vmem>>, %arg10: memref<3x1x128xf32, #tpu.memory_space<vmem>>, %arg11: memref<3x128x256xf32, #tpu.memory_space<vmem>>, %arg12: memref<3x1x256xf32, #tpu.memory_space<vmem>>, %arg13: memref<3x256x128xf32, #tpu.memory_space<vmem>>, %arg14: memref<3x1x128xf32, #tpu.memory_space<vmem>>, %arg15: memref<3x1x128xf32, #tpu.memory_space<vmem>>, %arg16: memref<3x1x128xf32, #tpu.memory_space<vmem>>, %arg17: memref<128x144xf32, #tpu.memory_space<vmem>>, %arg18: memref<1x144xf32, #tpu.memory_space<vmem>>, %arg19: memref<1x8x144xf32, #tpu.memory_space<vmem>>) attributes {dimension_semantics = [#tpu.dimension_semantics<parallel>], iteration_bounds = array<i64: 2>, scalar_prefetch = 0 : i64, scratch_operands = 0 : i64, tpu.core_type = #tpu.core_type<tc>, window_params = [{transform_indices = @transform_0, window_bounds = array<i64: 1, 8, 64>}, {pipeline_mode = #tpu.pipeline_mode<synchronous>, transform_indices = @transform_1, window_bounds = array<i64: 8, 128>}, {pipeline_mode = #tpu.pipeline_mode<synchronous>, transform_indices = @transform_2, window_bounds = array<i64: 64, 128>}, {pipeline_mode = #tpu.pipeline_mode<synchronous>, transform_indices = @transform_3, window_bounds = array<i64: 1, 128>}, {pipeline_mode = #tpu.pipeline_mode<synchronous>, transform_indices = @transform_4, window_bounds = array<i64: 3, 128, 384>}, {pipeline_mode = #tpu.pipeline_mode<synchronous>, transform_indices = @transform_5, window_bounds = array<i64: 3, 1, 384>}, {pipeline_mode = #tpu.pipeline_mode<synchronous>, transform_indices = @transform_6, window_bounds = array<i64: 3, 128, 128>}, {pipeline_mode = #tpu.pipeline_mode<synchronous>, transform_indices = @transform_7, window_bounds = array<i64: 3, 1, 128>}, {pipeline_mode = #tpu.pipeline_mode<synchronous>, transform_indices = @transform_8, window_bounds = array<i64: 3, 1, 128>}, {pipeline_mode = #tpu.pipeline_mode<synchronous>, transform_indices = @transform_9, window_bounds = array<i64: 3, 1, 128>}, {pipeline_mode = #tpu.pipeline_mode<synchronous>, transform_indices = @transform_10, window_bounds = array<i64: 3, 128, 256>}, {pipeline_mode = #tpu.pipeline_mode<synchronous>, transform_indices = @transform_11, window_bounds = array<i64: 3, 1, 256>}, {pipeline_mode = #tpu.pipeline_mode<synchronous>, transform_indices = @transform_12, window_bounds = array<i64: 3, 256, 128>}, {pipeline_mode = #tpu.pipeline_mode<synchronous>, transform_indices = @transform_13, window_bounds = array<i64: 3, 1, 128>}, {pipeline_mode = #tpu.pipeline_mode<synchronous>, transform_indices = @transform_14, window_bounds = array<i64: 3, 1, 128>}, {pipeline_mode = #tpu.pipeline_mode<synchronous>, transform_indices = @transform_15, window_bounds = array<i64: 3, 1, 128>}, {pipeline_mode = #tpu.pipeline_mode<synchronous>, transform_indices = @transform_16, window_bounds = array<i64: 128, 144>}, {pipeline_mode = #tpu.pipeline_mode<synchronous>, transform_indices = @transform_17, window_bounds = array<i64: 1, 144>}, {transform_indices = @transform_18, window_bounds = array<i64: 1, 8, 144>}]} {
    %c0 = arith.constant 0 : index
    %c0_0 = arith.constant 0 : index
    %c0_1 = arith.constant 0 : index
    %0 = vector.load %arg1[%c0, %c0_0, %c0_1] : memref<1x8x64xf32, #tpu.memory_space<vmem>>, vector<1x8x64xf32>
    %1 = vector.shape_cast %0 : vector<1x8x64xf32> to vector<8x64xf32>
    %c0_2 = arith.constant 0 : index
    %c0_3 = arith.constant 0 : index
    %2 = vector.load %arg3[%c0_2, %c0_3] : memref<64x128xf32, #tpu.memory_space<vmem>>, vector<64x128xf32>
    %cst = arith.constant dense<0.000000e+00> : vector<8x128xf32>
    %3 = tpu.matmul %1, %2, %cst {dimension_numbers = #tpu.dot_dimension_numbers<[1], [0], [0], [1], [0, 0, 1, 1], [], []>} : vector<8x64xf32>, vector<64x128xf32>, vector<8x128xf32> -> vector<8x128xf32>
    %c0_4 = arith.constant 0 : index
    %c0_5 = arith.constant 0 : index
    %4 = vector.load %arg4[%c0_4, %c0_5] : memref<1x128xf32, #tpu.memory_space<vmem>>, vector<1x128xf32>
    %5 = vector.broadcast %4 : vector<1x128xf32> to vector<8x128xf32>
    %6 = arith.addf %3, %5 : vector<8x128xf32>
    %cst_6 = arith.constant 0.000000e+00 : f32
    %7 = vector.broadcast %cst_6 : f32 to vector<8x128xf32>
    %8 = arith.maximumf %6, %7 : vector<8x128xf32>
    %c0_7 = arith.constant 0 : index
    %c0_8 = arith.constant 0 : index
    %9 = vector.load %arg2[%c0_7, %c0_8] : memref<8x128xf32, #tpu.memory_space<vmem>>, vector<8x128xf32>
    %10 = arith.addf %8, %9 : vector<8x128xf32>
    %c0_9 = arith.constant 0 : index
    %c0_10 = arith.constant 0 : index
    %c0_11 = arith.constant 0 : index
    %11 = vector.load %arg5[%c0_9, %c0_10, %c0_11] : memref<3x128x384xf32, #tpu.memory_space<vmem>>, vector<1x128x384xf32>
    %12 = vector.shape_cast %11 : vector<1x128x384xf32> to vector<128x384xf32>
    %c0_12 = arith.constant 0 : index
    %c0_13 = arith.constant 0 : index
    %c0_14 = arith.constant 0 : index
    %13 = vector.load %arg7[%c0_12, %c0_13, %c0_14] : memref<3x128x128xf32, #tpu.memory_space<vmem>>, vector<1x128x128xf32>
    %14 = vector.shape_cast %13 : vector<1x128x128xf32> to vector<128x128xf32>
    %cst_15 = arith.constant dense<0.000000e+00> : vector<8x384xf32>
    %15 = tpu.matmul %10, %12, %cst_15 {dimension_numbers = #tpu.dot_dimension_numbers<[1], [0], [0], [1], [0, 0, 1, 1], [], []>} : vector<8x128xf32>, vector<128x384xf32>, vector<8x384xf32> -> vector<8x384xf32>
    %c0_16 = arith.constant 0 : index
    %c0_17 = arith.constant 0 : index
    %c0_18 = arith.constant 0 : index
    %16 = vector.load %arg6[%c0_16, %c0_17, %c0_18] : memref<3x1x384xf32, #tpu.memory_space<vmem>>, vector<1x1x384xf32>
    %17 = vector.shape_cast %16 : vector<1x1x384xf32> to vector<1x384xf32>
    %18 = vector.broadcast %17 : vector<1x384xf32> to vector<8x384xf32>
    %19 = arith.addf %15, %18 : vector<8x384xf32>
    %20 = vector.extract_strided_slice %19 {offsets = [0, 0], sizes = [8, 32], strides = [1, 1]} : vector<8x384xf32> to vector<8x32xf32>
    %21 = vector.extract_strided_slice %19 {offsets = [0, 128], sizes = [8, 32], strides = [1, 1]} : vector<8x384xf32> to vector<8x32xf32>
    %22 = vector.extract_strided_slice %19 {offsets = [0, 256], sizes = [8, 32], strides = [1, 1]} : vector<8x384xf32> to vector<8x32xf32>
    %cst_19 = arith.constant dense<0.000000e+00> : vector<8x8xf32>
    %23 = tpu.matmul %20, %21, %cst_19 {dimension_numbers = #tpu.dot_dimension_numbers<[1], [1], [0], [0], [0, 0, 1, 0], [], []>} : vector<8x32xf32>, vector<8x32xf32>, vector<8x8xf32> -> vector<8x8xf32>
    %cst_20 = arith.constant 0.176776692 : f32
    %24 = vector.broadcast %cst_20 : f32 to vector<8x8xf32>
    %25 = arith.mulf %23, %24 : vector<8x8xf32>
    %cst_21 = arith.constant dense<0xFF800000> : vector<8xf32>
    %26 = vector.multi_reduction <maximumf>, %25, %cst_21 [1] : vector<8x8xf32> to vector<8xf32>
    %27 = vector.shape_cast %26 : vector<8xf32> to vector<8x1xf32>
    %28 = vector.broadcast %27 : vector<8x1xf32> to vector<8x8xf32>
    %29 = arith.subf %25, %28 : vector<8x8xf32>
    %30 = math.exp %29 : vector<8x8xf32>
    %cst_22 = arith.constant dense<0.000000e+00> : vector<8xf32>
    %31 = vector.multi_reduction <add>, %30, %cst_22 [1] : vector<8x8xf32> to vector<8xf32>
    %32 = vector.shape_cast %31 : vector<8xf32> to vector<8x1xf32>
    %33 = vector.broadcast %32 : vector<8x1xf32> to vector<8x8xf32>
    %34 = arith.divf %30, %33 : vector<8x8xf32>
    %cst_23 = arith.constant dense<0.000000e+00> : vector<8x32xf32>
    %35 = tpu.matmul %34, %22, %cst_23 {dimension_numbers = #tpu.dot_dimension_numbers<[1], [0], [0], [1], [0, 0, 1, 1], [], []>} : vector<8x8xf32>, vector<8x32xf32>, vector<8x32xf32> -> vector<8x32xf32>
    %36 = vector.extract_strided_slice %14 {offsets = [0, 0], sizes = [32, 128], strides = [1, 1]} : vector<128x128xf32> to vector<32x128xf32>
    %cst_24 = arith.constant dense<0.000000e+00> : vector<8x128xf32>
    %37 = tpu.matmul %35, %36, %cst_24 {dimension_numbers = #tpu.dot_dimension_numbers<[1], [0], [0], [1], [0, 0, 1, 1], [], []>} : vector<8x32xf32>, vector<32x128xf32>, vector<8x128xf32> -> vector<8x128xf32>
    %38 = vector.extract_strided_slice %19 {offsets = [0, 32], sizes = [8, 32], strides = [1, 1]} : vector<8x384xf32> to vector<8x32xf32>
    %39 = vector.extract_strided_slice %19 {offsets = [0, 160], sizes = [8, 32], strides = [1, 1]} : vector<8x384xf32> to vector<8x32xf32>
    %40 = vector.extract_strided_slice %19 {offsets = [0, 288], sizes = [8, 32], strides = [1, 1]} : vector<8x384xf32> to vector<8x32xf32>
    %cst_25 = arith.constant dense<0.000000e+00> : vector<8x8xf32>
    %41 = tpu.matmul %38, %39, %cst_25 {dimension_numbers = #tpu.dot_dimension_numbers<[1], [1], [0], [0], [0, 0, 1, 0], [], []>} : vector<8x32xf32>, vector<8x32xf32>, vector<8x8xf32> -> vector<8x8xf32>
    %cst_26 = arith.constant 0.176776692 : f32
    %42 = vector.broadcast %cst_26 : f32 to vector<8x8xf32>
    %43 = arith.mulf %41, %42 : vector<8x8xf32>
    %cst_27 = arith.constant dense<0xFF800000> : vector<8xf32>
    %44 = vector.multi_reduction <maximumf>, %43, %cst_27 [1] : vector<8x8xf32> to vector<8xf32>
    %45 = vector.shape_cast %44 : vector<8xf32> to vector<8x1xf32>
    %46 = vector.broadcast %45 : vector<8x1xf32> to vector<8x8xf32>
    %47 = arith.subf %43, %46 : vector<8x8xf32>
    %48 = math.exp %47 : vector<8x8xf32>
    %cst_28 = arith.constant dense<0.000000e+00> : vector<8xf32>
    %49 = vector.multi_reduction <add>, %48, %cst_28 [1] : vector<8x8xf32> to vector<8xf32>
    %50 = vector.shape_cast %49 : vector<8xf32> to vector<8x1xf32>
    %51 = vector.broadcast %50 : vector<8x1xf32> to vector<8x8xf32>
    %52 = arith.divf %48, %51 : vector<8x8xf32>
    %cst_29 = arith.constant dense<0.000000e+00> : vector<8x32xf32>
    %53 = tpu.matmul %52, %40, %cst_29 {dimension_numbers = #tpu.dot_dimension_numbers<[1], [0], [0], [1], [0, 0, 1, 1], [], []>} : vector<8x8xf32>, vector<8x32xf32>, vector<8x32xf32> -> vector<8x32xf32>
    %54 = vector.extract_strided_slice %14 {offsets = [32, 0], sizes = [32, 128], strides = [1, 1]} : vector<128x128xf32> to vector<32x128xf32>
    %cst_30 = arith.constant dense<0.000000e+00> : vector<8x128xf32>
    %55 = tpu.matmul %53, %54, %cst_30 {dimension_numbers = #tpu.dot_dimension_numbers<[1], [0], [0], [1], [0, 0, 1, 1], [], []>} : vector<8x32xf32>, vector<32x128xf32>, vector<8x128xf32> -> vector<8x128xf32>
    %56 = arith.addf %37, %55 : vector<8x128xf32>
    %57 = vector.extract_strided_slice %19 {offsets = [0, 64], sizes = [8, 32], strides = [1, 1]} : vector<8x384xf32> to vector<8x32xf32>
    %58 = vector.extract_strided_slice %19 {offsets = [0, 192], sizes = [8, 32], strides = [1, 1]} : vector<8x384xf32> to vector<8x32xf32>
    %59 = vector.extract_strided_slice %19 {offsets = [0, 320], sizes = [8, 32], strides = [1, 1]} : vector<8x384xf32> to vector<8x32xf32>
    %cst_31 = arith.constant dense<0.000000e+00> : vector<8x8xf32>
    %60 = tpu.matmul %57, %58, %cst_31 {dimension_numbers = #tpu.dot_dimension_numbers<[1], [1], [0], [0], [0, 0, 1, 0], [], []>} : vector<8x32xf32>, vector<8x32xf32>, vector<8x8xf32> -> vector<8x8xf32>
    %cst_32 = arith.constant 0.176776692 : f32
    %61 = vector.broadcast %cst_32 : f32 to vector<8x8xf32>
    %62 = arith.mulf %60, %61 : vector<8x8xf32>
    %cst_33 = arith.constant dense<0xFF800000> : vector<8xf32>
    %63 = vector.multi_reduction <maximumf>, %62, %cst_33 [1] : vector<8x8xf32> to vector<8xf32>
    %64 = vector.shape_cast %63 : vector<8xf32> to vector<8x1xf32>
    %65 = vector.broadcast %64 : vector<8x1xf32> to vector<8x8xf32>
    %66 = arith.subf %62, %65 : vector<8x8xf32>
    %67 = math.exp %66 : vector<8x8xf32>
    %cst_34 = arith.constant dense<0.000000e+00> : vector<8xf32>
    %68 = vector.multi_reduction <add>, %67, %cst_34 [1] : vector<8x8xf32> to vector<8xf32>
    %69 = vector.shape_cast %68 : vector<8xf32> to vector<8x1xf32>
    %70 = vector.broadcast %69 : vector<8x1xf32> to vector<8x8xf32>
    %71 = arith.divf %67, %70 : vector<8x8xf32>
    %cst_35 = arith.constant dense<0.000000e+00> : vector<8x32xf32>
    %72 = tpu.matmul %71, %59, %cst_35 {dimension_numbers = #tpu.dot_dimension_numbers<[1], [0], [0], [1], [0, 0, 1, 1], [], []>} : vector<8x8xf32>, vector<8x32xf32>, vector<8x32xf32> -> vector<8x32xf32>
    %73 = vector.extract_strided_slice %14 {offsets = [64, 0], sizes = [32, 128], strides = [1, 1]} : vector<128x128xf32> to vector<32x128xf32>
    %cst_36 = arith.constant dense<0.000000e+00> : vector<8x128xf32>
    %74 = tpu.matmul %72, %73, %cst_36 {dimension_numbers = #tpu.dot_dimension_numbers<[1], [0], [0], [1], [0, 0, 1, 1], [], []>} : vector<8x32xf32>, vector<32x128xf32>, vector<8x128xf32> -> vector<8x128xf32>
    %75 = arith.addf %56, %74 : vector<8x128xf32>
    %76 = vector.extract_strided_slice %19 {offsets = [0, 96], sizes = [8, 32], strides = [1, 1]} : vector<8x384xf32> to vector<8x32xf32>
    %77 = vector.extract_strided_slice %19 {offsets = [0, 224], sizes = [8, 32], strides = [1, 1]} : vector<8x384xf32> to vector<8x32xf32>
    %78 = vector.extract_strided_slice %19 {offsets = [0, 352], sizes = [8, 32], strides = [1, 1]} : vector<8x384xf32> to vector<8x32xf32>
    %cst_37 = arith.constant dense<0.000000e+00> : vector<8x8xf32>
    %79 = tpu.matmul %76, %77, %cst_37 {dimension_numbers = #tpu.dot_dimension_numbers<[1], [1], [0], [0], [0, 0, 1, 0], [], []>} : vector<8x32xf32>, vector<8x32xf32>, vector<8x8xf32> -> vector<8x8xf32>
    %cst_38 = arith.constant 0.176776692 : f32
    %80 = vector.broadcast %cst_38 : f32 to vector<8x8xf32>
    %81 = arith.mulf %79, %80 : vector<8x8xf32>
    %cst_39 = arith.constant dense<0xFF800000> : vector<8xf32>
    %82 = vector.multi_reduction <maximumf>, %81, %cst_39 [1] : vector<8x8xf32> to vector<8xf32>
    %83 = vector.shape_cast %82 : vector<8xf32> to vector<8x1xf32>
    %84 = vector.broadcast %83 : vector<8x1xf32> to vector<8x8xf32>
    %85 = arith.subf %81, %84 : vector<8x8xf32>
    %86 = math.exp %85 : vector<8x8xf32>
    %cst_40 = arith.constant dense<0.000000e+00> : vector<8xf32>
    %87 = vector.multi_reduction <add>, %86, %cst_40 [1] : vector<8x8xf32> to vector<8xf32>
    %88 = vector.shape_cast %87 : vector<8xf32> to vector<8x1xf32>
    %89 = vector.broadcast %88 : vector<8x1xf32> to vector<8x8xf32>
    %90 = arith.divf %86, %89 : vector<8x8xf32>
    %cst_41 = arith.constant dense<0.000000e+00> : vector<8x32xf32>
    %91 = tpu.matmul %90, %78, %cst_41 {dimension_numbers = #tpu.dot_dimension_numbers<[1], [0], [0], [1], [0, 0, 1, 1], [], []>} : vector<8x8xf32>, vector<8x32xf32>, vector<8x32xf32> -> vector<8x32xf32>
    %92 = vector.extract_strided_slice %14 {offsets = [96, 0], sizes = [32, 128], strides = [1, 1]} : vector<128x128xf32> to vector<32x128xf32>
    %cst_42 = arith.constant dense<0.000000e+00> : vector<8x128xf32>
    %93 = tpu.matmul %91, %92, %cst_42 {dimension_numbers = #tpu.dot_dimension_numbers<[1], [0], [0], [1], [0, 0, 1, 1], [], []>} : vector<8x32xf32>, vector<32x128xf32>, vector<8x128xf32> -> vector<8x128xf32>
    %94 = arith.addf %75, %93 : vector<8x128xf32>
    %c0_43 = arith.constant 0 : index
    %c0_44 = arith.constant 0 : index
    %c0_45 = arith.constant 0 : index
    %95 = vector.load %arg8[%c0_43, %c0_44, %c0_45] : memref<3x1x128xf32, #tpu.memory_space<vmem>>, vector<1x1x128xf32>
    %96 = vector.shape_cast %95 : vector<1x1x128xf32> to vector<1x128xf32>
    %97 = vector.broadcast %96 : vector<1x128xf32> to vector<8x128xf32>
    %98 = arith.addf %94, %97 : vector<8x128xf32>
    %99 = arith.addf %10, %98 : vector<8x128xf32>
    %c0_46 = arith.constant 0 : index
    %c0_47 = arith.constant 0 : index
    %c0_48 = arith.constant 0 : index
    %100 = vector.load %arg9[%c0_46, %c0_47, %c0_48] : memref<3x1x128xf32, #tpu.memory_space<vmem>>, vector<1x1x128xf32>
    %101 = vector.shape_cast %100 : vector<1x1x128xf32> to vector<1x128xf32>
    %c0_49 = arith.constant 0 : index
    %c0_50 = arith.constant 0 : index
    %c0_51 = arith.constant 0 : index
    %102 = vector.load %arg10[%c0_49, %c0_50, %c0_51] : memref<3x1x128xf32, #tpu.memory_space<vmem>>, vector<1x1x128xf32>
    %103 = vector.shape_cast %102 : vector<1x1x128xf32> to vector<1x128xf32>
    %cst_52 = arith.constant dense<0.000000e+00> : vector<8xf32>
    %104 = vector.multi_reduction <add>, %99, %cst_52 [1] : vector<8x128xf32> to vector<8xf32>
    %105 = vector.shape_cast %104 : vector<8xf32> to vector<8x1xf32>
    %cst_53 = arith.constant 1.280000e+02 : f32
    %106 = vector.broadcast %cst_53 : f32 to vector<8x1xf32>
    %107 = arith.divf %105, %106 : vector<8x1xf32>
    %108 = vector.broadcast %107 : vector<8x1xf32> to vector<8x128xf32>
    %109 = arith.subf %99, %108 : vector<8x128xf32>
    %110 = arith.mulf %109, %109 : vector<8x128xf32>
    %cst_54 = arith.constant dense<0.000000e+00> : vector<8xf32>
    %111 = vector.multi_reduction <add>, %110, %cst_54 [1] : vector<8x128xf32> to vector<8xf32>
    %112 = vector.shape_cast %111 : vector<8xf32> to vector<8x1xf32>
    %cst_55 = arith.constant 1.280000e+02 : f32
    %113 = vector.broadcast %cst_55 : f32 to vector<8x1xf32>
    %114 = arith.divf %112, %113 : vector<8x1xf32>
    %115 = vector.broadcast %107 : vector<8x1xf32> to vector<8x128xf32>
    %116 = arith.subf %99, %115 : vector<8x128xf32>
    %cst_56 = arith.constant 9.99999974E-6 : f32
    %117 = vector.broadcast %cst_56 : f32 to vector<8x1xf32>
    %118 = arith.addf %114, %117 : vector<8x1xf32>
    %119 = math.rsqrt %118 : vector<8x1xf32>
    %120 = vector.broadcast %119 : vector<8x1xf32> to vector<8x128xf32>
    %121 = arith.mulf %116, %120 : vector<8x128xf32>
    %122 = vector.broadcast %101 : vector<1x128xf32> to vector<8x128xf32>
    %123 = arith.mulf %121, %122 : vector<8x128xf32>
    %124 = vector.broadcast %103 : vector<1x128xf32> to vector<8x128xf32>
    %125 = arith.addf %123, %124 : vector<8x128xf32>
    %c0_57 = arith.constant 0 : index
    %c0_58 = arith.constant 0 : index
    %c0_59 = arith.constant 0 : index
    %126 = vector.load %arg11[%c0_57, %c0_58, %c0_59] : memref<3x128x256xf32, #tpu.memory_space<vmem>>, vector<1x128x256xf32>
    %127 = vector.shape_cast %126 : vector<1x128x256xf32> to vector<128x256xf32>
    %cst_60 = arith.constant dense<0.000000e+00> : vector<8x256xf32>
    %128 = tpu.matmul %125, %127, %cst_60 {dimension_numbers = #tpu.dot_dimension_numbers<[1], [0], [0], [1], [0, 0, 1, 1], [], []>} : vector<8x128xf32>, vector<128x256xf32>, vector<8x256xf32> -> vector<8x256xf32>
    %c0_61 = arith.constant 0 : index
    %c0_62 = arith.constant 0 : index
    %c0_63 = arith.constant 0 : index
    %129 = vector.load %arg12[%c0_61, %c0_62, %c0_63] : memref<3x1x256xf32, #tpu.memory_space<vmem>>, vector<1x1x256xf32>
    %130 = vector.shape_cast %129 : vector<1x1x256xf32> to vector<1x256xf32>
    %131 = vector.broadcast %130 : vector<1x256xf32> to vector<8x256xf32>
    %132 = arith.addf %128, %131 : vector<8x256xf32>
    %cst_64 = arith.constant 0.000000e+00 : f32
    %133 = vector.broadcast %cst_64 : f32 to vector<8x256xf32>
    %134 = arith.maximumf %132, %133 : vector<8x256xf32>
    %c0_65 = arith.constant 0 : index
    %c0_66 = arith.constant 0 : index
    %c0_67 = arith.constant 0 : index
    %135 = vector.load %arg13[%c0_65, %c0_66, %c0_67] : memref<3x256x128xf32, #tpu.memory_space<vmem>>, vector<1x256x128xf32>
    %136 = vector.shape_cast %135 : vector<1x256x128xf32> to vector<256x128xf32>
    %cst_68 = arith.constant dense<0.000000e+00> : vector<8x128xf32>
    %137 = tpu.matmul %134, %136, %cst_68 {dimension_numbers = #tpu.dot_dimension_numbers<[1], [0], [0], [1], [0, 0, 1, 1], [], []>} : vector<8x256xf32>, vector<256x128xf32>, vector<8x128xf32> -> vector<8x128xf32>
    %c0_69 = arith.constant 0 : index
    %c0_70 = arith.constant 0 : index
    %c0_71 = arith.constant 0 : index
    %138 = vector.load %arg14[%c0_69, %c0_70, %c0_71] : memref<3x1x128xf32, #tpu.memory_space<vmem>>, vector<1x1x128xf32>
    %139 = vector.shape_cast %138 : vector<1x1x128xf32> to vector<1x128xf32>
    %140 = vector.broadcast %139 : vector<1x128xf32> to vector<8x128xf32>
    %141 = arith.addf %137, %140 : vector<8x128xf32>
    %142 = arith.addf %125, %141 : vector<8x128xf32>
    %c0_72 = arith.constant 0 : index
    %c0_73 = arith.constant 0 : index
    %c0_74 = arith.constant 0 : index
    %143 = vector.load %arg15[%c0_72, %c0_73, %c0_74] : memref<3x1x128xf32, #tpu.memory_space<vmem>>, vector<1x1x128xf32>
    %144 = vector.shape_cast %143 : vector<1x1x128xf32> to vector<1x128xf32>
    %c0_75 = arith.constant 0 : index
    %c0_76 = arith.constant 0 : index
    %c0_77 = arith.constant 0 : index
    %145 = vector.load %arg16[%c0_75, %c0_76, %c0_77] : memref<3x1x128xf32, #tpu.memory_space<vmem>>, vector<1x1x128xf32>
    %146 = vector.shape_cast %145 : vector<1x1x128xf32> to vector<1x128xf32>
    %cst_78 = arith.constant dense<0.000000e+00> : vector<8xf32>
    %147 = vector.multi_reduction <add>, %142, %cst_78 [1] : vector<8x128xf32> to vector<8xf32>
    %148 = vector.shape_cast %147 : vector<8xf32> to vector<8x1xf32>
    %cst_79 = arith.constant 1.280000e+02 : f32
    %149 = vector.broadcast %cst_79 : f32 to vector<8x1xf32>
    %150 = arith.divf %148, %149 : vector<8x1xf32>
    %151 = vector.broadcast %150 : vector<8x1xf32> to vector<8x128xf32>
    %152 = arith.subf %142, %151 : vector<8x128xf32>
    %153 = arith.mulf %152, %152 : vector<8x128xf32>
    %cst_80 = arith.constant dense<0.000000e+00> : vector<8xf32>
    %154 = vector.multi_reduction <add>, %153, %cst_80 [1] : vector<8x128xf32> to vector<8xf32>
    %155 = vector.shape_cast %154 : vector<8xf32> to vector<8x1xf32>
    %cst_81 = arith.constant 1.280000e+02 : f32
    %156 = vector.broadcast %cst_81 : f32 to vector<8x1xf32>
    %157 = arith.divf %155, %156 : vector<8x1xf32>
    %158 = vector.broadcast %150 : vector<8x1xf32> to vector<8x128xf32>
    %159 = arith.subf %142, %158 : vector<8x128xf32>
    %cst_82 = arith.constant 9.99999974E-6 : f32
    %160 = vector.broadcast %cst_82 : f32 to vector<8x1xf32>
    %161 = arith.addf %157, %160 : vector<8x1xf32>
    %162 = math.rsqrt %161 : vector<8x1xf32>
    %163 = vector.broadcast %162 : vector<8x1xf32> to vector<8x128xf32>
    %164 = arith.mulf %159, %163 : vector<8x128xf32>
    %165 = vector.broadcast %144 : vector<1x128xf32> to vector<8x128xf32>
    %166 = arith.mulf %164, %165 : vector<8x128xf32>
    %167 = vector.broadcast %146 : vector<1x128xf32> to vector<8x128xf32>
    %168 = arith.addf %166, %167 : vector<8x128xf32>
    %c1 = arith.constant 1 : index
    %c0_83 = arith.constant 0 : index
    %c0_84 = arith.constant 0 : index
    %169 = vector.load %arg5[%c1, %c0_83, %c0_84] : memref<3x128x384xf32, #tpu.memory_space<vmem>>, vector<1x128x384xf32>
    %170 = vector.shape_cast %169 : vector<1x128x384xf32> to vector<128x384xf32>
    %c1_85 = arith.constant 1 : index
    %c0_86 = arith.constant 0 : index
    %c0_87 = arith.constant 0 : index
    %171 = vector.load %arg7[%c1_85, %c0_86, %c0_87] : memref<3x128x128xf32, #tpu.memory_space<vmem>>, vector<1x128x128xf32>
    %172 = vector.shape_cast %171 : vector<1x128x128xf32> to vector<128x128xf32>
    %cst_88 = arith.constant dense<0.000000e+00> : vector<8x384xf32>
    %173 = tpu.matmul %168, %170, %cst_88 {dimension_numbers = #tpu.dot_dimension_numbers<[1], [0], [0], [1], [0, 0, 1, 1], [], []>} : vector<8x128xf32>, vector<128x384xf32>, vector<8x384xf32> -> vector<8x384xf32>
    %c1_89 = arith.constant 1 : index
    %c0_90 = arith.constant 0 : index
    %c0_91 = arith.constant 0 : index
    %174 = vector.load %arg6[%c1_89, %c0_90, %c0_91] : memref<3x1x384xf32, #tpu.memory_space<vmem>>, vector<1x1x384xf32>
    %175 = vector.shape_cast %174 : vector<1x1x384xf32> to vector<1x384xf32>
    %176 = vector.broadcast %175 : vector<1x384xf32> to vector<8x384xf32>
    %177 = arith.addf %173, %176 : vector<8x384xf32>
    %178 = vector.extract_strided_slice %177 {offsets = [0, 0], sizes = [8, 32], strides = [1, 1]} : vector<8x384xf32> to vector<8x32xf32>
    %179 = vector.extract_strided_slice %177 {offsets = [0, 128], sizes = [8, 32], strides = [1, 1]} : vector<8x384xf32> to vector<8x32xf32>
    %180 = vector.extract_strided_slice %177 {offsets = [0, 256], sizes = [8, 32], strides = [1, 1]} : vector<8x384xf32> to vector<8x32xf32>
    %cst_92 = arith.constant dense<0.000000e+00> : vector<8x8xf32>
    %181 = tpu.matmul %178, %179, %cst_92 {dimension_numbers = #tpu.dot_dimension_numbers<[1], [1], [0], [0], [0, 0, 1, 0], [], []>} : vector<8x32xf32>, vector<8x32xf32>, vector<8x8xf32> -> vector<8x8xf32>
    %cst_93 = arith.constant 0.176776692 : f32
    %182 = vector.broadcast %cst_93 : f32 to vector<8x8xf32>
    %183 = arith.mulf %181, %182 : vector<8x8xf32>
    %cst_94 = arith.constant dense<0xFF800000> : vector<8xf32>
    %184 = vector.multi_reduction <maximumf>, %183, %cst_94 [1] : vector<8x8xf32> to vector<8xf32>
    %185 = vector.shape_cast %184 : vector<8xf32> to vector<8x1xf32>
    %186 = vector.broadcast %185 : vector<8x1xf32> to vector<8x8xf32>
    %187 = arith.subf %183, %186 : vector<8x8xf32>
    %188 = math.exp %187 : vector<8x8xf32>
    %cst_95 = arith.constant dense<0.000000e+00> : vector<8xf32>
    %189 = vector.multi_reduction <add>, %188, %cst_95 [1] : vector<8x8xf32> to vector<8xf32>
    %190 = vector.shape_cast %189 : vector<8xf32> to vector<8x1xf32>
    %191 = vector.broadcast %190 : vector<8x1xf32> to vector<8x8xf32>
    %192 = arith.divf %188, %191 : vector<8x8xf32>
    %cst_96 = arith.constant dense<0.000000e+00> : vector<8x32xf32>
    %193 = tpu.matmul %192, %180, %cst_96 {dimension_numbers = #tpu.dot_dimension_numbers<[1], [0], [0], [1], [0, 0, 1, 1], [], []>} : vector<8x8xf32>, vector<8x32xf32>, vector<8x32xf32> -> vector<8x32xf32>
    %194 = vector.extract_strided_slice %172 {offsets = [0, 0], sizes = [32, 128], strides = [1, 1]} : vector<128x128xf32> to vector<32x128xf32>
    %cst_97 = arith.constant dense<0.000000e+00> : vector<8x128xf32>
    %195 = tpu.matmul %193, %194, %cst_97 {dimension_numbers = #tpu.dot_dimension_numbers<[1], [0], [0], [1], [0, 0, 1, 1], [], []>} : vector<8x32xf32>, vector<32x128xf32>, vector<8x128xf32> -> vector<8x128xf32>
    %196 = vector.extract_strided_slice %177 {offsets = [0, 32], sizes = [8, 32], strides = [1, 1]} : vector<8x384xf32> to vector<8x32xf32>
    %197 = vector.extract_strided_slice %177 {offsets = [0, 160], sizes = [8, 32], strides = [1, 1]} : vector<8x384xf32> to vector<8x32xf32>
    %198 = vector.extract_strided_slice %177 {offsets = [0, 288], sizes = [8, 32], strides = [1, 1]} : vector<8x384xf32> to vector<8x32xf32>
    %cst_98 = arith.constant dense<0.000000e+00> : vector<8x8xf32>
    %199 = tpu.matmul %196, %197, %cst_98 {dimension_numbers = #tpu.dot_dimension_numbers<[1], [1], [0], [0], [0, 0, 1, 0], [], []>} : vector<8x32xf32>, vector<8x32xf32>, vector<8x8xf32> -> vector<8x8xf32>
    %cst_99 = arith.constant 0.176776692 : f32
    %200 = vector.broadcast %cst_99 : f32 to vector<8x8xf32>
    %201 = arith.mulf %199, %200 : vector<8x8xf32>
    %cst_100 = arith.constant dense<0xFF800000> : vector<8xf32>
    %202 = vector.multi_reduction <maximumf>, %201, %cst_100 [1] : vector<8x8xf32> to vector<8xf32>
    %203 = vector.shape_cast %202 : vector<8xf32> to vector<8x1xf32>
    %204 = vector.broadcast %203 : vector<8x1xf32> to vector<8x8xf32>
    %205 = arith.subf %201, %204 : vector<8x8xf32>
    %206 = math.exp %205 : vector<8x8xf32>
    %cst_101 = arith.constant dense<0.000000e+00> : vector<8xf32>
    %207 = vector.multi_reduction <add>, %206, %cst_101 [1] : vector<8x8xf32> to vector<8xf32>
    %208 = vector.shape_cast %207 : vector<8xf32> to vector<8x1xf32>
    %209 = vector.broadcast %208 : vector<8x1xf32> to vector<8x8xf32>
    %210 = arith.divf %206, %209 : vector<8x8xf32>
    %cst_102 = arith.constant dense<0.000000e+00> : vector<8x32xf32>
    %211 = tpu.matmul %210, %198, %cst_102 {dimension_numbers = #tpu.dot_dimension_numbers<[1], [0], [0], [1], [0, 0, 1, 1], [], []>} : vector<8x8xf32>, vector<8x32xf32>, vector<8x32xf32> -> vector<8x32xf32>
    %212 = vector.extract_strided_slice %172 {offsets = [32, 0], sizes = [32, 128], strides = [1, 1]} : vector<128x128xf32> to vector<32x128xf32>
    %cst_103 = arith.constant dense<0.000000e+00> : vector<8x128xf32>
    %213 = tpu.matmul %211, %212, %cst_103 {dimension_numbers = #tpu.dot_dimension_numbers<[1], [0], [0], [1], [0, 0, 1, 1], [], []>} : vector<8x32xf32>, vector<32x128xf32>, vector<8x128xf32> -> vector<8x128xf32>
    %214 = arith.addf %195, %213 : vector<8x128xf32>
    %215 = vector.extract_strided_slice %177 {offsets = [0, 64], sizes = [8, 32], strides = [1, 1]} : vector<8x384xf32> to vector<8x32xf32>
    %216 = vector.extract_strided_slice %177 {offsets = [0, 192], sizes = [8, 32], strides = [1, 1]} : vector<8x384xf32> to vector<8x32xf32>
    %217 = vector.extract_strided_slice %177 {offsets = [0, 320], sizes = [8, 32], strides = [1, 1]} : vector<8x384xf32> to vector<8x32xf32>
    %cst_104 = arith.constant dense<0.000000e+00> : vector<8x8xf32>
    %218 = tpu.matmul %215, %216, %cst_104 {dimension_numbers = #tpu.dot_dimension_numbers<[1], [1], [0], [0], [0, 0, 1, 0], [], []>} : vector<8x32xf32>, vector<8x32xf32>, vector<8x8xf32> -> vector<8x8xf32>
    %cst_105 = arith.constant 0.176776692 : f32
    %219 = vector.broadcast %cst_105 : f32 to vector<8x8xf32>
    %220 = arith.mulf %218, %219 : vector<8x8xf32>
    %cst_106 = arith.constant dense<0xFF800000> : vector<8xf32>
    %221 = vector.multi_reduction <maximumf>, %220, %cst_106 [1] : vector<8x8xf32> to vector<8xf32>
    %222 = vector.shape_cast %221 : vector<8xf32> to vector<8x1xf32>
    %223 = vector.broadcast %222 : vector<8x1xf32> to vector<8x8xf32>
    %224 = arith.subf %220, %223 : vector<8x8xf32>
    %225 = math.exp %224 : vector<8x8xf32>
    %cst_107 = arith.constant dense<0.000000e+00> : vector<8xf32>
    %226 = vector.multi_reduction <add>, %225, %cst_107 [1] : vector<8x8xf32> to vector<8xf32>
    %227 = vector.shape_cast %226 : vector<8xf32> to vector<8x1xf32>
    %228 = vector.broadcast %227 : vector<8x1xf32> to vector<8x8xf32>
    %229 = arith.divf %225, %228 : vector<8x8xf32>
    %cst_108 = arith.constant dense<0.000000e+00> : vector<8x32xf32>
    %230 = tpu.matmul %229, %217, %cst_108 {dimension_numbers = #tpu.dot_dimension_numbers<[1], [0], [0], [1], [0, 0, 1, 1], [], []>} : vector<8x8xf32>, vector<8x32xf32>, vector<8x32xf32> -> vector<8x32xf32>
    %231 = vector.extract_strided_slice %172 {offsets = [64, 0], sizes = [32, 128], strides = [1, 1]} : vector<128x128xf32> to vector<32x128xf32>
    %cst_109 = arith.constant dense<0.000000e+00> : vector<8x128xf32>
    %232 = tpu.matmul %230, %231, %cst_109 {dimension_numbers = #tpu.dot_dimension_numbers<[1], [0], [0], [1], [0, 0, 1, 1], [], []>} : vector<8x32xf32>, vector<32x128xf32>, vector<8x128xf32> -> vector<8x128xf32>
    %233 = arith.addf %214, %232 : vector<8x128xf32>
    %234 = vector.extract_strided_slice %177 {offsets = [0, 96], sizes = [8, 32], strides = [1, 1]} : vector<8x384xf32> to vector<8x32xf32>
    %235 = vector.extract_strided_slice %177 {offsets = [0, 224], sizes = [8, 32], strides = [1, 1]} : vector<8x384xf32> to vector<8x32xf32>
    %236 = vector.extract_strided_slice %177 {offsets = [0, 352], sizes = [8, 32], strides = [1, 1]} : vector<8x384xf32> to vector<8x32xf32>
    %cst_110 = arith.constant dense<0.000000e+00> : vector<8x8xf32>
    %237 = tpu.matmul %234, %235, %cst_110 {dimension_numbers = #tpu.dot_dimension_numbers<[1], [1], [0], [0], [0, 0, 1, 0], [], []>} : vector<8x32xf32>, vector<8x32xf32>, vector<8x8xf32> -> vector<8x8xf32>
    %cst_111 = arith.constant 0.176776692 : f32
    %238 = vector.broadcast %cst_111 : f32 to vector<8x8xf32>
    %239 = arith.mulf %237, %238 : vector<8x8xf32>
    %cst_112 = arith.constant dense<0xFF800000> : vector<8xf32>
    %240 = vector.multi_reduction <maximumf>, %239, %cst_112 [1] : vector<8x8xf32> to vector<8xf32>
    %241 = vector.shape_cast %240 : vector<8xf32> to vector<8x1xf32>
    %242 = vector.broadcast %241 : vector<8x1xf32> to vector<8x8xf32>
    %243 = arith.subf %239, %242 : vector<8x8xf32>
    %244 = math.exp %243 : vector<8x8xf32>
    %cst_113 = arith.constant dense<0.000000e+00> : vector<8xf32>
    %245 = vector.multi_reduction <add>, %244, %cst_113 [1] : vector<8x8xf32> to vector<8xf32>
    %246 = vector.shape_cast %245 : vector<8xf32> to vector<8x1xf32>
    %247 = vector.broadcast %246 : vector<8x1xf32> to vector<8x8xf32>
    %248 = arith.divf %244, %247 : vector<8x8xf32>
    %cst_114 = arith.constant dense<0.000000e+00> : vector<8x32xf32>
    %249 = tpu.matmul %248, %236, %cst_114 {dimension_numbers = #tpu.dot_dimension_numbers<[1], [0], [0], [1], [0, 0, 1, 1], [], []>} : vector<8x8xf32>, vector<8x32xf32>, vector<8x32xf32> -> vector<8x32xf32>
    %250 = vector.extract_strided_slice %172 {offsets = [96, 0], sizes = [32, 128], strides = [1, 1]} : vector<128x128xf32> to vector<32x128xf32>
    %cst_115 = arith.constant dense<0.000000e+00> : vector<8x128xf32>
    %251 = tpu.matmul %249, %250, %cst_115 {dimension_numbers = #tpu.dot_dimension_numbers<[1], [0], [0], [1], [0, 0, 1, 1], [], []>} : vector<8x32xf32>, vector<32x128xf32>, vector<8x128xf32> -> vector<8x128xf32>
    %252 = arith.addf %233, %251 : vector<8x128xf32>
    %c1_116 = arith.constant 1 : index
    %c0_117 = arith.constant 0 : index
    %c0_118 = arith.constant 0 : index
    %253 = vector.load %arg8[%c1_116, %c0_117, %c0_118] : memref<3x1x128xf32, #tpu.memory_space<vmem>>, vector<1x1x128xf32>
    %254 = vector.shape_cast %253 : vector<1x1x128xf32> to vector<1x128xf32>
    %255 = vector.broadcast %254 : vector<1x128xf32> to vector<8x128xf32>
    %256 = arith.addf %252, %255 : vector<8x128xf32>
    %257 = arith.addf %168, %256 : vector<8x128xf32>
    %c1_119 = arith.constant 1 : index
    %c0_120 = arith.constant 0 : index
    %c0_121 = arith.constant 0 : index
    %258 = vector.load %arg9[%c1_119, %c0_120, %c0_121] : memref<3x1x128xf32, #tpu.memory_space<vmem>>, vector<1x1x128xf32>
    %259 = vector.shape_cast %258 : vector<1x1x128xf32> to vector<1x128xf32>
    %c1_122 = arith.constant 1 : index
    %c0_123 = arith.constant 0 : index
    %c0_124 = arith.constant 0 : index
    %260 = vector.load %arg10[%c1_122, %c0_123, %c0_124] : memref<3x1x128xf32, #tpu.memory_space<vmem>>, vector<1x1x128xf32>
    %261 = vector.shape_cast %260 : vector<1x1x128xf32> to vector<1x128xf32>
    %cst_125 = arith.constant dense<0.000000e+00> : vector<8xf32>
    %262 = vector.multi_reduction <add>, %257, %cst_125 [1] : vector<8x128xf32> to vector<8xf32>
    %263 = vector.shape_cast %262 : vector<8xf32> to vector<8x1xf32>
    %cst_126 = arith.constant 1.280000e+02 : f32
    %264 = vector.broadcast %cst_126 : f32 to vector<8x1xf32>
    %265 = arith.divf %263, %264 : vector<8x1xf32>
    %266 = vector.broadcast %265 : vector<8x1xf32> to vector<8x128xf32>
    %267 = arith.subf %257, %266 : vector<8x128xf32>
    %268 = arith.mulf %267, %267 : vector<8x128xf32>
    %cst_127 = arith.constant dense<0.000000e+00> : vector<8xf32>
    %269 = vector.multi_reduction <add>, %268, %cst_127 [1] : vector<8x128xf32> to vector<8xf32>
    %270 = vector.shape_cast %269 : vector<8xf32> to vector<8x1xf32>
    %cst_128 = arith.constant 1.280000e+02 : f32
    %271 = vector.broadcast %cst_128 : f32 to vector<8x1xf32>
    %272 = arith.divf %270, %271 : vector<8x1xf32>
    %273 = vector.broadcast %265 : vector<8x1xf32> to vector<8x128xf32>
    %274 = arith.subf %257, %273 : vector<8x128xf32>
    %cst_129 = arith.constant 9.99999974E-6 : f32
    %275 = vector.broadcast %cst_129 : f32 to vector<8x1xf32>
    %276 = arith.addf %272, %275 : vector<8x1xf32>
    %277 = math.rsqrt %276 : vector<8x1xf32>
    %278 = vector.broadcast %277 : vector<8x1xf32> to vector<8x128xf32>
    %279 = arith.mulf %274, %278 : vector<8x128xf32>
    %280 = vector.broadcast %259 : vector<1x128xf32> to vector<8x128xf32>
    %281 = arith.mulf %279, %280 : vector<8x128xf32>
    %282 = vector.broadcast %261 : vector<1x128xf32> to vector<8x128xf32>
    %283 = arith.addf %281, %282 : vector<8x128xf32>
    %c1_130 = arith.constant 1 : index
    %c0_131 = arith.constant 0 : index
    %c0_132 = arith.constant 0 : index
    %284 = vector.load %arg11[%c1_130, %c0_131, %c0_132] : memref<3x128x256xf32, #tpu.memory_space<vmem>>, vector<1x128x256xf32>
    %285 = vector.shape_cast %284 : vector<1x128x256xf32> to vector<128x256xf32>
    %cst_133 = arith.constant dense<0.000000e+00> : vector<8x256xf32>
    %286 = tpu.matmul %283, %285, %cst_133 {dimension_numbers = #tpu.dot_dimension_numbers<[1], [0], [0], [1], [0, 0, 1, 1], [], []>} : vector<8x128xf32>, vector<128x256xf32>, vector<8x256xf32> -> vector<8x256xf32>
    %c1_134 = arith.constant 1 : index
    %c0_135 = arith.constant 0 : index
    %c0_136 = arith.constant 0 : index
    %287 = vector.load %arg12[%c1_134, %c0_135, %c0_136] : memref<3x1x256xf32, #tpu.memory_space<vmem>>, vector<1x1x256xf32>
    %288 = vector.shape_cast %287 : vector<1x1x256xf32> to vector<1x256xf32>
    %289 = vector.broadcast %288 : vector<1x256xf32> to vector<8x256xf32>
    %290 = arith.addf %286, %289 : vector<8x256xf32>
    %cst_137 = arith.constant 0.000000e+00 : f32
    %291 = vector.broadcast %cst_137 : f32 to vector<8x256xf32>
    %292 = arith.maximumf %290, %291 : vector<8x256xf32>
    %c1_138 = arith.constant 1 : index
    %c0_139 = arith.constant 0 : index
    %c0_140 = arith.constant 0 : index
    %293 = vector.load %arg13[%c1_138, %c0_139, %c0_140] : memref<3x256x128xf32, #tpu.memory_space<vmem>>, vector<1x256x128xf32>
    %294 = vector.shape_cast %293 : vector<1x256x128xf32> to vector<256x128xf32>
    %cst_141 = arith.constant dense<0.000000e+00> : vector<8x128xf32>
    %295 = tpu.matmul %292, %294, %cst_141 {dimension_numbers = #tpu.dot_dimension_numbers<[1], [0], [0], [1], [0, 0, 1, 1], [], []>} : vector<8x256xf32>, vector<256x128xf32>, vector<8x128xf32> -> vector<8x128xf32>
    %c1_142 = arith.constant 1 : index
    %c0_143 = arith.constant 0 : index
    %c0_144 = arith.constant 0 : index
    %296 = vector.load %arg14[%c1_142, %c0_143, %c0_144] : memref<3x1x128xf32, #tpu.memory_space<vmem>>, vector<1x1x128xf32>
    %297 = vector.shape_cast %296 : vector<1x1x128xf32> to vector<1x128xf32>
    %298 = vector.broadcast %297 : vector<1x128xf32> to vector<8x128xf32>
    %299 = arith.addf %295, %298 : vector<8x128xf32>
    %300 = arith.addf %283, %299 : vector<8x128xf32>
    %c1_145 = arith.constant 1 : index
    %c0_146 = arith.constant 0 : index
    %c0_147 = arith.constant 0 : index
    %301 = vector.load %arg15[%c1_145, %c0_146, %c0_147] : memref<3x1x128xf32, #tpu.memory_space<vmem>>, vector<1x1x128xf32>
    %302 = vector.shape_cast %301 : vector<1x1x128xf32> to vector<1x128xf32>
    %c1_148 = arith.constant 1 : index
    %c0_149 = arith.constant 0 : index
    %c0_150 = arith.constant 0 : index
    %303 = vector.load %arg16[%c1_148, %c0_149, %c0_150] : memref<3x1x128xf32, #tpu.memory_space<vmem>>, vector<1x1x128xf32>
    %304 = vector.shape_cast %303 : vector<1x1x128xf32> to vector<1x128xf32>
    %cst_151 = arith.constant dense<0.000000e+00> : vector<8xf32>
    %305 = vector.multi_reduction <add>, %300, %cst_151 [1] : vector<8x128xf32> to vector<8xf32>
    %306 = vector.shape_cast %305 : vector<8xf32> to vector<8x1xf32>
    %cst_152 = arith.constant 1.280000e+02 : f32
    %307 = vector.broadcast %cst_152 : f32 to vector<8x1xf32>
    %308 = arith.divf %306, %307 : vector<8x1xf32>
    %309 = vector.broadcast %308 : vector<8x1xf32> to vector<8x128xf32>
    %310 = arith.subf %300, %309 : vector<8x128xf32>
    %311 = arith.mulf %310, %310 : vector<8x128xf32>
    %cst_153 = arith.constant dense<0.000000e+00> : vector<8xf32>
    %312 = vector.multi_reduction <add>, %311, %cst_153 [1] : vector<8x128xf32> to vector<8xf32>
    %313 = vector.shape_cast %312 : vector<8xf32> to vector<8x1xf32>
    %cst_154 = arith.constant 1.280000e+02 : f32
    %314 = vector.broadcast %cst_154 : f32 to vector<8x1xf32>
    %315 = arith.divf %313, %314 : vector<8x1xf32>
    %316 = vector.broadcast %308 : vector<8x1xf32> to vector<8x128xf32>
    %317 = arith.subf %300, %316 : vector<8x128xf32>
    %cst_155 = arith.constant 9.99999974E-6 : f32
    %318 = vector.broadcast %cst_155 : f32 to vector<8x1xf32>
    %319 = arith.addf %315, %318 : vector<8x1xf32>
    %320 = math.rsqrt %319 : vector<8x1xf32>
    %321 = vector.broadcast %320 : vector<8x1xf32> to vector<8x128xf32>
    %322 = arith.mulf %317, %321 : vector<8x128xf32>
    %323 = vector.broadcast %302 : vector<1x128xf32> to vector<8x128xf32>
    %324 = arith.mulf %322, %323 : vector<8x128xf32>
    %325 = vector.broadcast %304 : vector<1x128xf32> to vector<8x128xf32>
    %326 = arith.addf %324, %325 : vector<8x128xf32>
    %c2 = arith.constant 2 : index
    %c0_156 = arith.constant 0 : index
    %c0_157 = arith.constant 0 : index
    %327 = vector.load %arg5[%c2, %c0_156, %c0_157] : memref<3x128x384xf32, #tpu.memory_space<vmem>>, vector<1x128x384xf32>
    %328 = vector.shape_cast %327 : vector<1x128x384xf32> to vector<128x384xf32>
    %c2_158 = arith.constant 2 : index
    %c0_159 = arith.constant 0 : index
    %c0_160 = arith.constant 0 : index
    %329 = vector.load %arg7[%c2_158, %c0_159, %c0_160] : memref<3x128x128xf32, #tpu.memory_space<vmem>>, vector<1x128x128xf32>
    %330 = vector.shape_cast %329 : vector<1x128x128xf32> to vector<128x128xf32>
    %cst_161 = arith.constant dense<0.000000e+00> : vector<8x384xf32>
    %331 = tpu.matmul %326, %328, %cst_161 {dimension_numbers = #tpu.dot_dimension_numbers<[1], [0], [0], [1], [0, 0, 1, 1], [], []>} : vector<8x128xf32>, vector<128x384xf32>, vector<8x384xf32> -> vector<8x384xf32>
    %c2_162 = arith.constant 2 : index
    %c0_163 = arith.constant 0 : index
    %c0_164 = arith.constant 0 : index
    %332 = vector.load %arg6[%c2_162, %c0_163, %c0_164] : memref<3x1x384xf32, #tpu.memory_space<vmem>>, vector<1x1x384xf32>
    %333 = vector.shape_cast %332 : vector<1x1x384xf32> to vector<1x384xf32>
    %334 = vector.broadcast %333 : vector<1x384xf32> to vector<8x384xf32>
    %335 = arith.addf %331, %334 : vector<8x384xf32>
    %336 = vector.extract_strided_slice %335 {offsets = [0, 0], sizes = [8, 32], strides = [1, 1]} : vector<8x384xf32> to vector<8x32xf32>
    %337 = vector.extract_strided_slice %335 {offsets = [0, 128], sizes = [8, 32], strides = [1, 1]} : vector<8x384xf32> to vector<8x32xf32>
    %338 = vector.extract_strided_slice %335 {offsets = [0, 256], sizes = [8, 32], strides = [1, 1]} : vector<8x384xf32> to vector<8x32xf32>
    %cst_165 = arith.constant dense<0.000000e+00> : vector<8x8xf32>
    %339 = tpu.matmul %336, %337, %cst_165 {dimension_numbers = #tpu.dot_dimension_numbers<[1], [1], [0], [0], [0, 0, 1, 0], [], []>} : vector<8x32xf32>, vector<8x32xf32>, vector<8x8xf32> -> vector<8x8xf32>
    %cst_166 = arith.constant 0.176776692 : f32
    %340 = vector.broadcast %cst_166 : f32 to vector<8x8xf32>
    %341 = arith.mulf %339, %340 : vector<8x8xf32>
    %cst_167 = arith.constant dense<0xFF800000> : vector<8xf32>
    %342 = vector.multi_reduction <maximumf>, %341, %cst_167 [1] : vector<8x8xf32> to vector<8xf32>
    %343 = vector.shape_cast %342 : vector<8xf32> to vector<8x1xf32>
    %344 = vector.broadcast %343 : vector<8x1xf32> to vector<8x8xf32>
    %345 = arith.subf %341, %344 : vector<8x8xf32>
    %346 = math.exp %345 : vector<8x8xf32>
    %cst_168 = arith.constant dense<0.000000e+00> : vector<8xf32>
    %347 = vector.multi_reduction <add>, %346, %cst_168 [1] : vector<8x8xf32> to vector<8xf32>
    %348 = vector.shape_cast %347 : vector<8xf32> to vector<8x1xf32>
    %349 = vector.broadcast %348 : vector<8x1xf32> to vector<8x8xf32>
    %350 = arith.divf %346, %349 : vector<8x8xf32>
    %cst_169 = arith.constant dense<0.000000e+00> : vector<8x32xf32>
    %351 = tpu.matmul %350, %338, %cst_169 {dimension_numbers = #tpu.dot_dimension_numbers<[1], [0], [0], [1], [0, 0, 1, 1], [], []>} : vector<8x8xf32>, vector<8x32xf32>, vector<8x32xf32> -> vector<8x32xf32>
    %352 = vector.extract_strided_slice %330 {offsets = [0, 0], sizes = [32, 128], strides = [1, 1]} : vector<128x128xf32> to vector<32x128xf32>
    %cst_170 = arith.constant dense<0.000000e+00> : vector<8x128xf32>
    %353 = tpu.matmul %351, %352, %cst_170 {dimension_numbers = #tpu.dot_dimension_numbers<[1], [0], [0], [1], [0, 0, 1, 1], [], []>} : vector<8x32xf32>, vector<32x128xf32>, vector<8x128xf32> -> vector<8x128xf32>
    %354 = vector.extract_strided_slice %335 {offsets = [0, 32], sizes = [8, 32], strides = [1, 1]} : vector<8x384xf32> to vector<8x32xf32>
    %355 = vector.extract_strided_slice %335 {offsets = [0, 160], sizes = [8, 32], strides = [1, 1]} : vector<8x384xf32> to vector<8x32xf32>
    %356 = vector.extract_strided_slice %335 {offsets = [0, 288], sizes = [8, 32], strides = [1, 1]} : vector<8x384xf32> to vector<8x32xf32>
    %cst_171 = arith.constant dense<0.000000e+00> : vector<8x8xf32>
    %357 = tpu.matmul %354, %355, %cst_171 {dimension_numbers = #tpu.dot_dimension_numbers<[1], [1], [0], [0], [0, 0, 1, 0], [], []>} : vector<8x32xf32>, vector<8x32xf32>, vector<8x8xf32> -> vector<8x8xf32>
    %cst_172 = arith.constant 0.176776692 : f32
    %358 = vector.broadcast %cst_172 : f32 to vector<8x8xf32>
    %359 = arith.mulf %357, %358 : vector<8x8xf32>
    %cst_173 = arith.constant dense<0xFF800000> : vector<8xf32>
    %360 = vector.multi_reduction <maximumf>, %359, %cst_173 [1] : vector<8x8xf32> to vector<8xf32>
    %361 = vector.shape_cast %360 : vector<8xf32> to vector<8x1xf32>
    %362 = vector.broadcast %361 : vector<8x1xf32> to vector<8x8xf32>
    %363 = arith.subf %359, %362 : vector<8x8xf32>
    %364 = math.exp %363 : vector<8x8xf32>
    %cst_174 = arith.constant dense<0.000000e+00> : vector<8xf32>
    %365 = vector.multi_reduction <add>, %364, %cst_174 [1] : vector<8x8xf32> to vector<8xf32>
    %366 = vector.shape_cast %365 : vector<8xf32> to vector<8x1xf32>
    %367 = vector.broadcast %366 : vector<8x1xf32> to vector<8x8xf32>
    %368 = arith.divf %364, %367 : vector<8x8xf32>
    %cst_175 = arith.constant dense<0.000000e+00> : vector<8x32xf32>
    %369 = tpu.matmul %368, %356, %cst_175 {dimension_numbers = #tpu.dot_dimension_numbers<[1], [0], [0], [1], [0, 0, 1, 1], [], []>} : vector<8x8xf32>, vector<8x32xf32>, vector<8x32xf32> -> vector<8x32xf32>
    %370 = vector.extract_strided_slice %330 {offsets = [32, 0], sizes = [32, 128], strides = [1, 1]} : vector<128x128xf32> to vector<32x128xf32>
    %cst_176 = arith.constant dense<0.000000e+00> : vector<8x128xf32>
    %371 = tpu.matmul %369, %370, %cst_176 {dimension_numbers = #tpu.dot_dimension_numbers<[1], [0], [0], [1], [0, 0, 1, 1], [], []>} : vector<8x32xf32>, vector<32x128xf32>, vector<8x128xf32> -> vector<8x128xf32>
    %372 = arith.addf %353, %371 : vector<8x128xf32>
    %373 = vector.extract_strided_slice %335 {offsets = [0, 64], sizes = [8, 32], strides = [1, 1]} : vector<8x384xf32> to vector<8x32xf32>
    %374 = vector.extract_strided_slice %335 {offsets = [0, 192], sizes = [8, 32], strides = [1, 1]} : vector<8x384xf32> to vector<8x32xf32>
    %375 = vector.extract_strided_slice %335 {offsets = [0, 320], sizes = [8, 32], strides = [1, 1]} : vector<8x384xf32> to vector<8x32xf32>
    %cst_177 = arith.constant dense<0.000000e+00> : vector<8x8xf32>
    %376 = tpu.matmul %373, %374, %cst_177 {dimension_numbers = #tpu.dot_dimension_numbers<[1], [1], [0], [0], [0, 0, 1, 0], [], []>} : vector<8x32xf32>, vector<8x32xf32>, vector<8x8xf32> -> vector<8x8xf32>
    %cst_178 = arith.constant 0.176776692 : f32
    %377 = vector.broadcast %cst_178 : f32 to vector<8x8xf32>
    %378 = arith.mulf %376, %377 : vector<8x8xf32>
    %cst_179 = arith.constant dense<0xFF800000> : vector<8xf32>
    %379 = vector.multi_reduction <maximumf>, %378, %cst_179 [1] : vector<8x8xf32> to vector<8xf32>
    %380 = vector.shape_cast %379 : vector<8xf32> to vector<8x1xf32>
    %381 = vector.broadcast %380 : vector<8x1xf32> to vector<8x8xf32>
    %382 = arith.subf %378, %381 : vector<8x8xf32>
    %383 = math.exp %382 : vector<8x8xf32>
    %cst_180 = arith.constant dense<0.000000e+00> : vector<8xf32>
    %384 = vector.multi_reduction <add>, %383, %cst_180 [1] : vector<8x8xf32> to vector<8xf32>
    %385 = vector.shape_cast %384 : vector<8xf32> to vector<8x1xf32>
    %386 = vector.broadcast %385 : vector<8x1xf32> to vector<8x8xf32>
    %387 = arith.divf %383, %386 : vector<8x8xf32>
    %cst_181 = arith.constant dense<0.000000e+00> : vector<8x32xf32>
    %388 = tpu.matmul %387, %375, %cst_181 {dimension_numbers = #tpu.dot_dimension_numbers<[1], [0], [0], [1], [0, 0, 1, 1], [], []>} : vector<8x8xf32>, vector<8x32xf32>, vector<8x32xf32> -> vector<8x32xf32>
    %389 = vector.extract_strided_slice %330 {offsets = [64, 0], sizes = [32, 128], strides = [1, 1]} : vector<128x128xf32> to vector<32x128xf32>
    %cst_182 = arith.constant dense<0.000000e+00> : vector<8x128xf32>
    %390 = tpu.matmul %388, %389, %cst_182 {dimension_numbers = #tpu.dot_dimension_numbers<[1], [0], [0], [1], [0, 0, 1, 1], [], []>} : vector<8x32xf32>, vector<32x128xf32>, vector<8x128xf32> -> vector<8x128xf32>
    %391 = arith.addf %372, %390 : vector<8x128xf32>
    %392 = vector.extract_strided_slice %335 {offsets = [0, 96], sizes = [8, 32], strides = [1, 1]} : vector<8x384xf32> to vector<8x32xf32>
    %393 = vector.extract_strided_slice %335 {offsets = [0, 224], sizes = [8, 32], strides = [1, 1]} : vector<8x384xf32> to vector<8x32xf32>
    %394 = vector.extract_strided_slice %335 {offsets = [0, 352], sizes = [8, 32], strides = [1, 1]} : vector<8x384xf32> to vector<8x32xf32>
    %cst_183 = arith.constant dense<0.000000e+00> : vector<8x8xf32>
    %395 = tpu.matmul %392, %393, %cst_183 {dimension_numbers = #tpu.dot_dimension_numbers<[1], [1], [0], [0], [0, 0, 1, 0], [], []>} : vector<8x32xf32>, vector<8x32xf32>, vector<8x8xf32> -> vector<8x8xf32>
    %cst_184 = arith.constant 0.176776692 : f32
    %396 = vector.broadcast %cst_184 : f32 to vector<8x8xf32>
    %397 = arith.mulf %395, %396 : vector<8x8xf32>
    %cst_185 = arith.constant dense<0xFF800000> : vector<8xf32>
    %398 = vector.multi_reduction <maximumf>, %397, %cst_185 [1] : vector<8x8xf32> to vector<8xf32>
    %399 = vector.shape_cast %398 : vector<8xf32> to vector<8x1xf32>
    %400 = vector.broadcast %399 : vector<8x1xf32> to vector<8x8xf32>
    %401 = arith.subf %397, %400 : vector<8x8xf32>
    %402 = math.exp %401 : vector<8x8xf32>
    %cst_186 = arith.constant dense<0.000000e+00> : vector<8xf32>
    %403 = vector.multi_reduction <add>, %402, %cst_186 [1] : vector<8x8xf32> to vector<8xf32>
    %404 = vector.shape_cast %403 : vector<8xf32> to vector<8x1xf32>
    %405 = vector.broadcast %404 : vector<8x1xf32> to vector<8x8xf32>
    %406 = arith.divf %402, %405 : vector<8x8xf32>
    %cst_187 = arith.constant dense<0.000000e+00> : vector<8x32xf32>
    %407 = tpu.matmul %406, %394, %cst_187 {dimension_numbers = #tpu.dot_dimension_numbers<[1], [0], [0], [1], [0, 0, 1, 1], [], []>} : vector<8x8xf32>, vector<8x32xf32>, vector<8x32xf32> -> vector<8x32xf32>
    %408 = vector.extract_strided_slice %330 {offsets = [96, 0], sizes = [32, 128], strides = [1, 1]} : vector<128x128xf32> to vector<32x128xf32>
    %cst_188 = arith.constant dense<0.000000e+00> : vector<8x128xf32>
    %409 = tpu.matmul %407, %408, %cst_188 {dimension_numbers = #tpu.dot_dimension_numbers<[1], [0], [0], [1], [0, 0, 1, 1], [], []>} : vector<8x32xf32>, vector<32x128xf32>, vector<8x128xf32> -> vector<8x128xf32>
    %410 = arith.addf %391, %409 : vector<8x128xf32>
    %c2_189 = arith.constant 2 : index
    %c0_190 = arith.constant 0 : index
    %c0_191 = arith.constant 0 : index
    %411 = vector.load %arg8[%c2_189, %c0_190, %c0_191] : memref<3x1x128xf32, #tpu.memory_space<vmem>>, vector<1x1x128xf32>
    %412 = vector.shape_cast %411 : vector<1x1x128xf32> to vector<1x128xf32>
    %413 = vector.broadcast %412 : vector<1x128xf32> to vector<8x128xf32>
    %414 = arith.addf %410, %413 : vector<8x128xf32>
    %415 = arith.addf %326, %414 : vector<8x128xf32>
    %c2_192 = arith.constant 2 : index
    %c0_193 = arith.constant 0 : index
    %c0_194 = arith.constant 0 : index
    %416 = vector.load %arg9[%c2_192, %c0_193, %c0_194] : memref<3x1x128xf32, #tpu.memory_space<vmem>>, vector<1x1x128xf32>
    %417 = vector.shape_cast %416 : vector<1x1x128xf32> to vector<1x128xf32>
    %c2_195 = arith.constant 2 : index
    %c0_196 = arith.constant 0 : index
    %c0_197 = arith.constant 0 : index
    %418 = vector.load %arg10[%c2_195, %c0_196, %c0_197] : memref<3x1x128xf32, #tpu.memory_space<vmem>>, vector<1x1x128xf32>
    %419 = vector.shape_cast %418 : vector<1x1x128xf32> to vector<1x128xf32>
    %cst_198 = arith.constant dense<0.000000e+00> : vector<8xf32>
    %420 = vector.multi_reduction <add>, %415, %cst_198 [1] : vector<8x128xf32> to vector<8xf32>
    %421 = vector.shape_cast %420 : vector<8xf32> to vector<8x1xf32>
    %cst_199 = arith.constant 1.280000e+02 : f32
    %422 = vector.broadcast %cst_199 : f32 to vector<8x1xf32>
    %423 = arith.divf %421, %422 : vector<8x1xf32>
    %424 = vector.broadcast %423 : vector<8x1xf32> to vector<8x128xf32>
    %425 = arith.subf %415, %424 : vector<8x128xf32>
    %426 = arith.mulf %425, %425 : vector<8x128xf32>
    %cst_200 = arith.constant dense<0.000000e+00> : vector<8xf32>
    %427 = vector.multi_reduction <add>, %426, %cst_200 [1] : vector<8x128xf32> to vector<8xf32>
    %428 = vector.shape_cast %427 : vector<8xf32> to vector<8x1xf32>
    %cst_201 = arith.constant 1.280000e+02 : f32
    %429 = vector.broadcast %cst_201 : f32 to vector<8x1xf32>
    %430 = arith.divf %428, %429 : vector<8x1xf32>
    %431 = vector.broadcast %423 : vector<8x1xf32> to vector<8x128xf32>
    %432 = arith.subf %415, %431 : vector<8x128xf32>
    %cst_202 = arith.constant 9.99999974E-6 : f32
    %433 = vector.broadcast %cst_202 : f32 to vector<8x1xf32>
    %434 = arith.addf %430, %433 : vector<8x1xf32>
    %435 = math.rsqrt %434 : vector<8x1xf32>
    %436 = vector.broadcast %435 : vector<8x1xf32> to vector<8x128xf32>
    %437 = arith.mulf %432, %436 : vector<8x128xf32>
    %438 = vector.broadcast %417 : vector<1x128xf32> to vector<8x128xf32>
    %439 = arith.mulf %437, %438 : vector<8x128xf32>
    %440 = vector.broadcast %419 : vector<1x128xf32> to vector<8x128xf32>
    %441 = arith.addf %439, %440 : vector<8x128xf32>
    %c2_203 = arith.constant 2 : index
    %c0_204 = arith.constant 0 : index
    %c0_205 = arith.constant 0 : index
    %442 = vector.load %arg11[%c2_203, %c0_204, %c0_205] : memref<3x128x256xf32, #tpu.memory_space<vmem>>, vector<1x128x256xf32>
    %443 = vector.shape_cast %442 : vector<1x128x256xf32> to vector<128x256xf32>
    %cst_206 = arith.constant dense<0.000000e+00> : vector<8x256xf32>
    %444 = tpu.matmul %441, %443, %cst_206 {dimension_numbers = #tpu.dot_dimension_numbers<[1], [0], [0], [1], [0, 0, 1, 1], [], []>} : vector<8x128xf32>, vector<128x256xf32>, vector<8x256xf32> -> vector<8x256xf32>
    %c2_207 = arith.constant 2 : index
    %c0_208 = arith.constant 0 : index
    %c0_209 = arith.constant 0 : index
    %445 = vector.load %arg12[%c2_207, %c0_208, %c0_209] : memref<3x1x256xf32, #tpu.memory_space<vmem>>, vector<1x1x256xf32>
    %446 = vector.shape_cast %445 : vector<1x1x256xf32> to vector<1x256xf32>
    %447 = vector.broadcast %446 : vector<1x256xf32> to vector<8x256xf32>
    %448 = arith.addf %444, %447 : vector<8x256xf32>
    %cst_210 = arith.constant 0.000000e+00 : f32
    %449 = vector.broadcast %cst_210 : f32 to vector<8x256xf32>
    %450 = arith.maximumf %448, %449 : vector<8x256xf32>
    %c2_211 = arith.constant 2 : index
    %c0_212 = arith.constant 0 : index
    %c0_213 = arith.constant 0 : index
    %451 = vector.load %arg13[%c2_211, %c0_212, %c0_213] : memref<3x256x128xf32, #tpu.memory_space<vmem>>, vector<1x256x128xf32>
    %452 = vector.shape_cast %451 : vector<1x256x128xf32> to vector<256x128xf32>
    %cst_214 = arith.constant dense<0.000000e+00> : vector<8x128xf32>
    %453 = tpu.matmul %450, %452, %cst_214 {dimension_numbers = #tpu.dot_dimension_numbers<[1], [0], [0], [1], [0, 0, 1, 1], [], []>} : vector<8x256xf32>, vector<256x128xf32>, vector<8x128xf32> -> vector<8x128xf32>
    %c2_215 = arith.constant 2 : index
    %c0_216 = arith.constant 0 : index
    %c0_217 = arith.constant 0 : index
    %454 = vector.load %arg14[%c2_215, %c0_216, %c0_217] : memref<3x1x128xf32, #tpu.memory_space<vmem>>, vector<1x1x128xf32>
    %455 = vector.shape_cast %454 : vector<1x1x128xf32> to vector<1x128xf32>
    %456 = vector.broadcast %455 : vector<1x128xf32> to vector<8x128xf32>
    %457 = arith.addf %453, %456 : vector<8x128xf32>
    %458 = arith.addf %441, %457 : vector<8x128xf32>
    %c2_218 = arith.constant 2 : index
    %c0_219 = arith.constant 0 : index
    %c0_220 = arith.constant 0 : index
    %459 = vector.load %arg15[%c2_218, %c0_219, %c0_220] : memref<3x1x128xf32, #tpu.memory_space<vmem>>, vector<1x1x128xf32>
    %460 = vector.shape_cast %459 : vector<1x1x128xf32> to vector<1x128xf32>
    %c2_221 = arith.constant 2 : index
    %c0_222 = arith.constant 0 : index
    %c0_223 = arith.constant 0 : index
    %461 = vector.load %arg16[%c2_221, %c0_222, %c0_223] : memref<3x1x128xf32, #tpu.memory_space<vmem>>, vector<1x1x128xf32>
    %462 = vector.shape_cast %461 : vector<1x1x128xf32> to vector<1x128xf32>
    %cst_224 = arith.constant dense<0.000000e+00> : vector<8xf32>
    %463 = vector.multi_reduction <add>, %458, %cst_224 [1] : vector<8x128xf32> to vector<8xf32>
    %464 = vector.shape_cast %463 : vector<8xf32> to vector<8x1xf32>
    %cst_225 = arith.constant 1.280000e+02 : f32
    %465 = vector.broadcast %cst_225 : f32 to vector<8x1xf32>
    %466 = arith.divf %464, %465 : vector<8x1xf32>
    %467 = vector.broadcast %466 : vector<8x1xf32> to vector<8x128xf32>
    %468 = arith.subf %458, %467 : vector<8x128xf32>
    %469 = arith.mulf %468, %468 : vector<8x128xf32>
    %cst_226 = arith.constant dense<0.000000e+00> : vector<8xf32>
    %470 = vector.multi_reduction <add>, %469, %cst_226 [1] : vector<8x128xf32> to vector<8xf32>
    %471 = vector.shape_cast %470 : vector<8xf32> to vector<8x1xf32>
    %cst_227 = arith.constant 1.280000e+02 : f32
    %472 = vector.broadcast %cst_227 : f32 to vector<8x1xf32>
    %473 = arith.divf %471, %472 : vector<8x1xf32>
    %474 = vector.broadcast %466 : vector<8x1xf32> to vector<8x128xf32>
    %475 = arith.subf %458, %474 : vector<8x128xf32>
    %cst_228 = arith.constant 9.99999974E-6 : f32
    %476 = vector.broadcast %cst_228 : f32 to vector<8x1xf32>
    %477 = arith.addf %473, %476 : vector<8x1xf32>
    %478 = math.rsqrt %477 : vector<8x1xf32>
    %479 = vector.broadcast %478 : vector<8x1xf32> to vector<8x128xf32>
    %480 = arith.mulf %475, %479 : vector<8x128xf32>
    %481 = vector.broadcast %460 : vector<1x128xf32> to vector<8x128xf32>
    %482 = arith.mulf %480, %481 : vector<8x128xf32>
    %483 = vector.broadcast %462 : vector<1x128xf32> to vector<8x128xf32>
    %484 = arith.addf %482, %483 : vector<8x128xf32>
    %c0_229 = arith.constant 0 : index
    %c0_230 = arith.constant 0 : index
    %485 = vector.load %arg17[%c0_229, %c0_230] : memref<128x144xf32, #tpu.memory_space<vmem>>, vector<128x144xf32>
    %cst_231 = arith.constant dense<0.000000e+00> : vector<8x144xf32>
    %486 = tpu.matmul %484, %485, %cst_231 {dimension_numbers = #tpu.dot_dimension_numbers<[1], [0], [0], [1], [0, 0, 1, 1], [], []>} : vector<8x128xf32>, vector<128x144xf32>, vector<8x144xf32> -> vector<8x144xf32>
    %c0_232 = arith.constant 0 : index
    %c0_233 = arith.constant 0 : index
    %487 = vector.load %arg18[%c0_232, %c0_233] : memref<1x144xf32, #tpu.memory_space<vmem>>, vector<1x144xf32>
    %488 = vector.broadcast %487 : vector<1x144xf32> to vector<8x144xf32>
    %489 = arith.addf %486, %488 : vector<8x144xf32>
    %c0_234 = arith.constant 0 : index
    %c0_235 = arith.constant 0 : index
    %c0_236 = arith.constant 0 : index
    %490 = vector.load %arg19[%c0_234, %c0_235, %c0_236] : memref<1x8x144xf32, #tpu.memory_space<vmem>>, vector<1x8x144xf32>
    %491 = vector.shape_cast %490 : vector<1x8x144xf32> to vector<8x144xf32>
    %492 = vector.shape_cast %489 : vector<8x144xf32> to vector<1x8x144xf32>
    tpu.vector_store %arg19[%c0_234, %c0_235, %c0_236], %492 {strides = array<i32>} : memref<1x8x144xf32, #tpu.memory_space<vmem>>, vector<1x8x144xf32>,
    return
  }
  func.func @transform_0(%arg0: i32) -> (i32, i32, i32) {
    %c0_i32 = arith.constant 0 : i32
    %c0_i32_0 = arith.constant 0 : i32
    %c0_i32_1 = arith.constant 0 : i32
    return %arg0, %c0_i32, %c0_i32_0 : i32, i32, i32
  }
  func.func @transform_1(%arg0: i32) -> (i32, i32) {
    %c0_i32 = arith.constant 0 : i32
    %c0_i32_0 = arith.constant 0 : i32
    %c0_i32_1 = arith.constant 0 : i32
    return %c0_i32, %c0_i32_0 : i32, i32
  }
  func.func @transform_2(%arg0: i32) -> (i32, i32) {
    %c0_i32 = arith.constant 0 : i32
    %c0_i32_0 = arith.constant 0 : i32
    %c0_i32_1 = arith.constant 0 : i32
    return %c0_i32, %c0_i32_0 : i32, i32
  }
  func.func @transform_3(%arg0: i32) -> (i32, i32) {
    %c0_i32 = arith.constant 0 : i32
    %c0_i32_0 = arith.constant 0 : i32
    %c0_i32_1 = arith.constant 0 : i32
    return %c0_i32, %c0_i32_0 : i32, i32
  }
  func.func @transform_4(%arg0: i32) -> (i32, i32, i32) {
    %c0_i32 = arith.constant 0 : i32
    %c0_i32_0 = arith.constant 0 : i32
    %c0_i32_1 = arith.constant 0 : i32
    %c0_i32_2 = arith.constant 0 : i32
    return %c0_i32, %c0_i32_0, %c0_i32_1 : i32, i32, i32
  }
  func.func @transform_5(%arg0: i32) -> (i32, i32, i32) {
    %c0_i32 = arith.constant 0 : i32
    %c0_i32_0 = arith.constant 0 : i32
    %c0_i32_1 = arith.constant 0 : i32
    %c0_i32_2 = arith.constant 0 : i32
    return %c0_i32, %c0_i32_0, %c0_i32_1 : i32, i32, i32
  }
  func.func @transform_6(%arg0: i32) -> (i32, i32, i32) {
    %c0_i32 = arith.constant 0 : i32
    %c0_i32_0 = arith.constant 0 : i32
    %c0_i32_1 = arith.constant 0 : i32
    %c0_i32_2 = arith.constant 0 : i32
    return %c0_i32, %c0_i32_0, %c0_i32_1 : i32, i32, i32
  }
  func.func @transform_7(%arg0: i32) -> (i32, i32, i32) {
    %c0_i32 = arith.constant 0 : i32
    %c0_i32_0 = arith.constant 0 : i32
    %c0_i32_1 = arith.constant 0 : i32
    %c0_i32_2 = arith.constant 0 : i32
    return %c0_i32, %c0_i32_0, %c0_i32_1 : i32, i32, i32
  }
  func.func @transform_8(%arg0: i32) -> (i32, i32, i32) {
    %c0_i32 = arith.constant 0 : i32
    %c0_i32_0 = arith.constant 0 : i32
    %c0_i32_1 = arith.constant 0 : i32
    %c0_i32_2 = arith.constant 0 : i32
    return %c0_i32, %c0_i32_0, %c0_i32_1 : i32, i32, i32
  }
  func.func @transform_9(%arg0: i32) -> (i32, i32, i32) {
    %c0_i32 = arith.constant 0 : i32
    %c0_i32_0 = arith.constant 0 : i32
    %c0_i32_1 = arith.constant 0 : i32
    %c0_i32_2 = arith.constant 0 : i32
    return %c0_i32, %c0_i32_0, %c0_i32_1 : i32, i32, i32
  }
  func.func @transform_10(%arg0: i32) -> (i32, i32, i32) {
    %c0_i32 = arith.constant 0 : i32
    %c0_i32_0 = arith.constant 0 : i32
    %c0_i32_1 = arith.constant 0 : i32
    %c0_i32_2 = arith.constant 0 : i32
    return %c0_i32, %c0_i32_0, %c0_i32_1 : i32, i32, i32
  }
  func.func @transform_11(%arg0: i32) -> (i32, i32, i32) {
    %c0_i32 = arith.constant 0 : i32
    %c0_i32_0 = arith.constant 0 : i32
    %c0_i32_1 = arith.constant 0 : i32
    %c0_i32_2 = arith.constant 0 : i32
    return %c0_i32, %c0_i32_0, %c0_i32_1 : i32, i32, i32
  }
  func.func @transform_12(%arg0: i32) -> (i32, i32, i32) {
    %c0_i32 = arith.constant 0 : i32
    %c0_i32_0 = arith.constant 0 : i32
    %c0_i32_1 = arith.constant 0 : i32
    %c0_i32_2 = arith.constant 0 : i32
    return %c0_i32, %c0_i32_0, %c0_i32_1 : i32, i32, i32
  }
  func.func @transform_13(%arg0: i32) -> (i32, i32, i32) {
    %c0_i32 = arith.constant 0 : i32
    %c0_i32_0 = arith.constant 0 : i32
    %c0_i32_1 = arith.constant 0 : i32
    %c0_i32_2 = arith.constant 0 : i32
    return %c0_i32, %c0_i32_0, %c0_i32_1 : i32, i32, i32
  }
  func.func @transform_14(%arg0: i32) -> (i32, i32, i32) {
    %c0_i32 = arith.constant 0 : i32
    %c0_i32_0 = arith.constant 0 : i32
    %c0_i32_1 = arith.constant 0 : i32
    %c0_i32_2 = arith.constant 0 : i32
    return %c0_i32, %c0_i32_0, %c0_i32_1 : i32, i32, i32
  }
  func.func @transform_15(%arg0: i32) -> (i32, i32, i32) {
    %c0_i32 = arith.constant 0 : i32
    %c0_i32_0 = arith.constant 0 : i32
    %c0_i32_1 = arith.constant 0 : i32
    %c0_i32_2 = arith.constant 0 : i32
    return %c0_i32, %c0_i32_0, %c0_i32_1 : i32, i32, i32
  }
  func.func @transform_16(%arg0: i32) -> (i32, i32) {
    %c0_i32 = arith.constant 0 : i32
    %c0_i32_0 = arith.constant 0 : i32
    %c0_i32_1 = arith.constant 0 : i32
    return %c0_i32, %c0_i32_0 : i32, i32
  }
  func.func @transform_17(%arg0: i32) -> (i32, i32) {
    %c0_i32 = arith.constant 0 : i32
    %c0_i32_0 = arith.constant 0 : i32
    %c0_i32_1 = arith.constant 0 : i32
    return %c0_i32, %c0_i32_0 : i32, i32
  }
  func.func @transform_18(%arg0: i32) -> (i32, i32, i32) {
    %c0_i32 = arith.constant 0 : i32
    %c0_i32_0 = arith.constant 0 : i32
    %c0_i32_1 = arith.constant 0 : i32
    return %arg0, %c0_i32, %c0_i32_0 : i32, i32, i32
  }
}

</mosaic_0001>

<bundles_post_ra>
// kernel: pose_decoder_forward.1
= control target key start
LH: loop header
LB: loop body
LE: loop exit
PB: predicated region body
PF: predicated region fallthrough
CT: control target
= control target key end

     0   :  { %s5080_s0 = inlined_call_operand.hbm [shape: f32[2,8,64], index: 0, kind: input, shape index: {}]   ;;  %s5081_s1 = inlined_call_operand.vmem [shape: f32[8,128], index: 1, kind: input, shape index: {}]   ;;  %s5082_s2 = inlined_call_operand.hbm [shape: f32[64,128], index: 2, kind: input, shape index: {}]   ;;  %s5083_s3 = inlined_call_operand.hbm [shape: f32[1,128], index: 3, kind: input, shape index: {}]   ;;  %s5084_s4 = inlined_call_operand.hbm [shape: f32[3,128,384], index: 4, kind: input, shape index: {}]   ;;  %s5085_s5 = inlined_call_operand.hbm [shape: f32[3,1,384], index: 5, kind: input, shape index: {}]   ;;  %s5086_s6 = inlined_call_operand.hbm [shape: f32[3,128,128], index: 6, kind: input, shape index: {}]   ;;  %s5087_s7 = inlined_call_operand.hbm [shape: f32[3,1,128], index: 7, kind: input, shape index: {}]   ;;  %s5088_s8 = inlined_call_operand.hbm [shape: f32[3,1,128], index: 8, kind: input, shape index: {}]   ;;  %s5089_s9 = inlined_call_operand.hbm [shape: f32[3,1,128], index: 9, kind: input, shape index: {}]   ;;  %s5090_s10 = inlined_call_operand.hbm [shape: f32[3,128,256], index: 10, kind: input, shape index: {}]   ;;  %s5091_s11 = inlined_call_operand.hbm [shape: f32[3,1,256], index: 11, kind: input, shape index: {}]   ;;  %s5092_s12 = inlined_call_operand.hbm [shape: f32[3,256,128], index: 12, kind: input, shape index: {}]   ;;  %s5093_s13 = inlined_call_operand.hbm [shape: f32[3,1,128], index: 13, kind: input, shape index: {}]   ;;  %s5094_s14 = inlined_call_operand.hbm [shape: f32[3,1,128], index: 14, kind: input, shape index: {}]   ;;  %s5095_s15 = inlined_call_operand.hbm [shape: f32[3,1,128], index: 15, kind: input, shape index: {}]   ;;  %s5096_s16 = inlined_call_operand.vmem [shape: f32[128,144], index: 16, kind: input, shape index: {}]   ;;  %s5097_s17 = inlined_call_operand.hbm [shape: f32[1,144], index: 17, kind: input, shape index: {}]   ;;  %s5098_s18 = inlined_call_operand.vmem [shape: f32[2,8,144], index: 18, kind: output, shape index: {}]  }
   0x1   :  { %5108 = sst [smem:[#allocation39_spill]] %s5080_s0 }
   0x2   :  { %5109 = sst [smem:[#allocation40_spill]] %s5081_s1 }
   0x3   :  { %5110 = sst [smem:[#allocation41_spill]] %s5082_s2 }
   0x4   :  { %5111 = sst [smem:[#allocation42_spill]] %s5084_s4 }
   0x5   :  { %5112 = sst [smem:[#allocation43_spill]] %s5086_s6 }
   0x6   :  { %5113 = sst [smem:[#allocation44_spill]] %s5088_s8 }
   0x7   :  { %5114 = sst [smem:[#allocation45_spill]] %s5096_s16 }
   0x8   :  { %5115 = sst [smem:[#allocation46_spill]] %s5098_s18 }
   0x9   :  { %23 = vsyncpa [#allocation3], 0 }
   0xa   :  { %25 = vsyncpa [#allocation3 + $0x1], 0 }
   0xb   :  { %26 = vsyncpa [#allocation5], 0 }
   0xc   :  { %27 = vsyncpa [#allocation8], 0 }
   0xd   :  { %28 = vsyncpa [#allocation11], 0 }
   0xe   :  { %29 = vsyncpa [#allocation14], 0 }
   0xf   :  { %30 = vsyncpa [#allocation17], 0 }
  0x10   :  { %31 = vsyncpa [#allocation20], 0 }
  0x11   :  { %32 = vsyncpa [#allocation23], 0 }
  0x12   :  { %33 = vsyncpa [#allocation26], 0  ;;  %s4536_s27 = smov 0   ;;  %s4538_s28 = smov 0  }
  0x13   :  { %s4540_s29 = smov 0   ;;  %s4542_s30 = smov 0  }
  0x14 LB: > { %5116 = sst [smem:[#allocation36_spill]] %s4397_s27  ;;  %s4560_s21 = sadd.s32 4294967295, %s4409_s30   ;;  %s4409_s30 = sphi %s4542_s30, %s5142_s30   ;;  %s4405_s29 = sphi %s4540_s29, %s5141_s29   ;;  %s4401_s28 = sphi %s4538_s28, %s5140_s28   ;;  %s4397_s27 = sphi %s4536_s27, %s5139_s27  }
  0x15   : > { %s5117_s1 = sld [smem:[#allocation41_spill]]  ;;  %p3487_p0 = scmp.ge.s32.totalorder %s4409_s30, 1 }
  0x16   : > { %5118 = sst [smem:[#allocation37_spill]] %s4560_s21  ;;  %p60_p1 = scmp.eq.s32.totalorder %s4560_s21, 0 }
  0x17   : > { %p453_p2 = scmp.lt.s32.totalorder %s4409_s30, 3  ;;  %s4411_s2 = smov [#allocation4]  }
  0x18   : > { %s469_s23 = sshll.u32 %s4411_s2, 4  ;;  %s5121_s4 = sld [smem:[#allocation42_spill]]  ;;  %s470_s23 = int_to_ptr.vmem [resolvable:$true] %s469_s23 }
  0x19   : > { %p4565_p3 = pnand %p3487_p0, %p453_p2  ;;  %s4412_s19 = smov [#allocation7]  }
  0x1a   : > { %s5104_s18 = smov 128   ;;  %s5105_s2 = smov 8  }
  0x1b   : > { %s467_s20 = sshll.u32 %s5117_s1, 4  ;;  %p3639_p4 = pneg %p4565_p3  ;;  %s468_s20 = int_to_ptr.hbm [resolvable:$true] %s467_s20 }
  0x1c   : > { %s5119_s22 = scalar_select %p4565_p3, 1, 0 }
  0x1d   : > { %p4576_p5 = pnand %p3639_p4, %p60_p1  ;;  %s495_s1 = sshll.u32 %s4412_s19, 4  ;;  %s496_s1 = int_to_ptr.vmem [resolvable:$true] %s495_s1 }
  0x1e   : > { %5120 = sst [smem:[#allocation38_spill]] %s5119_s22  ;;  %s493_s26 = sshll.u32 %s5121_s4, 4  ;;  %s494_s26 = int_to_ptr.hbm [resolvable:$true] %s493_s26 }
  0x1f   : > { %3642 = dma.hbm_to_vmem [thread:$0]  (!%p4576_p5), %s468_s20, 1024, %s470_s23, [#allocation5], %s5104_s18, %s5104_s18, %s5105_s2  }
  0x20   : > { %s4415_s24 = smov 384   ;;  %s4416_s25 = smov 24  }
  0x21   : > { %3648 = dma.hbm_to_vmem [thread:$0]  (!%p4576_p5), %s494_s26, 18432, %s496_s1, [#allocation8], %s4415_s24, %s4415_s24, %s4416_s25  }
  0x22   : > { %s5123_s6 = sld [smem:[#allocation43_spill]]  ;;  %s4417_s21 = smov [#allocation10]  }
  0x23   : > { %s523_s19 = sshll.u32 %s4417_s21, 4  ;;  %s5124_s8 = sld [smem:[#allocation44_spill]]  ;;  %s524_s19 = int_to_ptr.vmem [resolvable:$true] %s523_s19 }
  0x24   : > { %s4418_s26 = smov [#allocation13]   ;;  %s577_s24 = sshll.u32 %s5090_s10, 4  ;;  %s578_s24 = int_to_ptr.hbm [resolvable:$true] %s577_s24 }
  0x25   : > { %s551_s1 = sshll.u32 %s4418_s26, 4  ;;  %s4419_s21 = smov 16   ;;  %s552_s1 = int_to_ptr.vmem [resolvable:$true] %s551_s1 }
  0x26   : > { %s5106_s25 = smov 1   ;;  %s605_s26 = sshll.u32 %s5092_s12, 4  ;;  %s606_s26 = int_to_ptr.hbm [resolvable:$true] %s605_s26 }
  0x27   : > { %s4422_s4 = smov 256   ;;  %s4424_s20 = smov [#allocation22]  }
  0x28   : > { %s521_s22 = sshll.u32 %s5123_s6, 4  ;;  %s4423_s6 = smov [#allocation19]   ;;  %s522_s22 = int_to_ptr.hbm [resolvable:$true] %s521_s22 }
  0x29   : > { %3654 = dma.hbm_to_vmem [thread:$0]  (!%p4576_p5), %s522_s22, 6144, %s524_s19, [#allocation11], %s5104_s18, %s5104_s18, %s5105_s2  }
  0x2a   : > { %s549_s27 = sshll.u32 %s5124_s8, 4  ;;  %s4421_s22 = smov [#allocation16]   ;;  %s550_s27 = int_to_ptr.hbm [resolvable:$true] %s549_s27 }
  0x2b   : > { %3660 = dma.hbm_to_vmem [thread:$0]  (!%p4576_p5), %s550_s27, 48, %s552_s1, [#allocation14], %s4419_s21, %s4419_s21, %s5106_s25  }
  0x2c   : > { %s579_s19 = sshll.u32 %s4421_s22, 4  ;;  %s633_s2 = sshll.u32 %s5094_s14, 4  ;;  %s580_s19 = int_to_ptr.vmem [resolvable:$true] %s579_s19  ;;  %s634_s2 = int_to_ptr.hbm [resolvable:$true] %s633_s2 }
  0x2d   : > { %3666 = dma.hbm_to_vmem [thread:$0]  (!%p4576_p5), %s578_s24, 12288, %s580_s19, [#allocation17], %s4422_s4, %s4422_s4, %s4419_s21  }
  0x2e   : > { %s607_s27 = sshll.u32 %s4423_s6, 4  ;;  %s5125_s1 = smov 8   ;;  %s608_s27 = int_to_ptr.vmem [resolvable:$true] %s607_s27 }
  0x2f   : > { %s5126_s22 = smov 128   ;;  %s635_s23 = sshll.u32 %s4424_s20, 4  ;;  %s636_s23 = int_to_ptr.vmem [resolvable:$true] %s635_s23 }
  0x30   : > { %3672 = dma.hbm_to_vmem [thread:$0]  (!%p4576_p5), %s606_s26, 12288, %s608_s27, [#allocation20], %s5126_s22, %s5126_s22, %s5125_s1  }
  0x31   : > { %s482_s24 = sshll.u32 %s5083_s3, 4  ;;  %s5127_s18 = smov 1   ;;  %s483_s24 = int_to_ptr.hbm [resolvable:$true] %s482_s24 }
  0x32   : > { %3678 = dma.hbm_to_vmem [thread:$0]  (!%p4576_p5), %s634_s2, 48, %s636_s23, [#allocation23], %s4419_s21, %s4419_s21, %s5127_s18  }
  0x33   : > { %s507_s4 = sshll.u32 %s5085_s5, 4  ;;  %s4425_s16 = smov [#allocation6]   ;;  %s508_s4 = int_to_ptr.hbm [resolvable:$true] %s507_s4 }
  0x34   : > { %s484_s26 = sshll.u32 %s4425_s16, 4  ;;  %s4426_s8 = smov [#allocation9]   ;;  %s485_s26 = int_to_ptr.vmem [resolvable:$true] %s484_s26 }
  0x35   : > { %3645 = dma.hbm_to_vmem [thread:$0]  (!%p4576_p5), %s483_s24, 16, %s485_s26, [#allocation5]  }
  0x36   : > { %s509_s25 = sshll.u32 %s4426_s8, 4  ;;  %s4427_s27 = smov 48   ;;  %s510_s25 = int_to_ptr.vmem [resolvable:$true] %s509_s25 }
  0x37   : > { %s4428_s1 = smov 3   ;;  %s535_s20 = sshll.u32 %s5087_s7, 4  ;;  %s536_s20 = int_to_ptr.hbm [resolvable:$true] %s535_s20 }
  0x38   : > { %3651 = dma.hbm_to_vmem [thread:$0]  (!%p4576_p5), %s508_s4, 144, %s510_s25, [#allocation8], %s4427_s27, %s4427_s27, %s4428_s1  }
  0x39   : > { %s4429_s23 = smov [#allocation12]   ;;  %s563_s24 = sshll.u32 %s5089_s9, 4  ;;  %s564_s24 = int_to_ptr.hbm [resolvable:$true] %s563_s24 }
  0x3a   : > { %s537_s6 = sshll.u32 %s4429_s23, 4  ;;  %s4430_s4 = smov [#allocation15]   ;;  %s538_s6 = int_to_ptr.vmem [resolvable:$true] %s537_s6 }
  0x3b   : > { %3657 = dma.hbm_to_vmem [thread:$0]  (!%p4576_p5), %s536_s20, 48, %s538_s6, [#allocation11], %s4419_s21, %s4419_s21, %s5127_s18  }
  0x3c   : > { %s565_s26 = sshll.u32 %s4430_s4, 4  ;;  %s591_s27 = sshll.u32 %s5091_s11, 4  ;;  %s566_s26 = int_to_ptr.vmem [resolvable:$true] %s565_s26  ;;  %s592_s27 = int_to_ptr.hbm [resolvable:$true] %s591_s27 }
  0x3d   : > { %3663 = dma.hbm_to_vmem [thread:$0]  (!%p4576_p5), %s564_s24, 48, %s566_s26, [#allocation14], %s4419_s21, %s4419_s21, %s5127_s18  }
  0x3e   : > { %s4431_s1 = smov [#allocation18]   ;;  %s619_s23 = sshll.u32 %s5093_s13, 4  ;;  %s620_s23 = int_to_ptr.hbm [resolvable:$true] %s619_s23 }
  0x3f   : > { %s593_s2 = sshll.u32 %s4431_s1, 4  ;;  %s4432_s6 = smov 32   ;;  %s594_s2 = int_to_ptr.vmem [resolvable:$true] %s593_s2 }
  0x40   : > { %s4433_s19 = smov 2   ;;  %s4434_s16 = smov [#allocation21]  }
  0x41   : > { %3669 = dma.hbm_to_vmem [thread:$0]  (!%p4576_p5), %s592_s27, 96, %s594_s2, [#allocation17], %s4432_s6, %s4432_s6, %s4433_s19  }
  0x42   : > { %s621_s4 = sshll.u32 %s4434_s16, 4  ;;  %s647_s24 = sshll.u32 %s5095_s15, 4  ;;  %s622_s4 = int_to_ptr.vmem [resolvable:$true] %s621_s4  ;;  %s648_s24 = int_to_ptr.hbm [resolvable:$true] %s647_s24 }
  0x43   : > { %3675 = dma.hbm_to_vmem [thread:$0]  (!%p4576_p5), %s620_s23, 48, %s622_s4, [#allocation20], %s4419_s21, %s4419_s21, %s5127_s18  }
  0x44   : > { %s665_s1 = sshll.u32 %s5097_s17, 4  ;;  %s5128_s2 = sld [smem:[#allocation36_spill]]  ;;  %s666_s1 = int_to_ptr.hbm [resolvable:$true] %s665_s1 }
  0x45   : > { %s4435_s22 = smov [#allocation24]   ;;  %s4436_s23 = smov [#allocation25]  }
  0x46   : > { %s649_s20 = sshll.u32 %s4435_s22, 4  ;;  %s667_s19 = sshll.u32 %s4436_s23, 4  ;;  %s650_s20 = int_to_ptr.vmem [resolvable:$true] %s649_s20  ;;  %s668_s19 = int_to_ptr.vmem [resolvable:$true] %s667_s19 }
  0x47   : > { %3681 = dma.hbm_to_vmem [thread:$0]  (!%p4576_p5), %s648_s24, 48, %s650_s20, [#allocation23], %s4419_s21, %s4419_s21, %s5127_s18  }
  0x48   : > { %3684 = dma.hbm_to_vmem [thread:$0]  (!%p4576_p5), %s666_s1, 32, %s668_s19, [#allocation26]  }
  0x49   : > { %s4678_s16 = sadd.s32 1, %s4409_s30   ;;  %s46_s8 = sadd.s32 1, %s4405_s29 }
  0x4a   : > { %s43_s4 = ssub.s32 %s4409_s30, %s4678_s16  ;;  %p53_p7 = scmp.ne.s32.totalorder %s4405_s29, %s4401_s28 }
  0x4b   : > { %p44_p6 = scmp.eq.s32.totalorder %s43_s4, 0  ;;  %p54_p8 = scmp.eq.s32.totalorder %s4409_s30, 0 }
  0x4c   : > { %p59_p9 = scmp.ne.s32.totalorder %s4401_s28, %s5128_s2  ;;  %p3704_p11 = scmp.lt.s32.totalorder %s4409_s30, 2 }
  0x4d   : > { %s4689_s25 = scalar_select %p44_p6, %s4405_s29, %s46_s8  }
  0x4e   : > { %p4693_p10 = por %p60_p1, %p59_p9  ;;  %s678_s18 = sand.u32 1, %s4405_s29  }
  0x4f   : > { %s3505_s0 = sshll.u32 %s4409_s30, 3  ;;  %p55_p12 = por %p54_p8, %p53_p7 }
  0x50   : > { %s3504_s24 = sshll.u32 %s678_s18, 3  ;;  %s5131_s1 = sld [smem:[#allocation39_spill]] }
  0x51   : > { %s682_s23 = scalar_lea.vmem [#allocation2], %s3504_s24  ;;  %p4703_p13 = pnand %p3704_p11, %p55_p12 }
  0x52   : > { %s690_s19 = sshll.u32 %s682_s23, 4  ;;  %s679_s6 = scalar_lea.sflag [#allocation3], %s678_s18  ;;  %s691_s19 = int_to_ptr.vmem [resolvable:$true] %s690_s19 }
  0x53   : > { %p4317_p2 = pneg %p4703_p13 }
  0x56   : > { %s686_s22 = scalar_lea.hbm %s5131_s1, %s3505_s0  ;;  %s4320_s24 = scalar_lea.hbm %s5131_s1, 16 }
  0x57   : > { %s688_s20 = sshll.u32 %s686_s22, 4  ;;  %s689_s20 = int_to_ptr.hbm [resolvable:$true] %s688_s20 }
  0x58   : > { %s4313_s4 = sshra.s32 %s689_s20, 4  ;;  %s4314_s4 = int_to_ptr.hbm [resolvable:$true] %s4313_s4 }
  0x59   : > { %s4315_s30 = scalar_lea.hbm %s4314_s4, 8  ;;  %p4321_p6 = scmp.lt.s32.totalorder %s4314_s4, %s5131_s1 }
  0x5a   : > { %p4316_p0 = scmp.ne.s32.totalorder %s4314_s4, %s4315_s30  ;;  %p4322_p7 = scmp.lt.s32.totalorder %s4320_s24, %s4315_s30 }
  0x5c   : > { %p4318_p4 = pnand %p4317_p2, %p4316_p0  ;;  %p4323_p8 = por %p4322_p7, %p4321_p6 }
  0x5e   : > { %p4319_p5 = pneg %p4318_p4 }
  0x60   : > { %p4324_p9 = pnand %p4323_p8, %p4319_p5 }
  0x62   : > { %4327 = shalt.err (!%p4324_p9)
}
  0x63   : > { %3688 = dma.hbm_to_vmem [thread:$0]  (!%p4703_p13), %s689_s20, 128, %s691_s19, %s679_s6  }
  0x64   : > { %699 = sbr.rel (%p4565_p3) target bundleno = 7172 (0x1c04), region = 92  ;;  %s701_s22 = sand.u32 (!%p4565_p3), 1, %s4401_s28  }
  0x65   : > { %s4720_s23 = sshll.u32 (!%p4565_p3), %s701_s22, 3  ;;  %s702_s8 = scalar_lea.sflag (!%p4565_p3), [#allocation3], %s701_s22 }
  0x66   : > { %s705_s0 = scalar_lea.vmem (!%p4565_p3), [#allocation2], %s4720_s23 }
  0x69   : > { %4360 = dma.done.wait (%p4693_p10), %s702_s8, 128  }
  0x6a   : > { %4362 = vsyncadd (%p4693_p10), %s702_s8, 4294967168  ;;  %s5134_s4 = sld [smem:[#allocation37_spill]] }
  0x6b   : > { %4364 = dma.done.wait (%p60_p1), [#allocation5], 1040  }
  0x6c   : > { %4366 = vsyncadd (%p60_p1), [#allocation5], 4294966256 }
  0x6d   : > { %4368 = dma.done.wait (%p60_p1), [#allocation8], 18576  }
  0x6e   : > { %4370 = vsyncadd (%p60_p1), [#allocation8], 4294948720 }
  0x6f   : > { %4372 = dma.done.wait (%p60_p1), [#allocation11], 6192  }
  0x70   : > { %4374 = vsyncadd (%p60_p1), [#allocation11], 4294961104 }
  0x71   : > { %4376 = dma.done.wait (%p60_p1), [#allocation14], 96  }
  0x72   : > { %4378 = vsyncadd (%p60_p1), [#allocation14], 4294967200 }
  0x73   : > { %4380 = dma.done.wait (%p60_p1), [#allocation17], 12384  }
  0x74   : > { %4382 = vsyncadd (%p60_p1), [#allocation17], 4294954912 }
  0x75   : > { %4384 = dma.done.wait (%p60_p1), [#allocation20], 12336  }
  0x76   : > { %4386 = vsyncadd (%p60_p1), [#allocation20], 4294954960 }
  0x77   : > { %4388 = dma.done.wait (%p60_p1), [#allocation23], 96  }
  0x78   : > { %4390 = vsyncadd (%p60_p1), [#allocation23], 4294967200 }
  0x79   : > { %4392 = dma.done.wait (%p60_p1), [#allocation26], 32  }
  0x7a   : > { %4394 = vsyncadd (%p60_p1), [#allocation26], 4294967264  ;;  %v847_v0 = vld [vmem:[#allocation4 + $0x38] sm:$0xff]  ;;  %v846_v1 = vld [vmem:[#allocation4 + $0x30] sm:$0xff]  ;;  %vm852_vm0 = vcmask 523264   ;;  %s5135_s19 = sld [smem:[#allocation40_spill]] }
  0x7b   : > { %864 = vmatpush.msra.mxu0 %v847_v0  ;;  %v845_v2 = vld [vmem:[#allocation4 + $0x28] sm:$0xff]  ;;  %v844_v3 = vld [vmem:[#allocation4 + $0x20] sm:$0xff]  ;;  %v925_v5 = vld [vmem:[#allocation7 + $0x170] sm:$0xff]  ;;  %vm1011_vm1 = vcmask 261120   ;;  %s4437_s2 = smov 96   ;;  %s4438_s6 = smov 64  }
  0x7c   : > { %v924_v4 = vld [vmem:[#allocation7 + $0x168] sm:$0xff]  ;;  %v926_v6 = vld [vmem:[#allocation7 + $0x178] sm:$0xff]  ;;  %971 = vmatpush.msra.mxu2 %v925_v5  ;;  %v921_v7 = vld [vmem:[#allocation7 + $0x150] sm:$0xff]  ;;  %s4439_s30 = smov 32   ;;  %vm1039_vm2 = vcmask 64512   ;;  %s5136_s27 = sld [smem:[#allocation45_spill]] }
  0x7d   : > { %865 = vmatpush.msra.mxu0 %v846_v1  ;;  %951 = vmatpush.msra.mxu1 %v924_v4  ;;  %v922_v8 = vld [vmem:[#allocation7 + $0x158] sm:$0xff]  ;;  %v923_v9 = vld [vmem:[#allocation7 + $0x160] sm:$0xff]  ;;  %v920_v13 = vld [vmem:[#allocation7 + $0x148] sm:$0xff]  ;;  %p834_p1 = scmp.lt.s32.totalorder %s5134_s4, 1  ;;  %s5138_s22 = sld [smem:[#allocation46_spill]] }
  0x7e   : > { %991 = vmatpush.msra.mxu3 %v926_v6  ;;  %v918_v10 = vld [vmem:[#allocation7 + $0x138] sm:$0xff]  ;;  %v919_v11 = vld [vmem:[#allocation7 + $0x140] sm:$0xff]  ;;  %972 = vmatpush.msra.mxu2 %v922_v8  ;;  %v916_v15 = vld [vmem:[#allocation7 + $0x128] sm:$0xff] }
  0x7f   : > { %866 = vmatpush.msra.mxu0 %v845_v2  ;;  %v843_v12 = vld [vmem:[#allocation4 + $0x18] sm:$0xff]  ;;  %952 = vmatpush.msra.mxu1 %v921_v7  ;;  %v915_v14 = vld [vmem:[#allocation7 + $0x120] sm:$0xff]  ;;  %v842_v16 = vld [vmem:[#allocation4 + $0x10] sm:$0xff]  ;;  %s5144_s4 = smov (!%p834_p1, %s5134_s4), 1 }
  0x80   : > { %992 = vmatpush.msra.mxu3 %v923_v9  ;;  %973 = vmatpush.msra.mxu2 %v919_v11  ;;  %v917_v17 = vld [vmem:[#allocation7 + $0x130] sm:$0xff]  ;;  %v912_v18 = vld [vmem:[#allocation7 + $0x108] sm:$0xff]  ;;  %v914_v21 = vld [vmem:[#allocation7 + $0x118] sm:$0xff]  ;;  %s3576_s24 = sshll.u32 %s5144_s4, 4 }
  0x81   : > { %867 = vmatpush.msra.mxu0 %v844_v3  ;;  %953 = vmatpush.msra.mxu1 %v918_v10  ;;  %v913_v19 = vld [vmem:[#allocation7 + $0x110] sm:$0xff]  ;;  %v841_v20 = vld [vmem:[#allocation4 + $0x8] sm:$0xff]  ;;  %v910_v23 = vld [vmem:[#allocation7 + $0xf8] sm:$0xff] }
  0x82   : > { %993 = vmatpush.msra.mxu3 %v920_v13  ;;  %974 = vmatpush.msra.mxu2 %v916_v15  ;;  %v909_v22 = vld [vmem:[#allocation7 + $0xf0] sm:$0xff]  ;;  %v840_v24 = vld [vmem:[#allocation4] sm:$0xff]  ;;  %v908_v29 = vld [vmem:[#allocation7 + $0xe8] sm:$0xff]  ;;  %s5137_s18 = smov %s5136_s27 }
  0x83   : > { %868 = vmatpush.msra.mxu0 %v843_v12  ;;  %954 = vmatpush.msra.mxu1 %v915_v14  ;;  %v839_v25 = vld [vmem:[%s705_s0] sm:$0xff]  ;;  %v911_v26 = vld [vmem:[#allocation7 + $0x100] sm:$0xff]  ;;  %v3782_v57 = vld [vmem:[#allocation6] ss:$0 sm:$0xff]  ;;  %s838_s23 = scalar_lea.vmem %s5138_s22, %s3576_s24 }
  0x84   : > { %994 = vmatpush.msra.mxu3 %v917_v17  ;;  %975 = vmatpush.msra.mxu2 %v913_v19  ;;  %v906_v27 = vld [vmem:[#allocation7 + $0xd8] sm:$0xff]  ;;  %v907_v28 = vld [vmem:[#allocation7 + $0xe0] sm:$0xff]  ;;  %v904_v31 = vld [vmem:[#allocation7 + $0xc8] sm:$0xff] }
  0x85   : > { %869 = vmatpush.msra.mxu0 %v842_v16  ;;  %955 = vmatpush.msra.mxu1 %v912_v18  ;;  %v903_v30 = vld [vmem:[#allocation7 + $0xc0] sm:$0xff]  ;;  %v905_v32 = vld [vmem:[#allocation7 + $0xd0] sm:$0xff]  ;;  %v900_v33 = vld [vmem:[#allocation7 + $0xa8] sm:$0xff] }
  0x86   : > { %995 = vmatpush.msra.mxu3 %v914_v21  ;;  %976 = vmatpush.msra.mxu2 %v910_v23  ;;  %v901_v34 = vld [vmem:[#allocation7 + $0xb0] sm:$0xff]  ;;  %v902_v35 = vld [vmem:[#allocation7 + $0xb8] sm:$0xff]  ;;  %v899_v38 = vld [vmem:[#allocation7 + $0xa0] sm:$0xff] }
  0x87   : > { %870 = vmatpush.msra.mxu0 %v841_v20  ;;  %956 = vmatpush.msra.mxu1 %v909_v22  ;;  %v897_v36 = vld [vmem:[#allocation7 + $0x90] sm:$0xff]  ;;  %v898_v37 = vld [vmem:[#allocation7 + $0x98] sm:$0xff]  ;;  %v895_v40 = vld [vmem:[#allocation7 + $0x80] sm:$0xff] }
  0x88   : > { %996 = vmatpush.msra.mxu3 %v911_v26  ;;  %977 = vmatpush.msra.mxu2 %v907_v28  ;;  %v894_v39 = vld [vmem:[#allocation7 + $0x78] sm:$0xff]  ;;  %v896_v41 = vld [vmem:[#allocation7 + $0x88] sm:$0xff]  ;;  %v891_v42 = vld [vmem:[#allocation7 + $0x60] sm:$0xff] }
  0x89   : > { %871 = vmatpush.msra.mxu0 %v840_v24  ;;  %957 = vmatpush.msra.mxu1 %v906_v27  ;;  %v892_v43 = vld [vmem:[#allocation7 + $0x68] sm:$0xff]  ;;  %v893_v44 = vld [vmem:[#allocation7 + $0x70] sm:$0xff]  ;;  %v890_v47 = vld [vmem:[#allocation7 + $0x58] sm:$0xff] }
  0x8a   : > { %3525 = vmatmul.msk.f32.vlgmr.msra.gmra.mxu0 %vm852_vm0, %v839_v25  ;;  %997 = vmatpush.msra.mxu3 %v908_v29  ;;  %v888_v45 = vld [vmem:[#allocation7 + $0x48] sm:$0xff]  ;;  %v889_v46 = vld [vmem:[#allocation7 + $0x50] sm:$0xff]  ;;  %v886_v49 = vld [vmem:[#allocation7 + $0x38] sm:$0xff] }
  0x8b   : > { %958 = vmatpush.msra.mxu1 %v903_v30  ;;  %978 = vmatpush.msra.mxu2 %v904_v31  ;;  %v885_v48 = vld [vmem:[#allocation7 + $0x30] sm:$0xff]  ;;  %v887_v50 = vld [vmem:[#allocation7 + $0x40] sm:$0xff]  ;;  %v882_v51 = vld [vmem:[#allocation7 + $0x18] sm:$0xff] }
  0x8c   : > { %998 = vmatpush.msra.mxu3 %v905_v32  ;;  %v883_v52 = vld [vmem:[#allocation7 + $0x20] sm:$0xff]  ;;  %v884_v53 = vld [vmem:[#allocation7 + $0x28] sm:$0xff]  ;;  %v881_v56 = vld [vmem:[#allocation7 + $0x10] sm:$0xff] }
  0x8d   : > { %959 = vmatpush.msra.mxu1 %v900_v33  ;;  %979 = vmatpush.msra.mxu2 %v901_v34  ;;  %v879_v54 = vld [vmem:[#allocation7] sm:$0xff]  ;;  %v880_v55 = vld [vmem:[#allocation7 + $0x8] sm:$0xff]  ;;  %v932_v34 = vld [vmem:[#allocation10 + $0x28] sm:$0xff] }
  0x8e   : > { %999 = vmatpush.msra.mxu3 %v902_v35  ;;  %v877_v60 = vld [vmem:[%s5135_s19] sm:$0xff]  ;;  %v943_v63 = vld [vmem:[#allocation9] sm:$0x7] }
  0x8f   : > { %960 = vmatpush.msra.mxu1 %v897_v36  ;;  %980 = vmatpush.msra.mxu2 %v898_v37  ;;  %v946_v0 = vperm.slane %v943_v63, 1  ;;  %v947_v1 = vperm.slane %v943_v63, 2  ;;  %v945_v2 = vperm.slane %v943_v63, 0  ;;  %v934_v31 = vld [vmem:[#allocation10 + $0x38] sm:$0xff]  ;;  %v933_v33 = vld [vmem:[#allocation10 + $0x30] sm:$0xff]  ;;  %v931_v35 = vld [vmem:[#allocation10 + $0x20] sm:$0xff] }
  0x90   : > { %1000 = vmatpush.msra.mxu3 %v899_v38 }
  0x91   : > { %961 = vmatpush.msra.mxu1 %v894_v39  ;;  %981 = vmatpush.msra.mxu2 %v895_v40 }
  0x92   : > { %1001 = vmatpush.msra.mxu3 %v896_v41 }
  0x93   : > { %962 = vmatpush.msra.mxu1 %v891_v42  ;;  %982 = vmatpush.msra.mxu2 %v892_v43 }
  0x94   : > { %1002 = vmatpush.msra.mxu3 %v893_v44 }
  0x95   : > { %963 = vmatpush.msra.mxu1 %v888_v45  ;;  %983 = vmatpush.msra.mxu2 %v889_v46  ;;  %v930_v46 = vld [vmem:[#allocation10 + $0x18] sm:$0xff] }
  0x96   : > { %1003 = vmatpush.msra.mxu3 %v890_v47  ;;  %v929_v47 = vld [vmem:[#allocation10 + $0x10] sm:$0xff] }
  0x97   : > { %964 = vmatpush.msra.mxu1 %v885_v48  ;;  %984 = vmatpush.msra.mxu2 %v886_v49  ;;  %v928_v48 = vld [vmem:[#allocation10 + $0x8] sm:$0xff]  ;;  %v927_v49 = vld [vmem:[#allocation10] sm:$0xff] }
  0x98   : > { %1004 = vmatpush.msra.mxu3 %v887_v50 }
  0x99   : > { %965 = vmatpush.msra.mxu1 %v882_v51  ;;  %985 = vmatpush.msra.mxu2 %v883_v52 }
  0x9a   : > { %1005 = vmatpush.msra.mxu3 %v884_v53 }
  0x9b   : > { %966 = vmatpush.msra.mxu1 %v879_v54  ;;  %986 = vmatpush.msra.mxu2 %v880_v55 }
  0x9c   : > { %1006 = vmatpush.msra.mxu3 %v881_v56 }
 0x107   : > { %v873_v58 = vpop.f32.mrf.mxu0 }
 0x108   : > { %v874_v59 = vadd.f32 %v3782_v57, %v873_v58 }
 0x10a   : > { %v876_v61 = vmax.f32 %v874_v59, 0.0 }
 0x10c   : > { %v4764_v62 = vadd.f32 %v877_v60, %v876_v61 }
 0x10e   : > { %967 = vmatmul.f32.vlgmr.msra.gmra.mxu1 %v4764_v62  ;;  %987 = vmatmul.f32.vlgmr.msra.gmra.mxu2 %v4764_v62 }
 0x10f   : > { %1007 = vmatmul.f32.vlgmr.msra.gmra.mxu3 %v4764_v62 }
 0x18b   : > { %v968_v4 = vpop.f32.mrf.mxu1 }
 0x18c   : > { %v969_v8 = vadd.f32 %v968_v4, %v945_v2 }
 0x191   : > { %v988_v3 = vpop.f32.mrf.mxu2 }
 0x192   : > { %v4769_v5 = vadd.f32 %v988_v3, %v946_v0  ;;  %v1008_v6 = vpop.f32.mrf.mxu3 }
 0x193   : > { %v4771_v7 = vadd.f32 %v1008_v6, %v947_v1 }
 0x194   : > { %1089 = vrot.lane.b32.xlu1 %v4769_v5, %s4437_s2  ;;  %3526 = vmatpush.xpose.msk.msrb.mxu0 %vm1011_vm1, %v4769_v5 }
 0x197   : > { %3527 = vmatmul.msk.f32.vlgmr.msrb.gmra.mxu0 %vm1011_vm1, %v969_v8 }
 0x198   : > { %1082 = vmatpush.msra.mxu0 %v4771_v7 }
 0x19c   : > { %1087 = vrot.lane.b32.xlu1 %v969_v8, %s4437_s2 }
 0x1a4   : > { %1215 = vrot.lane.b32.xlu1 %v4769_v5, %s4438_s6 }
 0x1ac   : > { %1213 = vrot.lane.b32.xlu1 %v969_v8, %s4438_s6 }
 0x1b4   : > { %1316 = vrot.lane.b32.xlu1 %v969_v8, %s4439_s30 }
 0x206   : > { %v1090_v9 = vpop.permute.xlu1 %1089 }
 0x207   : > { %3529 = vmatpush.xpose.msk.msrb.mxu0 %vm1011_vm1, %v1090_v9 }
 0x20e   : > { %v1088_v29 = vpop.permute.xlu1 %1087 }
 0x214   : > { %v1035_v10 = vpop.f32.mrf.mxu0 }
 0x215   : > { %v1038_v11 = vmul.f32 0.17677669, %v1035_v10 }
 0x216   : > { %v1216_v36 = vpop.permute.xlu1 %1215 }
 0x217   : > { %v1040_v12 = vsel %vm1039_vm2, %v1038_v11, -inf }
 0x218   : > { %1041 = vmax.xlane.f32.xlu0 %v1040_v12 }
 0x21e   : > { %v1214_v51 = vpop.permute.xlu1 %1213 }
 0x226   : > { %v1317_v56 = vpop.permute.xlu1 %1316 }
 0x28b   : > { %v1042_v13 = vpop.xlane.xlu0 %1041 }
 0x28c   : > { %v1043_v14 = vsub.f32 %v1038_v11, %v1042_v13 }
 0x28e   : > { %v1044_v15 = vmul.f32 1.442695, %v1043_v14 }
 0x290   : > { %3801 = vpow2.f32 %v1044_v15 }
 0x296   : > { %v3802_v16 = vpop.eup %3801 }
 0x297   : > { %v1046_v17 = vsel %vm1039_vm2, %v3802_v16, 0.0 }
 0x298   : > { %1047 = vadd.xlane.f32.xlu0 %v1046_v17 }
 0x2ac   : > { %1141 = vrot.lane.b32.xlu0 %v4771_v7, %s4437_s2 }
 0x30b   : > { %v1048_v18 = vpop.xlane.xlu0 %1047 }
 0x30c   : > { %3803 = vrcp.f32 %v1048_v18  ;;  %v1060_v22 = vand.u32 2147483648, %v1048_v18  ;;  %v1058_v24 = vand.u32 2147483647, %v1048_v18  ;;  %vm1054_vm4 = vweird.f32 %v1048_v18 }
 0x30e   : > { %v1061_v26 = vor.u32 1.1754944e-38, %v1060_v22  ;;  %vm1059_vm6 = vcmp.eq.f32.partialorder %v1058_v24, 8.507059e+37 }
 0x312   : > { %v3804_v19 = vpop.eup %3803 }
 0x313   : > { %v1050_v20 = vmul.f32 %v3804_v19, %v1048_v18  ;;  %vm1055_vm3 = vweird.f32 %v3804_v19 }
 0x314   : > { %vm1056_vm5 = vmor %vm1054_vm4, %vm1055_vm3 }
 0x315   : > { %v1051_v21 = vsub.f32 1.0, %v1050_v20 }
 0x317   : > { %v1052_v23 = vmul.f32 %v3804_v19, %v1051_v21 }
 0x319   : > { %v1053_v25 = vadd.f32 %v3804_v19, %v1052_v23 }
 0x31b   : > { %v1057_v27 = vsel %vm1056_vm5, %v3804_v19, %v1053_v25 }
 0x31c   : > { %v1062_v28 = vsel %vm1059_vm6, %v1061_v26, %v1057_v27 }
 0x31d   : > { %v1063_v30 = vmul.f32 %v3802_v16, %v1062_v28 }
 0x31e   : > { %v1142_v32 = vpop.permute.xlu0 %1141 }
 0x31f   : > { %3528 = vmatmul.msk.f32.vlgmr.msra.gmra.mxu0 %vm1039_vm2, %v1063_v30  ;;  %1162 = vmatpush.msrb.mxu1 %v1142_v32 }
 0x320   : > { %1182 = vmatpush.msra.mxu0 %v934_v31 }
 0x321   : > { %1205 = vmatpush.msra.mxu1 %v930_v46 }
 0x322   : > { %1183 = vmatpush.msra.mxu0 %v933_v33 }
 0x323   : > { %1206 = vmatpush.msra.mxu1 %v929_v47  ;;  %v939_v47 = vld [vmem:[#allocation10 + $0x60] sm:$0xff] }
 0x324   : > { %1184 = vmatpush.msra.mxu0 %v932_v34  ;;  %v938_v34 = vld [vmem:[#allocation10 + $0x58] sm:$0xff] }
 0x325   : > { %1207 = vmatpush.msra.mxu1 %v928_v48  ;;  %1307 = vmatpush.msrb.mxu2 %v938_v34  ;;  %v1473_v34 = vld [vmem:[#allocation16 + $0x58] sm:$0xff] }
 0x326   : > { %1185 = vmatpush.msra.mxu0 %v931_v35  ;;  %v937_v35 = vld [vmem:[#allocation10 + $0x50] sm:$0xff] }
 0x327   : > { %3530 = vmatmul.msk.f32.vlgmr.msrb.gmra.mxu0 %vm1011_vm1, %v1088_v29  ;;  %1208 = vmatpush.msra.mxu1 %v927_v49 }
 0x328   : > { %3534 = vmatpush.xpose.msk.msrb.mxu0 %vm1011_vm1, %v1216_v36  ;;  %v936_v36 = vld [vmem:[#allocation10 + $0x48] sm:$0xff]  ;;  %1308 = vmatpush.msrb.mxu2 %v937_v35 }
 0x329   : > { %v1470_v35 = vld [vmem:[#allocation16 + $0x40] sm:$0xff] }
 0x32a   : > { %1309 = vmatpush.msrb.mxu2 %v936_v36  ;;  %v1471_v36 = vld [vmem:[#allocation16 + $0x48] sm:$0xff] }
 0x39c   : > { %v1084_v37 = vpop.f32.mrf.mxu0 }
 0x3a4   : > { %v1112_v38 = vpop.f32.mrf.mxu0 }
 0x3a5   : > { %v1115_v39 = vmul.f32 0.17677669, %v1112_v38 }
 0x3a7   : > { %v1116_v40 = vsel %vm1039_vm2, %v1115_v39, -inf }
 0x3a8   : > { %1117 = vmax.xlane.f32.xlu2 %v1116_v40 }
 0x41b   : > { %v1118_v41 = vpop.xlane.xlu2 %1117 }
 0x41c   : > { %v1119_v42 = vsub.f32 %v1115_v39, %v1118_v41  ;;  %v942_v39 = vld [vmem:[#allocation10 + $0x78] sm:$0xff] }
 0x41e   : > { %v1120_v43 = vmul.f32 1.442695, %v1119_v42  ;;  %v941_v42 = vld [vmem:[#allocation10 + $0x70] sm:$0xff] }
 0x420   : > { %3805 = vpow2.f32 %v1120_v43 }
 0x426   : > { %v3806_v44 = vpop.eup %3805 }
 0x427   : > { %v1122_v45 = vsel %vm1039_vm2, %v3806_v44, 0.0 }
 0x428   : > { %1123 = vadd.xlane.f32.xlu2 %v1122_v45  ;;  %v940_v45 = vld [vmem:[#allocation10 + $0x68] sm:$0xff] }
 0x440   : > { %1318 = vrot.lane.b32.xlu2 %v4769_v5, %s4439_s30 }
 0x49b   : > { %v1124_v50 = vpop.xlane.xlu2 %1123 }
 0x49c   : > { %3807 = vrcp.f32 %v1124_v50  ;;  %v1136_v57 = vand.u32 2147483648, %v1124_v50  ;;  %v1134_v59 = vand.u32 2147483647, %v1124_v50  ;;  %vm1130_vm8 = vweird.f32 %v1124_v50 }
 0x49e   : > { %v1137_v61 = vor.u32 1.1754944e-38, %v1136_v57  ;;  %vm1135_vm10 = vcmp.eq.f32.partialorder %v1134_v59, 8.507059e+37 }
 0x4a2   : > { %v3808_v52 = vpop.eup %3807 }
 0x4a3   : > { %v1126_v53 = vmul.f32 %v3808_v52, %v1124_v50  ;;  %v1319_v54 = vpop.permute.xlu2 %1318  ;;  %vm1131_vm7 = vweird.f32 %v3808_v52 }
 0x4a4   : > { %3538 = vmatpush.xpose.msk.msrb.mxu3 %vm1011_vm1, %v1319_v54  ;;  %vm1132_vm9 = vmor %vm1130_vm8, %vm1131_vm7  ;;  %v935_v54 = vld [vmem:[#allocation10 + $0x40] sm:$0xff] }
 0x4a5   : > { %v1127_v55 = vsub.f32 1.0, %v1126_v53  ;;  %1310 = vmatpush.msrb.mxu2 %v935_v54 }
 0x4a7   : > { %v1128_v58 = vmul.f32 %v3808_v52, %v1127_v55  ;;  %3539 = vmatmul.msk.f32.vlgmr.msrb.gmra.mxu3 %vm1011_vm1, %v1317_v56 }
 0x4a9   : > { %v1129_v60 = vadd.f32 %v3808_v52, %v1128_v58 }
 0x4ab   : > { %v1133_v63 = vsel %vm1132_vm9, %v3808_v52, %v1129_v60  ;;  %v3783_v60 = vld [vmem:[#allocation12] ss:$0 sm:$0xff] }
 0x4ac   : > { %v1138_v0 = vsel %vm1135_vm10, %v1137_v61, %v1133_v63 }
 0x4ad   : > { %v1139_v1 = vmul.f32 %v3806_v44, %v1138_v0 }
 0x4af   : > { %3531 = vmatmul.msk.f32.vlgmr.msrb.gmra.mxu1 %vm1039_vm2, %v1139_v1 }
 0x4b7   : > { %3533 = vmatmul.msk.f32.vlgmr.msra.gmra.mxu1 %vm1011_vm1, %v1084_v37 }
 0x52a   : > { %v1341_v2 = vpop.f32.mrf.mxu3 }
 0x52b   : > { %v1344_v3 = vmul.f32 0.17677669, %v1341_v2  ;;  %v4440_v2 = vmov 128.0  }
 0x52c   : > { %v1164_v4 = vpop.f32.mrf.mxu1 }
 0x52d   : > { %3532 = vmatmul.msk.f32.vlgmr.msra.gmra.mxu0 %vm1011_vm1, %v1164_v4  ;;  %v1345_v5 = vsel %vm1039_vm2, %v1344_v3, -inf  ;;  %v1493_v4 = vld [vmem:[#allocation16 + $0xf8] sm:$0xff] }
 0x52e   : > { %1346 = vmax.xlane.f32.xlu1 %v1345_v5  ;;  %v1490_v5 = vld [vmem:[#allocation16 + $0xe0] sm:$0xff]  ;;  %1520 = vmatpush.msra.mxu3 %v1493_v4  ;;  %v1548_v4 = vld [vmem:[#allocation19 + $0x30] sm:$0xff] }
 0x534   : > { %v1210_v55 = vpop.f32.mrf.mxu1 }
 0x535   : > { %3535 = vmatmul.msk.f32.vlgmr.msrb.gmra.mxu0 %vm1011_vm1, %v1214_v51 }
 0x547   : > { %1369 = vrot.lane.b32.xlu1 %v4771_v7, %s4439_s30 }
 0x5a1   : > { %v1347_v6 = vpop.xlane.xlu1 %1346 }
 0x5a2   : > { %v1348_v9 = vsub.f32 %v1344_v3, %v1347_v6  ;;  %v1492_v3 = vld [vmem:[#allocation16 + $0xf0] sm:$0xff]  ;;  %v1491_v6 = vld [vmem:[#allocation16 + $0xe8] sm:$0xff] }
 0x5a3   : > { %1500 = vmatpush.msra.mxu2 %v1492_v3  ;;  %1521 = vmatpush.msra.mxu3 %v1491_v6 }
 0x5a4   : > { %v1349_v10 = vmul.f32 1.442695, %v1348_v9 }
 0x5a5   : > { %1501 = vmatpush.msra.mxu2 %v1490_v5  ;;  %v1564_v5 = vld [vmem:[#allocation19 + $0xb0] sm:$0xff] }
 0x5a6   : > { %3809 = vpow2.f32 %v1349_v10 }
 0x5aa   : > { %v4805_v8 = vpop.f32.mrf.mxu0 }
 0x5ab   : > { %v1211_v57 = vadd.f32 %v1210_v55, %v4805_v8  ;;  %v1553_v55 = vld [vmem:[#allocation19 + $0x58] sm:$0xff] }
 0x5ac   : > { %v3810_v15 = vpop.eup %3809 }
 0x5ad   : > { %v1351_v16 = vsel %vm1039_vm2, %v3810_v15, 0.0 }
 0x5b2   : > { %v1238_v11 = vpop.f32.mrf.mxu0 }
 0x5b3   : > { %v1241_v12 = vmul.f32 0.17677669, %v1238_v11 }
 0x5b5   : > { %v1242_v13 = vsel %vm1039_vm2, %v1241_v12, -inf }
 0x5b6   : > { %1243 = vmax.xlane.f32.xlu0 %v1242_v13 }
 0x5b9   : > { %v1370_v14 = vpop.permute.xlu1 %1369 }
 0x5ba   : > { %1390 = vmatpush.msra.mxu0 %v1370_v14 }
 0x5be   : > { %1352 = vadd.xlane.f32.xlu0 %v1351_v16 }
 0x629   : > { %v1244_v17 = vpop.xlane.xlu0 %1243 }
 0x62a   : > { %v1245_v18 = vsub.f32 %v1241_v12, %v1244_v17  ;;  %v1488_v17 = vld [vmem:[#allocation16 + $0xd0] sm:$0xff] }
 0x62b   : > { %1502 = vmatpush.msra.mxu2 %v1488_v17 }
 0x62c   : > { %v1246_v19 = vmul.f32 1.442695, %v1245_v18  ;;  %v1489_v18 = vld [vmem:[#allocation16 + $0xd8] sm:$0xff] }
 0x62d   : > { %1522 = vmatpush.msra.mxu3 %v1489_v18  ;;  %v3784_v18 = vld [vmem:[#allocation13] ss:$0 sm:$0xff] }
 0x62e   : > { %3811 = vpow2.f32 %v1246_v19  ;;  %v1486_v19 = vld [vmem:[#allocation16 + $0xc0] sm:$0xff] }
 0x62f   : > { %1503 = vmatpush.msra.mxu2 %v1486_v19 }
 0x631   : > { %v1353_v20 = vpop.xlane.xlu0 %1352 }
 0x632   : > { %3813 = vrcp.f32 %v1353_v20  ;;  %v1365_v26 = vand.u32 2147483648, %v1353_v20  ;;  %v1363_v28 = vand.u32 2147483647, %v1353_v20  ;;  %vm1359_vm12 = vweird.f32 %v1353_v20 }
 0x634   : > { %v3812_v21 = vpop.eup %3811  ;;  %v1366_v30 = vor.u32 1.1754944e-38, %v1365_v26  ;;  %vm1364_vm14 = vcmp.eq.f32.partialorder %v1363_v28, 8.507059e+37  ;;  %v1481_v26 = vld [vmem:[#allocation16 + $0x98] sm:$0xff]  ;;  %v1479_v28 = vld [vmem:[#allocation16 + $0x88] sm:$0xff] }
 0x635   : > { %v1248_v22 = vsel %vm1039_vm2, %v3812_v21, 0.0 }
 0x636   : > { %1249 = vadd.xlane.f32.xlu2 %v1248_v22  ;;  %v1485_v22 = vld [vmem:[#allocation16 + $0xb8] sm:$0xff] }
 0x638   : > { %v3814_v23 = vpop.eup %3813 }
 0x639   : > { %v1355_v24 = vmul.f32 %v3814_v23, %v1353_v20  ;;  %vm1360_vm11 = vweird.f32 %v3814_v23  ;;  %v1487_v20 = vld [vmem:[#allocation16 + $0xc8] sm:$0xff] }
 0x63a   : > { %vm1361_vm13 = vmor %vm1359_vm12, %vm1360_vm11  ;;  %1523 = vmatpush.msra.mxu3 %v1487_v20 }
 0x63b   : > { %v1356_v25 = vsub.f32 1.0, %v1355_v24  ;;  %v1483_v24 = vld [vmem:[#allocation16 + $0xa8] sm:$0xff] }
 0x63c   : > { %1524 = vmatpush.msra.mxu3 %v1485_v22 }
 0x63d   : > { %v1357_v27 = vmul.f32 %v3814_v23, %v1356_v25  ;;  %v1480_v25 = vld [vmem:[#allocation16 + $0x90] sm:$0xff] }
 0x63e   : > { %1525 = vmatpush.msra.mxu3 %v1483_v24  ;;  %v1544_v24 = vld [vmem:[#allocation19 + $0x10] sm:$0xff] }
 0x63f   : > { %v1358_v29 = vadd.f32 %v3814_v23, %v1357_v27  ;;  %v1478_v27 = vld [vmem:[#allocation16 + $0x80] sm:$0xff] }
 0x640   : > { %1526 = vmatpush.msra.mxu3 %v1481_v26  ;;  %v1543_v26 = vld [vmem:[#allocation19 + $0x8] sm:$0xff] }
 0x641   : > { %v1362_v31 = vsel %vm1361_vm13, %v3814_v23, %v1358_v29  ;;  %v1482_v23 = vld [vmem:[#allocation16 + $0xa0] sm:$0xff]  ;;  %v1476_v29 = vld [vmem:[#allocation16 + $0x70] sm:$0xff] }
 0x642   : > { %v1367_v32 = vsel %vm1364_vm14, %v1366_v30, %v1362_v31  ;;  %1527 = vmatpush.msra.mxu3 %v1479_v28  ;;  %v1477_v30 = vld [vmem:[#allocation16 + $0x78] sm:$0xff]  ;;  %v1474_v31 = vld [vmem:[#allocation16 + $0x60] sm:$0xff] }
 0x643   : > { %v1368_v33 = vmul.f32 %v3810_v15, %v1367_v32  ;;  %v1475_v32 = vld [vmem:[#allocation16 + $0x68] sm:$0xff] }
 0x644   : > { %1528 = vmatpush.msra.mxu3 %v1477_v30  ;;  %v1542_v28 = vld [vmem:[#allocation19] sm:$0xff]  ;;  %v1494_v30 = vld [vmem:[#allocation18] sm:$0x3] }
 0x645   : > { %3540 = vmatmul.msk.f32.vlgmr.msra.gmra.mxu0 %vm1039_vm2, %v1368_v33  ;;  %v1472_v33 = vld [vmem:[#allocation16 + $0x50] sm:$0xff] }
 0x646   : > { %1529 = vmatpush.msra.mxu3 %v1475_v32 }
 0x648   : > { %1530 = vmatpush.msra.mxu3 %v1473_v34 }
 0x64a   : > { %1531 = vmatpush.msra.mxu3 %v1471_v36 }
 0x64e   : > { %1266 = vrot.lane.b32.xlu2 %v4771_v7, %s4438_s6 }
 0x6a9   : > { %v1250_v37 = vpop.xlane.xlu2 %1249 }
 0x6aa   : > { %3815 = vrcp.f32 %v1250_v37  ;;  %v1262_v44 = vand.u32 2147483648, %v1250_v37  ;;  %v1260_v7 = vand.u32 2147483647, %v1250_v37  ;;  %vm1256_vm0 = vweird.f32 %v1250_v37 }
 0x6ab   : > { %3817 = vrcp.f32 %v4440_v2  ;;  %v1565_v2 = vld [vmem:[#allocation19 + $0xb8] sm:$0xff] }
 0x6ac   : > { %v1263_v49 = vor.u32 1.1754944e-38, %v1262_v44  ;;  %vm1261_vm4 = vcmp.eq.f32.partialorder %v1260_v7, 8.507059e+37  ;;  %v1463_v44 = vld [vmem:[#allocation16 + $0x8] sm:$0xff]  ;;  %v1556_v7 = vld [vmem:[#allocation19 + $0x70] sm:$0xff] }
 0x6b0   : > { %v3816_v38 = vpop.eup %3815 }
 0x6b1   : > { %v1252_v40 = vmul.f32 %v3816_v38, %v1250_v37  ;;  %v1267_v41 = vpop.permute.xlu2 %1266  ;;  %vm1257_vm15 = vweird.f32 %v3816_v38  ;;  %v3818_v8 = vpop.eup %3817  ;;  %v1468_v37 = vld [vmem:[#allocation16 + $0x30] sm:$0xff] }
 0x6b2   : > { %1287 = vmatpush.msrb.mxu1 %v1267_v41  ;;  %vm1258_vm3 = vmor %vm1256_vm0, %vm1257_vm15  ;;  %v1430_v9 = vmul.f32 128.0, %v3818_v8  ;;  %vm1434_vm5 = vweird.f32 %v3818_v8  ;;  %v1464_v41 = vld [vmem:[#allocation16 + $0x10] sm:$0xff] }
 0x6b3   : > { %v1253_v43 = vsub.f32 1.0, %v1252_v40  ;;  %v1467_v40 = vld [vmem:[#allocation16 + $0x28] sm:$0xff] }
 0x6b4   : > { %1410 = vmatpush.msra.mxu1 %v942_v39  ;;  %v1431_v10 = vsub.f32 1.0, %v1430_v9  ;;  %v1466_v39 = vld [vmem:[#allocation16 + $0x20] sm:$0xff]  ;;  %v1563_v9 = vld [vmem:[#allocation19 + $0xa8] sm:$0xff] }
 0x6b5   : > { %v1254_v46 = vmul.f32 %v3816_v38, %v1253_v43  ;;  %v1462_v43 = vld [vmem:[#allocation16] sm:$0xff] }
 0x6b6   : > { %1411 = vmatpush.msra.mxu1 %v941_v42  ;;  %v1432_v11 = vmul.f32 %v3818_v8, %v1431_v10  ;;  %v1465_v42 = vld [vmem:[#allocation16 + $0x18] sm:$0xff] }
 0x6b7   : > { %v1255_v48 = vadd.f32 %v3816_v38, %v1254_v46  ;;  %v1573_v46 = vld [vmem:[#allocation19 + $0xf8] sm:$0xff] }
 0x6b8   : > { %1412 = vmatpush.msra.mxu1 %v940_v45  ;;  %v1433_v12 = vadd.f32 %v3818_v8, %v1432_v11  ;;  %v1557_v45 = vld [vmem:[#allocation19 + $0x78] sm:$0xff]  ;;  %v1546_v11 = vld [vmem:[#allocation19 + $0x20] sm:$0xff] }
 0x6b9   : > { %v1259_v50 = vsel %vm1258_vm3, %v3816_v38, %v1255_v48  ;;  %v1469_v38 = vld [vmem:[#allocation16 + $0x38] sm:$0xff]  ;;  %1578 = vmatpush.msrb.mxu0 %v1557_v45  ;;  %v1555_v48 = vld [vmem:[#allocation19 + $0x68] sm:$0xff] }
 0x6ba   : > { %1413 = vmatpush.msra.mxu1 %v939_v47  ;;  %v1264_v51 = vsel %vm1261_vm4, %v1263_v49, %v1259_v50  ;;  %v4818_v13 = vsel %vm1434_vm5, %v3818_v8, %v1433_v12  ;;  %1532 = vmatpush.msra.mxu3 %v1469_v38  ;;  %v1572_v47 = vld [vmem:[#allocation19 + $0xf0] sm:$0xff]  ;;  %v1571_v49 = vld [vmem:[#allocation19 + $0xe8] sm:$0xff]  ;;  %v1562_v12 = vld [vmem:[#allocation19 + $0xa0] sm:$0xff] }
 0x6bb   : > { %v1265_v52 = vmul.f32 %v3812_v21, %v1264_v51  ;;  %v1484_v21 = vld [vmem:[#allocation16 + $0xb0] sm:$0xff]  ;;  %1579 = vmatpush.msrb.mxu0 %v1556_v7  ;;  %v3786_v38 = vld [vmem:[#allocation21] ss:$0 sm:$0xff]  ;;  %v1696_v45 = vld [vmem:[#allocation7 + $0x2f0] sm:$0xff] }
 0x6bc   : > { %1504 = vmatpush.msra.mxu2 %v1484_v21  ;;  %1533 = vmatpush.msra.mxu3 %v1467_v40  ;;  %v1547_v8 = vld [vmem:[#allocation19 + $0x28] sm:$0xff]  ;;  %v3785_v21 = vld [vmem:[#allocation15] ss:$0 sm:$0xff] }
 0x6bd   : > { %3536 = vmatmul.msk.f32.vlgmr.msrb.gmra.mxu1 %vm1039_vm2, %v1265_v52  ;;  %v1554_v52 = vld [vmem:[#allocation19 + $0x60] sm:$0xff]  ;;  %1580 = vmatpush.msrb.mxu0 %v1555_v48  ;;  %v1692_v7 = vld [vmem:[#allocation7 + $0x2d0] sm:$0xff] }
 0x6be   : > { %1505 = vmatpush.msra.mxu2 %v1482_v23  ;;  %1534 = vmatpush.msra.mxu3 %v1465_v42  ;;  %v1694_v48 = vld [vmem:[#allocation7 + $0x2e0] sm:$0xff] }
 0x6bf   : > { %1598 = vmatpush.msrb.mxu1 %v1573_v46  ;;  %1581 = vmatpush.msrb.mxu0 %v1554_v52  ;;  %v1697_v46 = vld [vmem:[#allocation7 + $0x2f8] sm:$0xff] }
 0x6c0   : > { %1506 = vmatpush.msra.mxu2 %v1480_v25  ;;  %1535 = vmatpush.msra.mxu3 %v1463_v44  ;;  %v1560_v25 = vld [vmem:[#allocation19 + $0x90] sm:$0xff] }
 0x6c1   : > { %1599 = vmatpush.msrb.mxu1 %v1572_v47  ;;  %1582 = vmatpush.msrb.mxu0 %v1553_v55  ;;  %v1695_v44 = vld [vmem:[#allocation7 + $0x2e8] sm:$0xff]  ;;  %v1693_v47 = vld [vmem:[#allocation7 + $0x2d8] sm:$0xff] }
 0x6c2   : > { %v1392_v53 = vpop.f32.mrf.mxu0  ;;  %1507 = vmatpush.msra.mxu2 %v1478_v27  ;;  %v1559_v27 = vld [vmem:[#allocation19 + $0x88] sm:$0xff]  ;;  %1744 = vmatpush.msrb.mxu3 %v1696_v45 }
 0x6c3   : > { %1600 = vmatpush.msrb.mxu1 %v1571_v49  ;;  %v1691_v55 = vld [vmem:[#allocation7 + $0x2c8] sm:$0xff]  ;;  %v3788_v45 = vld [vmem:[#allocation24] ss:$0 sm:$0xff] }
 0x6c4   : > { %1508 = vmatpush.msra.mxu2 %v1476_v29  ;;  %v1558_v29 = vld [vmem:[#allocation19 + $0x80] sm:$0xff]  ;;  %1745 = vmatpush.msrb.mxu3 %v1693_v47 }
 0x6c5   : > { %3541 = vmatmul.msk.f32.vlgmr.msra.gmra.mxu1 %vm1011_vm1, %v1392_v53  ;;  %v1570_v53 = vld [vmem:[#allocation19 + $0xe0] sm:$0xff] }
 0x6c6   : > { %1509 = vmatpush.msra.mxu2 %v1474_v31  ;;  %1601 = vmatpush.msrb.mxu1 %v1570_v53  ;;  %v1496_v31 = vperm.slane %v1494_v30, 0  ;;  %v1689_v53 = vld [vmem:[#allocation7 + $0x2b8] sm:$0xff]  ;;  %v1702_v47 = vld [vmem:[#allocation10 + $0x98] sm:$0xff] }
 0x6c8   : > { %1510 = vmatpush.msra.mxu2 %v1472_v33 }
 0x6ca   : > { %1511 = vmatpush.msra.mxu2 %v1470_v35 }
 0x6cc   : > { %1512 = vmatpush.msra.mxu2 %v1468_v37 }
 0x6ce   : > { %1513 = vmatpush.msra.mxu2 %v1466_v39 }
 0x6d0   : > { %1514 = vmatpush.msra.mxu2 %v1464_v41 }
 0x6d2   : > { %1515 = vmatpush.msra.mxu2 %v1462_v43 }
 0x73a   : > { %v1289_v56 = vpop.f32.mrf.mxu1 }
 0x73b   : > { %3537 = vmatmul.msk.f32.vlgmr.msrb.gmra.mxu2 %vm1011_vm1, %v1289_v56  ;;  %v1569_v56 = vld [vmem:[#allocation19 + $0xd8] sm:$0xff] }
 0x73c   : > { %1602 = vmatpush.msrb.mxu1 %v1569_v56  ;;  %1724 = vmatpush.msrb.mxu2 %v1695_v44  ;;  %v1686_v56 = vld [vmem:[#allocation7 + $0x2a0] sm:$0xff] }
 0x73e   : > { %1725 = vmatpush.msrb.mxu2 %v1692_v7 }
 0x740   : > { %1726 = vmatpush.msrb.mxu2 %v1689_v53 }
 0x742   : > { %v1415_v61 = vpop.f32.mrf.mxu1  ;;  %1727 = vmatpush.msrb.mxu2 %v1686_v56 }
 0x7be   : > { %v1312_v58 = vpop.f32.mrf.mxu2 }
 0x7bf   : > { %v1315_v59 = vadd.f32 %v1312_v58, %v1211_v57  ;;  %v1552_v57 = vld [vmem:[#allocation19 + $0x50] sm:$0xff] }
 0x7c0   : > { %v1568_v58 = vld [vmem:[#allocation19 + $0xd0] sm:$0xff]  ;;  %1583 = vmatpush.msrb.mxu0 %v1552_v57 }
 0x7c1   : > { %v1418_v63 = vadd.f32 %v1415_v61, %v1315_v59  ;;  %v1551_v59 = vld [vmem:[#allocation19 + $0x48] sm:$0xff]  ;;  %1603 = vmatpush.msrb.mxu1 %v1568_v58  ;;  %v1550_v61 = vld [vmem:[#allocation19 + $0x40] sm:$0xff]  ;;  %v1688_v58 = vld [vmem:[#allocation7 + $0x2b0] sm:$0xff] }
 0x7c2   : > { %1584 = vmatpush.msrb.mxu0 %v1551_v59  ;;  %v1687_v57 = vld [vmem:[#allocation7 + $0x2a8] sm:$0xff] }
 0x7c3   : > { %v1423_v0 = vadd.f32 %v3783_v60, %v1418_v63  ;;  %v1567_v60 = vld [vmem:[#allocation19 + $0xc8] sm:$0xff]  ;;  %v1566_v63 = vld [vmem:[#allocation19 + $0xc0] sm:$0xff] }
 0x7c4   : > { %1604 = vmatpush.msrb.mxu1 %v1567_v60  ;;  %1585 = vmatpush.msrb.mxu0 %v1550_v61  ;;  %v1683_v59 = vld [vmem:[#allocation7 + $0x288] sm:$0xff]  ;;  %v1684_v60 = vld [vmem:[#allocation7 + $0x290] sm:$0xff]  ;;  %v1685_v61 = vld [vmem:[#allocation7 + $0x298] sm:$0xff] }
 0x7c5   : > { %v1424_v1 = vadd.f32 %v1423_v0, %v4764_v62  ;;  %1728 = vmatpush.msrb.mxu2 %v1683_v59 }
 0x7c6   : > { %1605 = vmatpush.msrb.mxu1 %v1566_v63  ;;  %v1680_v63 = vld [vmem:[#allocation7 + $0x270] sm:$0xff] }
 0x7c7   : > { %1427 = vadd.xlane.f32.xlu0 %v1424_v1  ;;  %1729 = vmatpush.msrb.mxu2 %v1680_v63 }
 0x7c8   : > { %1606 = vmatpush.msrb.mxu1 %v1565_v2  ;;  %v1677_v2 = vld [vmem:[#allocation7 + $0x258] sm:$0xff] }
 0x7c9   : > { %1730 = vmatpush.msrb.mxu2 %v1677_v2 }
 0x7ca   : > { %1607 = vmatpush.msrb.mxu1 %v1564_v5  ;;  %v1674_v5 = vld [vmem:[#allocation7 + $0x240] sm:$0xff] }
 0x7cb   : > { %1731 = vmatpush.msrb.mxu2 %v1674_v5 }
 0x7cc   : > { %1608 = vmatpush.msrb.mxu1 %v1563_v9  ;;  %v1671_v9 = vld [vmem:[#allocation7 + $0x228] sm:$0xff] }
 0x7cd   : > { %1732 = vmatpush.msrb.mxu2 %v1671_v9 }
 0x7ce   : > { %1609 = vmatpush.msrb.mxu1 %v1562_v12  ;;  %v1668_v12 = vld [vmem:[#allocation7 + $0x210] sm:$0xff] }
 0x7cf   : > { %1733 = vmatpush.msrb.mxu2 %v1668_v12 }
 0x83a   : > { %v1428_v62 = vpop.xlane.xlu0 %1427 }
 0x83b   : > { %v1436_v14 = vmul.f32 %v4818_v13, %v1428_v62 }
 0x83d   : > { %v4821_v15 = vsub.f32 %v1424_v1, %v1436_v14  ;;  %v1549_v1 = vld [vmem:[#allocation19 + $0x38] sm:$0xff] }
 0x83e   : > { %1586 = vmatpush.msrb.mxu0 %v1549_v1  ;;  %v1545_v14 = vld [vmem:[#allocation19 + $0x18] sm:$0xff]  ;;  %v1682_v1 = vld [vmem:[#allocation7 + $0x280] sm:$0xff] }
 0x83f   : > { %v1438_v16 = vmul.f32 %v4821_v15, %v4821_v15 }
 0x840   : > { %1587 = vmatpush.msrb.mxu0 %v1548_v4  ;;  %v1679_v4 = vld [vmem:[#allocation7 + $0x268] sm:$0xff] }
 0x841   : > { %1439 = vadd.xlane.f32.xlu0 %v1438_v16  ;;  %v1561_v16 = vld [vmem:[#allocation19 + $0x98] sm:$0xff] }
 0x842   : > { %1588 = vmatpush.msrb.mxu0 %v1547_v8  ;;  %1610 = vmatpush.msrb.mxu1 %v1561_v16  ;;  %v1676_v8 = vld [vmem:[#allocation7 + $0x250] sm:$0xff]  ;;  %v1665_v16 = vld [vmem:[#allocation7 + $0x1f8] sm:$0xff] }
 0x843   : > { %1734 = vmatpush.msrb.mxu2 %v1665_v16 }
 0x844   : > { %1589 = vmatpush.msrb.mxu0 %v1546_v11  ;;  %1611 = vmatpush.msrb.mxu1 %v1560_v25  ;;  %v1673_v11 = vld [vmem:[#allocation7 + $0x238] sm:$0xff]  ;;  %v1656_v25 = vld [vmem:[#allocation7 + $0x1b0] sm:$0xff] }
 0x846   : > { %1590 = vmatpush.msrb.mxu0 %v1545_v14  ;;  %1612 = vmatpush.msrb.mxu1 %v1559_v27  ;;  %v1670_v14 = vld [vmem:[#allocation7 + $0x220] sm:$0xff] }
 0x847   : > { %v1658_v27 = vld [vmem:[#allocation7 + $0x1c0] sm:$0xff] }
 0x848   : > { %1591 = vmatpush.msrb.mxu0 %v1544_v24  ;;  %1613 = vmatpush.msrb.mxu1 %v1558_v29  ;;  %v1661_v24 = vld [vmem:[#allocation7 + $0x1d8] sm:$0xff]  ;;  %v1654_v29 = vld [vmem:[#allocation7 + $0x1a0] sm:$0xff] }
 0x84a   : > { %1592 = vmatpush.msrb.mxu0 %v1543_v26  ;;  %v1657_v26 = vld [vmem:[#allocation7 + $0x1b8] sm:$0xff] }
 0x84c   : > { %1593 = vmatpush.msrb.mxu0 %v1542_v28  ;;  %v1653_v28 = vld [vmem:[#allocation7 + $0x198] sm:$0xff] }
 0x84e   : > { %1764 = vmatpush.msra.mxu0 %v1697_v46 }
 0x850   : > { %1765 = vmatpush.msra.mxu0 %v1694_v48  ;;  %v1701_v48 = vld [vmem:[#allocation10 + $0x90] sm:$0xff] }
 0x852   : > { %1766 = vmatpush.msra.mxu0 %v1691_v55 }
 0x854   : > { %1767 = vmatpush.msra.mxu0 %v1688_v58 }
 0x856   : > { %1768 = vmatpush.msra.mxu0 %v1685_v61 }
 0x858   : > { %1769 = vmatpush.msra.mxu0 %v1682_v1 }
 0x85a   : > { %1770 = vmatpush.msra.mxu0 %v1679_v4 }
 0x85c   : > { %1771 = vmatpush.msra.mxu0 %v1676_v8 }
 0x85e   : > { %1772 = vmatpush.msra.mxu0 %v1673_v11 }
 0x860   : > { %1773 = vmatpush.msra.mxu0 %v1670_v14 }
 0x8b4   : > { %v1440_v50 = vpop.xlane.xlu0 %1439 }
 0x8b5   : > { %v1441_v51 = vmul.f32 %v1440_v50, %v4818_v13 }
 0x8b7   : > { %v1442_v54 = vadd.f32 1e-05, %v1441_v51 }
 0x8b9   : > { %3819 = vrsqrt.f32 %v1442_v54  ;;  %vm1449_vm7 = vweird.f32 %v1442_v54 }
 0x8bf   : > { %v3820_v0 = vpop.eup %3819 }
 0x8c0   : > { %v1444_v3 = vmul.f32 %v3820_v0, %v1442_v54  ;;  %vm1450_vm6 = vweird.f32 %v3820_v0  ;;  %v1690_v54 = vld [vmem:[#allocation7 + $0x2c0] sm:$0xff] }
 0x8c1   : > { %vm1451_vm8 = vmor %vm1449_vm7, %vm1450_vm6  ;;  %1746 = vmatpush.msrb.mxu3 %v1690_v54 }
 0x8c2   : > { %v1445_v6 = vmul.f32 %v3820_v0, %v1444_v3  ;;  %v1678_v3 = vld [vmem:[#allocation7 + $0x260] sm:$0xff] }
 0x8c3   : > { %1747 = vmatpush.msrb.mxu3 %v1687_v57 }
 0x8c4   : > { %v1446_v10 = vmul.f32 0.5, %v1445_v6  ;;  %v1675_v6 = vld [vmem:[#allocation7 + $0x248] sm:$0xff] }
 0x8c5   : > { %1748 = vmatpush.msrb.mxu3 %v1684_v60 }
 0x8c6   : > { %v1447_v62 = vsub.f32 1.5, %v1446_v10  ;;  %v1672_v10 = vld [vmem:[#allocation7 + $0x230] sm:$0xff] }
 0x8c8   : > { %v1448_v17 = vmul.f32 %v3820_v0, %v1447_v62  ;;  %v1669_v62 = vld [vmem:[#allocation7 + $0x218] sm:$0xff] }
 0x8ca   : > { %v1452_v19 = vsel %vm1451_vm8, %v3820_v0, %v1448_v17  ;;  %v1681_v0 = vld [vmem:[#allocation7 + $0x278] sm:$0xff]  ;;  %v1666_v17 = vld [vmem:[#allocation7 + $0x200] sm:$0xff] }
 0x8cb   : > { %v1453_v20 = vmul.f32 %v1452_v19, %v4821_v15  ;;  %v1497_v15 = vperm.slane %v1494_v30, 1  ;;  %1749 = vmatpush.msrb.mxu3 %v1681_v0  ;;  %v1662_v19 = vld [vmem:[#allocation7 + $0x1e0] sm:$0xff]  ;;  %v1655_v30 = vld [vmem:[#allocation7 + $0x1a8] sm:$0xff] }
 0x8cc   : > { %1735 = vmatpush.msrb.mxu2 %v1662_v19 }
 0x8cd   : > { %v1457_v22 = vmul.f32 %v3784_v18, %v1453_v20  ;;  %1750 = vmatpush.msrb.mxu3 %v1678_v3  ;;  %v1667_v18 = vld [vmem:[#allocation7 + $0x208] sm:$0xff] }
 0x8ce   : > { %1774 = vmatpush.msra.mxu0 %v1667_v18  ;;  %v1663_v20 = vld [vmem:[#allocation7 + $0x1e8] sm:$0xff] }
 0x8cf   : > { %v1461_v23 = vadd.f32 %v3785_v21, %v1457_v22  ;;  %1751 = vmatpush.msrb.mxu3 %v1675_v6  ;;  %v1664_v21 = vld [vmem:[#allocation7 + $0x1f0] sm:$0xff]  ;;  %v1659_v22 = vld [vmem:[#allocation7 + $0x1c8] sm:$0xff] }
 0x8d0   : > { %1775 = vmatpush.msra.mxu0 %v1664_v21  ;;  %1736 = vmatpush.msrb.mxu2 %v1659_v22 }
 0x8d1   : > { %1516 = vmatmul.f32.vlgmr.msra.gmra.mxu2 %v1461_v23  ;;  %1536 = vmatmul.f32.vlgmr.msra.gmra.mxu3 %v1461_v23 }
 0x8d2   : > { %1752 = vmatpush.msrb.mxu3 %v1672_v10  ;;  %1776 = vmatpush.msra.mxu0 %v1661_v24 }
 0x8d3   : > { %1737 = vmatpush.msrb.mxu2 %v1656_v25 }
 0x8d4   : > { %1753 = vmatpush.msrb.mxu3 %v1669_v62  ;;  %1777 = vmatpush.msra.mxu0 %v1658_v27 }
 0x8d5   : > { %1738 = vmatpush.msrb.mxu2 %v1653_v28 }
 0x8d6   : > { %1754 = vmatpush.msrb.mxu3 %v1666_v17  ;;  %1778 = vmatpush.msra.mxu0 %v1655_v30 }
 0x8d8   : > { %1755 = vmatpush.msrb.mxu3 %v1663_v20 }
 0x954   : > { %v1517_v32 = vpop.f32.mrf.mxu2  ;;  %v1537_v33 = vpop.f32.mrf.mxu3 }
 0x955   : > { %v1518_v34 = vadd.f32 %v1517_v32, %v1496_v31  ;;  %v1538_v35 = vadd.f32 %v1537_v33, %v1497_v15  ;;  %v1650_v31 = vld [vmem:[#allocation7 + $0x180] sm:$0xff]  ;;  %v1651_v15 = vld [vmem:[#allocation7 + $0x188] sm:$0xff]  ;;  %v1652_v32 = vld [vmem:[#allocation7 + $0x190] sm:$0xff] }
 0x956   : > { %1739 = vmatpush.msrb.mxu2 %v1650_v31  ;;  %1779 = vmatpush.msra.mxu0 %v1652_v32 }
 0x957   : > { %v1540_v36 = vmax.f32 %v1518_v34, 0.0  ;;  %v1541_v37 = vmax.f32 %v1538_v35, 0.0 }
 0x959   : > { %1594 = vmatmul.f32.vlgmr.msrb.gmra.mxu0 %v1540_v36  ;;  %1614 = vmatmul.f32.vlgmr.msrb.gmra.mxu1 %v1541_v37 }
 0x9d6   : > { %v1595_v39 = vpop.f32.mrf.mxu0  ;;  %v1615_v41 = vpop.f32.mrf.mxu1 }
 0x9d7   : > { %v1596_v40 = vadd.f32 %v3786_v38, %v1595_v39 }
 0x9d9   : > { %v1616_v42 = vadd.f32 %v1615_v41, %v1596_v40 }
 0x9db   : > { %v1618_v43 = vadd.f32 %v1616_v42, %v1461_v23  ;;  %v1660_v23 = vld [vmem:[#allocation7 + $0x1d0] sm:$0xff]  ;;  %v3787_v42 = vld [vmem:[#allocation22] ss:$0 sm:$0xff] }
 0x9dc   : > { %1756 = vmatpush.msrb.mxu3 %v1660_v23 }
 0x9dd   : > { %1621 = vadd.xlane.f32.xlu0 %v1618_v43 }
 0x9de   : > { %1757 = vmatpush.msrb.mxu3 %v1657_v26 }
 0x9e0   : > { %1758 = vmatpush.msrb.mxu3 %v1654_v29 }
 0x9e2   : > { %1759 = vmatpush.msrb.mxu3 %v1651_v15 }
 0x9e4   : > { %1976 = vmatpush.msra.mxu3 %v1702_v47 }
 0x9e6   : > { %1977 = vmatpush.msra.mxu3 %v1701_v48 }
 0xa50   : > { %v1622_v49 = vpop.xlane.xlu0 %1621 }
 0xa51   : > { %v1623_v50 = vmul.f32 %v1622_v49, %v4818_v13  ;;  %v1700_v49 = vld [vmem:[#allocation10 + $0x88] sm:$0xff] }
 0xa52   : > { %1978 = vmatpush.msra.mxu3 %v1700_v49 }
 0xa53   : > { %v4828_v51 = vsub.f32 %v1618_v43, %v1623_v50  ;;  %v1699_v50 = vld [vmem:[#allocation10 + $0x80] sm:$0xff] }
 0xa54   : > { %1979 = vmatpush.msra.mxu3 %v1699_v50 }
 0xa55   : > { %v1625_v52 = vmul.f32 %v4828_v51, %v4828_v51 }
 0xa57   : > { %1626 = vadd.xlane.f32.xlu2 %v1625_v52  ;;  %v1716_v52 = vld [vmem:[#allocation9 + $0x3] sm:$0x7] }
 0xa58   : > { %v1720_v53 = vperm.slane %v1716_v52, 2  ;;  %v1718_v55 = vperm.slane %v1716_v52, 0 }
 0xaca   : > { %v1627_v33 = vpop.xlane.xlu2 %1626 }
 0xacb   : > { %v1628_v34 = vmul.f32 %v1627_v33, %v4818_v13 }
 0xacd   : > { %v1629_v35 = vadd.f32 1e-05, %v1628_v34 }
 0xacf   : > { %3821 = vrsqrt.f32 %v1629_v35  ;;  %vm1636_vm10 = vweird.f32 %v1629_v35 }
 0xad5   : > { %v3822_v36 = vpop.eup %3821 }
 0xad6   : > { %v1631_v37 = vmul.f32 %v3822_v36, %v1629_v35  ;;  %vm1637_vm9 = vweird.f32 %v3822_v36 }
 0xad7   : > { %vm1638_vm11 = vmor %vm1636_vm10, %vm1637_vm9 }
 0xad8   : > { %v1632_v38 = vmul.f32 %v3822_v36, %v1631_v37 }
 0xada   : > { %v1633_v39 = vmul.f32 0.5, %v1632_v38 }
 0xadc   : > { %v1634_v40 = vsub.f32 1.5, %v1633_v39 }
 0xade   : > { %v1635_v41 = vmul.f32 %v3822_v36, %v1634_v40 }
 0xae0   : > { %v1639_v43 = vsel %vm1638_vm11, %v3822_v36, %v1635_v41 }
 0xae1   : > { %v1640_v44 = vmul.f32 %v1639_v43, %v4828_v51  ;;  %v1719_v51 = vperm.slane %v1716_v52, 1 }
 0xae3   : > { %v1644_v46 = vmul.f32 %v3787_v42, %v1640_v44 }
 0xae5   : > { %v4834_v7 = vadd.f32 %v3788_v45, %v1644_v46 }
 0xae7   : > { %1740 = vmatmul.f32.vlgmr.msrb.gmra.mxu2 %v4834_v7  ;;  %1760 = vmatmul.f32.vlgmr.msrb.gmra.mxu3 %v4834_v7 }
 0xae8   : > { %1780 = vmatmul.f32.vlgmr.msra.gmra.mxu0 %v4834_v7 }
 0xb65   : > { %v1781_v54 = vpop.f32.mrf.mxu0 }
 0xb66   : > { %v4839_v59 = vadd.f32 %v1781_v54, %v1720_v53 }
 0xb6a   : > { %v1761_v56 = vpop.f32.mrf.mxu3  ;;  %v1741_v57 = vpop.f32.mrf.mxu2 }
 0xb6b   : > { %v1762_v58 = vadd.f32 %v1761_v56, %v1719_v51  ;;  %v1742_v60 = vadd.f32 %v1741_v57, %v1718_v55 }
 0xb6d   : > { %2089 = vrot.lane.b32.xlu2 %v1762_v58, %s4439_s30  ;;  %3542 = vmatpush.xpose.msk.msra.mxu1 %vm1011_vm1, %v1762_v58 }
 0xb70   : > { %3543 = vmatmul.msk.f32.vlgmr.msra.gmra.mxu1 %vm1011_vm1, %v1742_v60 }
 0xb71   : > { %1853 = vmatpush.msrb.mxu1 %v4839_v59 }
 0xbc7   : > { %v2090_v61 = vpop.permute.xlu2 %2089 }
 0xbc8   : > { %3554 = vmatpush.xpose.msk.msrb.mxu3 %vm1011_vm1, %v2090_v61 }
 0xbed   : > { %v1807_v63 = vpop.f32.mrf.mxu1 }
 0xbee   : > { %v1810_v0 = vmul.f32 0.17677669, %v1807_v63 }
 0xbf0   : > { %v1811_v1 = vsel %vm1039_vm2, %v1810_v0, -inf }
 0xbf1   : > { %1812 = vmax.xlane.f32.xlu1 %v1811_v1 }
 0xc0a   : > { %1984 = vrot.lane.b32.xlu1 %v1742_v60, %s4438_s6 }
 0xc64   : > { %v1813_v2 = vpop.xlane.xlu1 %1812 }
 0xc65   : > { %v1814_v3 = vsub.f32 %v1810_v0, %v1813_v2 }
 0xc67   : > { %v1815_v4 = vmul.f32 1.442695, %v1814_v3 }
 0xc69   : > { %3823 = vpow2.f32 %v1815_v4 }
 0xc6f   : > { %v3824_v5 = vpop.eup %3823 }
 0xc70   : > { %v1817_v6 = vsel %vm1039_vm2, %v3824_v5, 0.0 }
 0xc71   : > { %1818 = vadd.xlane.f32.xlu0 %v1817_v6 }
 0xc7c   : > { %v1985_v24 = vpop.permute.xlu1 %1984 }
 0xc85   : > { %1860 = vrot.lane.b32.xlu0 %v1762_v58, %s4437_s2 }
 0xc8d   : > { %1858 = vrot.lane.b32.xlu0 %v1742_v60, %s4437_s2 }
 0xc95   : > { %1986 = vrot.lane.b32.xlu0 %v1762_v58, %s4438_s6 }
 0xc9d   : > { %2087 = vrot.lane.b32.xlu0 %v1742_v60, %s4439_s30 }
 0xce4   : > { %v1819_v8 = vpop.xlane.xlu0 %1818 }
 0xce5   : > { %3825 = vrcp.f32 %v1819_v8  ;;  %v1831_v12 = vand.u32 2147483648, %v1819_v8  ;;  %v1829_v14 = vand.u32 2147483647, %v1819_v8  ;;  %vm1825_vm13 = vweird.f32 %v1819_v8 }
 0xce7   : > { %v1832_v17 = vor.u32 1.1754944e-38, %v1831_v12  ;;  %vm1830_vm15 = vcmp.eq.f32.partialorder %v1829_v14, 8.507059e+37 }
 0xceb   : > { %v3826_v9 = vpop.eup %3825 }
 0xcec   : > { %v1821_v10 = vmul.f32 %v3826_v9, %v1819_v8  ;;  %vm1826_vm12 = vweird.f32 %v3826_v9 }
 0xced   : > { %vm1827_vm14 = vmor %vm1825_vm13, %vm1826_vm12 }
 0xcee   : > { %v1822_v11 = vsub.f32 1.0, %v1821_v10 }
 0xcf0   : > { %v1823_v62 = vmul.f32 %v3826_v9, %v1822_v11 }
 0xcf2   : > { %v1824_v16 = vadd.f32 %v3826_v9, %v1823_v62 }
 0xcf4   : > { %v1828_v18 = vsel %vm1827_vm14, %v3826_v9, %v1824_v16 }
 0xcf5   : > { %v1833_v19 = vsel %vm1830_vm15, %v1832_v17, %v1828_v18  ;;  %v1706_v17 = vld [vmem:[#allocation10 + $0xb8] sm:$0xff]  ;;  %v1705_v18 = vld [vmem:[#allocation10 + $0xb0] sm:$0xff] }
 0xcf6   : > { %v1834_v20 = vmul.f32 %v3824_v5, %v1833_v19  ;;  %1953 = vmatpush.msra.mxu2 %v1706_v17  ;;  %v1704_v19 = vld [vmem:[#allocation10 + $0xa8] sm:$0xff] }
 0xcf7   : > { %v1861_v21 = vpop.permute.xlu0 %1860  ;;  %v2238_v17 = vld [vmem:[#allocation16 + $0x140] sm:$0xff] }
 0xcf8   : > { %3544 = vmatmul.msk.f32.vlgmr.msrb.gmra.mxu1 %vm1039_vm2, %v1834_v20  ;;  %1954 = vmatpush.msra.mxu2 %v1705_v18  ;;  %v1703_v20 = vld [vmem:[#allocation10 + $0xa0] sm:$0xff]  ;;  %v2239_v18 = vld [vmem:[#allocation16 + $0x148] sm:$0xff] }
 0xcf9   : > { %3545 = vmatpush.xpose.msk.msra.mxu1 %vm1011_vm1, %v1861_v21  ;;  %v1710_v21 = vld [vmem:[#allocation10 + $0xd8] sm:$0xff] }
 0xcfa   : > { %1955 = vmatpush.msra.mxu2 %v1704_v19  ;;  %v2236_v19 = vld [vmem:[#allocation16 + $0x130] sm:$0xff] }
 0xcfc   : > { %1956 = vmatpush.msra.mxu2 %v1703_v20  ;;  %v2237_v20 = vld [vmem:[#allocation16 + $0x138] sm:$0xff] }
 0xcfe   : > { %2078 = vmatpush.msrb.mxu2 %v1710_v21  ;;  %v2234_v21 = vld [vmem:[#allocation16 + $0x120] sm:$0xff] }
 0xcff   : > { %v1859_v22 = vpop.permute.xlu0 %1858 }
 0xd00   : > { %3546 = vmatmul.msk.f32.vlgmr.msra.gmra.mxu1 %vm1011_vm1, %v1859_v22  ;;  %v1709_v22 = vld [vmem:[#allocation10 + $0xd0] sm:$0xff] }
 0xd01   : > { %2079 = vmatpush.msrb.mxu2 %v1709_v22  ;;  %v2235_v22 = vld [vmem:[#allocation16 + $0x128] sm:$0xff] }
 0xd07   : > { %v1987_v23 = vpop.permute.xlu0 %1986 }
 0xd08   : > { %3550 = vmatpush.xpose.msk.msrb.mxu0 %vm1011_vm1, %v1987_v23  ;;  %v1708_v23 = vld [vmem:[#allocation10 + $0xc8] sm:$0xff] }
 0xd09   : > { %2080 = vmatpush.msrb.mxu2 %v1708_v23  ;;  %v2232_v23 = vld [vmem:[#allocation16 + $0x110] sm:$0xff] }
 0xd0b   : > { %3551 = vmatmul.msk.f32.vlgmr.msrb.gmra.mxu0 %vm1011_vm1, %v1985_v24  ;;  %v1707_v24 = vld [vmem:[#allocation10 + $0xc0] sm:$0xff] }
 0xd0c   : > { %2081 = vmatpush.msrb.mxu2 %v1707_v24  ;;  %v2233_v24 = vld [vmem:[#allocation16 + $0x118] sm:$0xff] }
 0xd0f   : > { %v2088_v26 = vpop.permute.xlu0 %2087 }
 0xd75   : > { %v1855_v25 = vpop.f32.mrf.mxu1 }
 0xd76   : > { %3549 = vmatmul.msk.f32.vlgmr.msra.gmra.mxu3 %vm1011_vm1, %v1855_v25 }
 0xd7d   : > { %v1883_v27 = vpop.f32.mrf.mxu1 }
 0xd7e   : > { %v1886_v28 = vmul.f32 0.17677669, %v1883_v27  ;;  %3555 = vmatmul.msk.f32.vlgmr.msrb.gmra.mxu3 %vm1011_vm1, %v2088_v26  ;;  %v1713_v26 = vld [vmem:[#allocation10 + $0xf0] sm:$0xff]  ;;  %v1712_v27 = vld [vmem:[#allocation10 + $0xe8] sm:$0xff] }
 0xd80   : > { %v1887_v29 = vsel %vm1039_vm2, %v1886_v28, -inf }
 0xd81   : > { %1888 = vmax.xlane.f32.xlu0 %v1887_v29 }
 0xd88   : > { %v2009_v30 = vpop.f32.mrf.mxu0 }
 0xd89   : > { %v2012_v31 = vmul.f32 0.17677669, %v2009_v30 }
 0xd8b   : > { %v2013_v15 = vsel %vm1039_vm2, %v2012_v31, -inf }
 0xd8c   : > { %2014 = vmax.xlane.f32.xlu2 %v2013_v15 }
 0xdf4   : > { %v1889_v32 = vpop.xlane.xlu0 %1888 }
 0xdf5   : > { %v1890_v33 = vsub.f32 %v1886_v28, %v1889_v32 }
 0xdf7   : > { %v1891_v34 = vmul.f32 1.442695, %v1890_v33 }
 0xdf9   : > { %3827 = vpow2.f32 %v1891_v34  ;;  %v4862_v35 = vpop.f32.mrf.mxu3 }
 0xdff   : > { %v3828_v36 = vpop.eup %3827  ;;  %v2015_v37 = vpop.xlane.xlu2 %2014 }
 0xe00   : > { %v2016_v38 = vsub.f32 %v2012_v31, %v2015_v37  ;;  %v1893_v39 = vsel %vm1039_vm2, %v3828_v36, 0.0 }
 0xe01   : > { %v2112_v40 = vpop.f32.mrf.mxu3  ;;  %1894 = vadd.xlane.f32.xlu0 %v1893_v39 }
 0xe02   : > { %v2017_v41 = vmul.f32 1.442695, %v2016_v38  ;;  %v2115_v42 = vmul.f32 0.17677669, %v2112_v40 }
 0xe04   : > { %3829 = vpow2.f32 %v2017_v41  ;;  %v2116_v43 = vsel %vm1039_vm2, %v2115_v42, -inf }
 0xe05   : > { %2117 = vmax.xlane.f32.xlu1 %v2116_v43 }
 0xe0a   : > { %v3830_v44 = vpop.eup %3829 }
 0xe0b   : > { %v2019_v45 = vsel %vm1039_vm2, %v3830_v44, 0.0 }
 0xe0c   : > { %2020 = vadd.xlane.f32.xlu2 %v2019_v45 }
 0xe1e   : > { %1912 = vrot.lane.b32.xlu1 %v4839_v59, %s4437_s2 }
 0xe24   : > { %2037 = vrot.lane.b32.xlu2 %v4839_v59, %s4438_s6 }
 0xe74   : > { %v1895_v46 = vpop.xlane.xlu0 %1894 }
 0xe75   : > { %3831 = vrcp.f32 %v1895_v46  ;;  %v1907_v60 = vand.u32 2147483648, %v1895_v46  ;;  %vm1901_vm3 = vweird.f32 %v1895_v46  ;;  %v1905_v63 = vand.u32 2147483647, %v1895_v46 }
 0xe77   : > { %v1908_v2 = vor.u32 1.1754944e-38, %v1907_v60  ;;  %vm1906_vm5 = vcmp.eq.f32.partialorder %v1905_v63, 8.507059e+37  ;;  %v2254_v63 = vld [vmem:[#allocation16 + $0x1c0] sm:$0xff] }
 0xe78   : > { %v2118_v47 = vpop.xlane.xlu1 %2117 }
 0xe79   : > { %v2119_v48 = vsub.f32 %v2115_v42, %v2118_v47  ;;  %v1711_v42 = vld [vmem:[#allocation10 + $0xe0] sm:$0xff] }
 0xe7b   : > { %v3832_v49 = vpop.eup %3831  ;;  %v2120_v50 = vmul.f32 1.442695, %v2119_v48  ;;  %v3789_v48 = vld [vmem:[#allocation12 + $0x1] ss:$0 sm:$0xff] }
 0xe7c   : > { %v1897_v52 = vmul.f32 %v3832_v49, %v1895_v46  ;;  %vm1902_vm0 = vweird.f32 %v3832_v49 }
 0xe7d   : > { %3833 = vpow2.f32 %v2120_v50  ;;  %vm1903_vm4 = vmor %vm1901_vm3, %vm1902_vm0 }
 0xe7e   : > { %v1898_v51 = vsub.f32 1.0, %v1897_v52 }
 0xe7f   : > { %v2021_v53 = vpop.xlane.xlu2 %2020 }
 0xe80   : > { %3835 = vrcp.f32 %v2021_v53  ;;  %v1899_v54 = vmul.f32 %v3832_v49, %v1898_v51  ;;  %v2033_v6 = vand.u32 2147483648, %v2021_v53  ;;  %vm2027_vm7 = vweird.f32 %v2021_v53 }
 0xe81   : > { %v2031_v8 = vand.u32 2147483647, %v2021_v53 }
 0xe82   : > { %v1900_v58 = vadd.f32 %v3832_v49, %v1899_v54  ;;  %v2034_v62 = vor.u32 1.1754944e-38, %v2033_v6  ;;  %v2261_v54 = vld [vmem:[#allocation16 + $0x1f8] sm:$0xff] }
 0xe83   : > { %v4871_v55 = vpop.eup %3833  ;;  %vm2032_vm9 = vcmp.eq.f32.partialorder %v2031_v8, 8.507059e+37  ;;  %2289 = vmatpush.msra.mxu3 %v2261_v54  ;;  %v2249_v6 = vld [vmem:[#allocation16 + $0x198] sm:$0xff]  ;;  %v2246_v8 = vld [vmem:[#allocation16 + $0x180] sm:$0xff] }
 0xe84   : > { %v2122_v56 = vsel %vm1039_vm2, %v4871_v55, 0.0  ;;  %v1904_v1 = vsel %vm1903_vm4, %v3832_v49, %v1900_v58 }
 0xe85   : > { %2123 = vadd.xlane.f32.xlu0 %v2122_v56  ;;  %v1909_v4 = vsel %vm1906_vm5, %v1908_v2, %v1904_v1  ;;  %v2259_v56 = vld [vmem:[#allocation16 + $0x1e8] sm:$0xff]  ;;  %v2252_v1 = vld [vmem:[#allocation16 + $0x1b0] sm:$0xff]  ;;  %v2253_v2 = vld [vmem:[#allocation16 + $0x1b8] sm:$0xff] }
 0xe86   : > { %v3836_v57 = vpop.eup %3835  ;;  %v1910_v10 = vmul.f32 %v3828_v36, %v1909_v4  ;;  %2290 = vmatpush.msra.mxu3 %v2259_v56  ;;  %v2251_v4 = vld [vmem:[#allocation16 + $0x1a8] sm:$0xff] }
 0xe87   : > { %v2023_v61 = vmul.f32 %v3836_v57, %v2021_v53  ;;  %vm2028_vm6 = vweird.f32 %v3836_v57  ;;  %v2038_v12 = vpop.permute.xlu2 %2037  ;;  %v2260_v53 = vld [vmem:[#allocation16 + $0x1f0] sm:$0xff]  ;;  %v2332_v56 = vld [vmem:[#allocation19 + $0x1a0] sm:$0xff] }
 0xe88   : > { %vm2029_vm8 = vmor %vm2027_vm7, %vm2028_vm6 }
 0xe89   : > { %v2024_v0 = vsub.f32 1.0, %v2023_v61  ;;  %v2256_v61 = vld [vmem:[#allocation16 + $0x1d0] sm:$0xff] }
 0xe8b   : > { %v2025_v3 = vmul.f32 %v3836_v57, %v2024_v0  ;;  %v2255_v0 = vld [vmem:[#allocation16 + $0x1c8] sm:$0xff] }
 0xe8d   : > { %v2026_v5 = vadd.f32 %v3836_v57, %v2025_v3  ;;  %v2250_v3 = vld [vmem:[#allocation16 + $0x1a0] sm:$0xff] }
 0xe8f   : > { %v2030_v11 = vsel %vm2029_vm8, %v3836_v57, %v2026_v5  ;;  %v2248_v5 = vld [vmem:[#allocation16 + $0x190] sm:$0xff] }
 0xe90   : > { %v1913_v9 = vpop.permute.xlu1 %1912  ;;  %v2035_v14 = vsel %vm2032_vm9, %v2034_v62, %v2030_v11  ;;  %v2245_v11 = vld [vmem:[#allocation16 + $0x178] sm:$0xff]  ;;  %v2243_v62 = vld [vmem:[#allocation16 + $0x168] sm:$0xff] }
 0xe91   : > { %1933 = vmatpush.msrb.mxu1 %v1913_v9  ;;  %v2036_v16 = vmul.f32 %v3830_v44, %v2035_v14  ;;  %v2247_v9 = vld [vmem:[#allocation16 + $0x188] sm:$0xff]  ;;  %v2240_v14 = vld [vmem:[#allocation16 + $0x150] sm:$0xff] }
 0xe92   : > { %3547 = vmatmul.msk.f32.vlgmr.msrb.gmra.mxu1 %vm1039_vm2, %v1910_v10  ;;  %v2244_v10 = vld [vmem:[#allocation16 + $0x170] sm:$0xff] }
 0xe93   : > { %2058 = vmatpush.msra.mxu1 %v2038_v12  ;;  %v2242_v12 = vld [vmem:[#allocation16 + $0x160] sm:$0xff] }
 0xe99   : > { %2140 = vrot.lane.b32.xlu0 %v4839_v59, %s4439_s30  ;;  %v1714_v59 = vld [vmem:[#allocation10 + $0xf8] sm:$0xff] }
 0xe9a   : > { %3552 = vmatmul.msk.f32.vlgmr.msra.gmra.mxu1 %vm1039_vm2, %v2036_v16  ;;  %v2241_v16 = vld [vmem:[#allocation16 + $0x158] sm:$0xff] }
 0xe9b   : > { %2181 = vmatpush.msrb.mxu1 %v1714_v59  ;;  %v2231_v59 = vld [vmem:[#allocation16 + $0x108] sm:$0xff] }
 0xe9d   : > { %2182 = vmatpush.msrb.mxu1 %v1713_v26  ;;  %v2327_v26 = vld [vmem:[#allocation19 + $0x178] sm:$0xff] }
 0xe9f   : > { %2183 = vmatpush.msrb.mxu1 %v1712_v27  ;;  %v2343_v27 = vld [vmem:[#allocation19 + $0x1f8] sm:$0xff] }
 0xea1   : > { %2184 = vmatpush.msrb.mxu1 %v1711_v42  ;;  %v2337_v42 = vld [vmem:[#allocation19 + $0x1c8] sm:$0xff] }
 0xea3   : > { %2369 = vmatpush.msra.mxu1 %v2343_v27  ;;  %v2470_v27 = vld [vmem:[#allocation7 + $0x478] sm:$0xff] }
 0xef8   : > { %v2124_v25 = vpop.xlane.xlu0 %2123 }
 0xef9   : > { %3837 = vrcp.f32 %v2124_v25  ;;  %v2136_v31 = vand.u32 2147483648, %v2124_v25  ;;  %v2134_v32 = vand.u32 2147483647, %v2124_v25  ;;  %vm2130_vm11 = vweird.f32 %v2124_v25 }
 0xefb   : > { %v2137_v34 = vor.u32 1.1754944e-38, %v2136_v31  ;;  %vm2135_vm13 = vcmp.eq.f32.partialorder %v2134_v32, 8.507059e+37  ;;  %v2341_v31 = vld [vmem:[#allocation19 + $0x1e8] sm:$0xff] }
 0xeff   : > { %v3838_v28 = vpop.eup %3837 }
 0xf00   : > { %v2126_v29 = vmul.f32 %v3838_v28, %v2124_v25  ;;  %vm2131_vm10 = vweird.f32 %v3838_v28  ;;  %v2230_v25 = vld [vmem:[#allocation16 + $0x100] sm:$0xff] }
 0xf01   : > { %vm2132_vm12 = vmor %vm2130_vm11, %vm2131_vm10 }
 0xf02   : > { %v2127_v30 = vsub.f32 1.0, %v2126_v29  ;;  %v2342_v29 = vld [vmem:[#allocation19 + $0x1f0] sm:$0xff] }
 0xf03   : > { %2370 = vmatpush.msra.mxu1 %v2342_v29  ;;  %v2466_v29 = vld [vmem:[#allocation7 + $0x458] sm:$0xff] }
 0xf04   : > { %v2128_v15 = vmul.f32 %v3838_v28, %v2127_v30  ;;  %v2325_v30 = vld [vmem:[#allocation19 + $0x168] sm:$0xff] }
 0xf05   : > { %2371 = vmatpush.msra.mxu1 %v2341_v31 }
 0xf06   : > { %v2129_v33 = vadd.f32 %v3838_v28, %v2128_v15 }
 0xf08   : > { %v2133_v36 = vsel %vm2132_vm12, %v3838_v28, %v2129_v33  ;;  %v2326_v28 = vld [vmem:[#allocation19 + $0x170] sm:$0xff]  ;;  %v2324_v33 = vld [vmem:[#allocation19 + $0x160] sm:$0xff] }
 0xf09   : > { %v2138_v37 = vsel %vm2135_vm13, %v2137_v34, %v2133_v36  ;;  %v2340_v34 = vld [vmem:[#allocation19 + $0x1e0] sm:$0xff] }
 0xf0a   : > { %v2139_v38 = vmul.f32 %v4871_v55, %v2138_v37  ;;  %v2258_v55 = vld [vmem:[#allocation16 + $0x1e0] sm:$0xff]  ;;  %2372 = vmatpush.msra.mxu1 %v2340_v34 }
 0xf0b   : > { %v2141_v39 = vpop.permute.xlu0 %2140  ;;  %v2323_v37 = vld [vmem:[#allocation19 + $0x158] sm:$0xff] }
 0xf0c   : > { %2161 = vmatpush.msra.mxu0 %v2141_v39  ;;  %v2322_v39 = vld [vmem:[#allocation19 + $0x150] sm:$0xff]  ;;  %v2462_v34 = vld [vmem:[#allocation7 + $0x438] sm:$0xff] }
 0xf0d   : > { %3556 = vmatmul.msk.f32.vlgmr.msra.gmra.mxu0 %vm1039_vm2, %v2139_v38  ;;  %v2339_v38 = vld [vmem:[#allocation19 + $0x1d8] sm:$0xff] }
 0xf0e   : > { %2349 = vmatpush.msrb.mxu0 %v2327_v26  ;;  %2373 = vmatpush.msra.mxu1 %v2339_v38  ;;  %v2469_v26 = vld [vmem:[#allocation7 + $0x470] sm:$0xff]  ;;  %v2459_v38 = vld [vmem:[#allocation7 + $0x420] sm:$0xff] }
 0xf0f   : > { %v1935_v40 = vpop.f32.mrf.mxu1 }
 0xf10   : > { %3548 = vmatmul.msk.f32.vlgmr.msra.gmra.mxu2 %vm1011_vm1, %v1935_v40  ;;  %2350 = vmatpush.msrb.mxu0 %v2326_v28  ;;  %v2338_v40 = vld [vmem:[#allocation19 + $0x1d0] sm:$0xff] }
 0xf11   : > { %2269 = vmatpush.msra.mxu2 %v2260_v53  ;;  %2374 = vmatpush.msra.mxu1 %v2338_v40  ;;  %v2333_v53 = vld [vmem:[#allocation19 + $0x1a8] sm:$0xff]  ;;  %v2465_v28 = vld [vmem:[#allocation7 + $0x450] sm:$0xff] }
 0xf12   : > { %2351 = vmatpush.msrb.mxu0 %v2325_v30  ;;  %v2467_v30 = vld [vmem:[#allocation7 + $0x460] sm:$0xff]  ;;  %v2461_v40 = vld [vmem:[#allocation7 + $0x430] sm:$0xff] }
 0xf13   : > { %2270 = vmatpush.msra.mxu2 %v2258_v55  ;;  %2375 = vmatpush.msra.mxu1 %v2337_v42  ;;  %v2316_v55 = vld [vmem:[#allocation19 + $0x120] sm:$0xff]  ;;  %v2457_v42 = vld [vmem:[#allocation7 + $0x410] sm:$0xff] }
 0xf14   : > { %2352 = vmatpush.msrb.mxu0 %v2324_v33 }
 0xf15   : > { %2271 = vmatpush.msra.mxu2 %v2256_v61 }
 0xf16   : > { %2353 = vmatpush.msrb.mxu0 %v2323_v37  ;;  %v2464_v37 = vld [vmem:[#allocation7 + $0x448] sm:$0xff] }
 0xf17   : > { %v2060_v41 = vpop.f32.mrf.mxu1  ;;  %2272 = vmatpush.msra.mxu2 %v2254_v63 }
 0xf18   : > { %3553 = vmatmul.msk.f32.vlgmr.msrb.gmra.mxu2 %vm1011_vm1, %v2060_v41  ;;  %v2321_v41 = vld [vmem:[#allocation19 + $0x148] sm:$0xff]  ;;  %2354 = vmatpush.msrb.mxu0 %v2322_v39 }
 0xf19   : > { %2273 = vmatpush.msra.mxu2 %v2252_v1  ;;  %v3791_v1 = vld [vmem:[#allocation15 + $0x1] ss:$0 sm:$0xff]  ;;  %v2460_v39 = vld [vmem:[#allocation7 + $0x428] sm:$0xff] }
 0xf1a   : > { %2355 = vmatpush.msrb.mxu0 %v2321_v41  ;;  %v2456_v41 = vld [vmem:[#allocation7 + $0x408] sm:$0xff] }
 0xf1b   : > { %2274 = vmatpush.msra.mxu2 %v2250_v3 }
 0xf1d   : > { %2275 = vmatpush.msra.mxu2 %v2248_v5  ;;  %v2330_v5 = vld [vmem:[#allocation19 + $0x190] sm:$0xff] }
 0xf1f   : > { %2276 = vmatpush.msra.mxu2 %v2246_v8  ;;  %v2329_v8 = vld [vmem:[#allocation19 + $0x188] sm:$0xff] }
 0xf21   : > { %2277 = vmatpush.msra.mxu2 %v2244_v10  ;;  %v2328_v10 = vld [vmem:[#allocation19 + $0x180] sm:$0xff] }
 0xf23   : > { %2278 = vmatpush.msra.mxu2 %v2242_v12 }
 0xf25   : > { %2279 = vmatpush.msra.mxu2 %v2240_v14 }
 0xf27   : > { %2280 = vmatpush.msra.mxu2 %v2238_v17 }
 0xf29   : > { %2281 = vmatpush.msra.mxu2 %v2236_v19 }
 0xf2b   : > { %2282 = vmatpush.msra.mxu2 %v2234_v21 }
 0xf2d   : > { %2283 = vmatpush.msra.mxu2 %v2232_v23 }
 0xf2f   : > { %2284 = vmatpush.msra.mxu2 %v2230_v25 }
 0xf8a   : > { %v2163_v43 = vpop.f32.mrf.mxu0 }
 0xf8b   : > { %3557 = vmatmul.msk.f32.vlgmr.msrb.gmra.mxu1 %vm1011_vm1, %v2163_v43  ;;  %v2320_v43 = vld [vmem:[#allocation19 + $0x140] sm:$0xff] }
 0xf8c   : > { %2356 = vmatpush.msrb.mxu0 %v2320_v43  ;;  %v2458_v43 = vld [vmem:[#allocation7 + $0x418] sm:$0xff] }
 0xf93   : > { %v1958_v44 = vpop.f32.mrf.mxu2 }
 0xf94   : > { %v1982_v46 = vadd.f32 %v4862_v35, %v1958_v44  ;;  %v2336_v44 = vld [vmem:[#allocation19 + $0x1c0] sm:$0xff] }
 0xf95   : > { %2376 = vmatpush.msra.mxu1 %v2336_v44  ;;  %v2453_v44 = vld [vmem:[#allocation7 + $0x3f0] sm:$0xff] }
 0xf9b   : > { %v2083_v45 = vpop.f32.mrf.mxu2 }
 0xf9c   : > { %v2086_v47 = vadd.f32 %v2083_v45, %v1982_v46  ;;  %v2319_v46 = vld [vmem:[#allocation19 + $0x138] sm:$0xff] }
 0xf9d   : > { %2357 = vmatpush.msrb.mxu0 %v2319_v46  ;;  %v2455_v46 = vld [vmem:[#allocation7 + $0x400] sm:$0xff] }
0x1008   : > { %v2186_v49 = vpop.f32.mrf.mxu1 }
0x1009   : > { %v2189_v50 = vadd.f32 %v2186_v49, %v2086_v47  ;;  %v2335_v47 = vld [vmem:[#allocation19 + $0x1b8] sm:$0xff]  ;;  %v2318_v49 = vld [vmem:[#allocation19 + $0x130] sm:$0xff] }
0x100a   : > { %2377 = vmatpush.msra.mxu1 %v2335_v47  ;;  %2358 = vmatpush.msrb.mxu0 %v2318_v49  ;;  %v2450_v47 = vld [vmem:[#allocation7 + $0x3d8] sm:$0xff]  ;;  %v2452_v49 = vld [vmem:[#allocation7 + $0x3e8] sm:$0xff] }
0x100b   : > { %v2195_v52 = vadd.f32 %v3789_v48, %v2189_v50  ;;  %v2334_v50 = vld [vmem:[#allocation19 + $0x1b0] sm:$0xff] }
0x100c   : > { %2378 = vmatpush.msra.mxu1 %v2334_v50  ;;  %v2447_v50 = vld [vmem:[#allocation7 + $0x3c0] sm:$0xff] }
0x100d   : > { %v2196_v51 = vadd.f32 %v2195_v52, %v4834_v7  ;;  %v2257_v7 = vld [vmem:[#allocation16 + $0x1d8] sm:$0xff] }
0x100e   : > { %2291 = vmatpush.msra.mxu3 %v2257_v7  ;;  %2379 = vmatpush.msra.mxu1 %v2333_v53  ;;  %v3790_v7 = vld [vmem:[#allocation13 + $0x1] ss:$0 sm:$0xff] }
0x100f   : > { %2201 = vadd.xlane.f32.xlu0 %v2196_v51  ;;  %v2444_v53 = vld [vmem:[#allocation7 + $0x3a8] sm:$0xff] }
0x1010   : > { %2292 = vmatpush.msra.mxu3 %v2255_v0  ;;  %2380 = vmatpush.msra.mxu1 %v2332_v56  ;;  %v2441_v56 = vld [vmem:[#allocation7 + $0x390] sm:$0xff] }
0x1012   : > { %2293 = vmatpush.msra.mxu3 %v2253_v2 }
0x1014   : > { %2294 = vmatpush.msra.mxu3 %v2251_v4  ;;  %v2314_v4 = vld [vmem:[#allocation19 + $0x110] sm:$0xff] }
0x1016   : > { %2295 = vmatpush.msra.mxu3 %v2249_v6  ;;  %v2313_v6 = vld [vmem:[#allocation19 + $0x108] sm:$0xff] }
0x1018   : > { %2296 = vmatpush.msra.mxu3 %v2247_v9  ;;  %v2312_v9 = vld [vmem:[#allocation19 + $0x100] sm:$0xff] }
0x101a   : > { %2297 = vmatpush.msra.mxu3 %v2245_v11  ;;  %v2263_v11 = vld [vmem:[#allocation18 + $0x2] sm:$0x3] }
0x101b   : > { %v2265_v12 = vperm.slane %v2263_v11, 0 }
0x101c   : > { %2298 = vmatpush.msra.mxu3 %v2243_v62 }
0x101e   : > { %2299 = vmatpush.msra.mxu3 %v2241_v16 }
0x1020   : > { %2300 = vmatpush.msra.mxu3 %v2239_v18 }
0x1022   : > { %2301 = vmatpush.msra.mxu3 %v2237_v20  ;;  %v3792_v20 = vld [vmem:[#allocation21 + $0x1] ss:$0 sm:$0xff] }
0x1024   : > { %2302 = vmatpush.msra.mxu3 %v2235_v22 }
0x1026   : > { %2303 = vmatpush.msra.mxu3 %v2233_v24 }
0x1028   : > { %2304 = vmatpush.msra.mxu3 %v2231_v59  ;;  %v2468_v59 = vld [vmem:[#allocation7 + $0x468] sm:$0xff] }
0x1029   : > { %2497 = vmatpush.msrb.mxu2 %v2468_v59 }
0x102a   : > { %2517 = vmatpush.msrb.mxu3 %v2469_v26  ;;  %v3794_v26 = vld [vmem:[#allocation24 + $0x1] ss:$0 sm:$0xff] }
0x102b   : > { %2498 = vmatpush.msrb.mxu2 %v2465_v28 }
0x102c   : > { %2518 = vmatpush.msrb.mxu3 %v2466_v29  ;;  %v2489_v29 = vld [vmem:[#allocation9 + $0x6] sm:$0x7] }
0x102d   : > { %2499 = vmatpush.msrb.mxu2 %v2462_v34 }
0x102f   : > { %2500 = vmatpush.msrb.mxu2 %v2459_v38 }
0x1031   : > { %2501 = vmatpush.msrb.mxu2 %v2456_v41  ;;  %v2473_v41 = vld [vmem:[#allocation10 + $0x108] sm:$0xff] }
0x1033   : > { %2502 = vmatpush.msrb.mxu2 %v2453_v44 }
0x1035   : > { %2503 = vmatpush.msrb.mxu2 %v2450_v47 }
0x1037   : > { %2504 = vmatpush.msrb.mxu2 %v2447_v50 }
0x1039   : > { %2505 = vmatpush.msrb.mxu2 %v2444_v53 }
0x103b   : > { %2506 = vmatpush.msrb.mxu2 %v2441_v56 }
0x1082   : > { %v2202_v57 = vpop.xlane.xlu0 %2201 }
0x1083   : > { %v2203_v58 = vmul.f32 %v2202_v57, %v4818_v13 }
0x1085   : > { %v4887_v35 = vsub.f32 %v2196_v51, %v2203_v58  ;;  %v2317_v51 = vld [vmem:[#allocation19 + $0x128] sm:$0xff]  ;;  %v2315_v58 = vld [vmem:[#allocation19 + $0x118] sm:$0xff] }
0x1086   : > { %2359 = vmatpush.msrb.mxu0 %v2317_v51  ;;  %v2449_v51 = vld [vmem:[#allocation7 + $0x3d0] sm:$0xff] }
0x1087   : > { %v2205_v60 = vmul.f32 %v4887_v35, %v4887_v35 }
0x1088   : > { %2360 = vmatpush.msrb.mxu0 %v2316_v55  ;;  %v2446_v55 = vld [vmem:[#allocation7 + $0x3b8] sm:$0xff] }
0x1089   : > { %2206 = vadd.xlane.f32.xlu1 %v2205_v60  ;;  %v2331_v60 = vld [vmem:[#allocation19 + $0x198] sm:$0xff] }
0x108a   : > { %2361 = vmatpush.msrb.mxu0 %v2315_v58  ;;  %2381 = vmatpush.msra.mxu1 %v2331_v60  ;;  %v2443_v58 = vld [vmem:[#allocation7 + $0x3a0] sm:$0xff]  ;;  %v2438_v60 = vld [vmem:[#allocation7 + $0x378] sm:$0xff] }
0x108b   : > { %2507 = vmatpush.msrb.mxu2 %v2438_v60 }
0x108c   : > { %2362 = vmatpush.msrb.mxu0 %v2314_v4  ;;  %2382 = vmatpush.msra.mxu1 %v2330_v5  ;;  %v2434_v4 = vld [vmem:[#allocation7 + $0x358] sm:$0xff]  ;;  %v2429_v5 = vld [vmem:[#allocation7 + $0x330] sm:$0xff] }
0x108e   : > { %2363 = vmatpush.msrb.mxu0 %v2313_v6  ;;  %2383 = vmatpush.msra.mxu1 %v2329_v8  ;;  %v2430_v6 = vld [vmem:[#allocation7 + $0x338] sm:$0xff]  ;;  %v2431_v8 = vld [vmem:[#allocation7 + $0x340] sm:$0xff] }
0x1090   : > { %2364 = vmatpush.msrb.mxu0 %v2312_v9  ;;  %2384 = vmatpush.msra.mxu1 %v2328_v10  ;;  %v2426_v9 = vld [vmem:[#allocation7 + $0x318] sm:$0xff]  ;;  %v2427_v10 = vld [vmem:[#allocation7 + $0x320] sm:$0xff] }
0x1092   : > { %2537 = vmatpush.msra.mxu0 %v2470_v27 }
0x1094   : > { %2538 = vmatpush.msra.mxu0 %v2467_v30  ;;  %v2492_v30 = vperm.slane %v2489_v29, 1 }
0x1096   : > { %2539 = vmatpush.msra.mxu0 %v2464_v37 }
0x1098   : > { %2540 = vmatpush.msra.mxu0 %v2461_v40  ;;  %v2474_v40 = vld [vmem:[#allocation10 + $0x110] sm:$0xff] }
0x109a   : > { %2541 = vmatpush.msra.mxu0 %v2458_v43 }
0x109c   : > { %2542 = vmatpush.msra.mxu0 %v2455_v46 }
0x109e   : > { %2543 = vmatpush.msra.mxu0 %v2452_v49 }
0x10a0   : > { %2544 = vmatpush.msra.mxu0 %v2449_v51 }
0x10a2   : > { %2545 = vmatpush.msra.mxu0 %v2446_v55 }
0x10a4   : > { %2546 = vmatpush.msra.mxu0 %v2443_v58 }
0x10fc   : > { %v2207_v15 = vpop.xlane.xlu1 %2206 }
0x10fd   : > { %v2208_v32 = vmul.f32 %v2207_v15, %v4818_v13 }
0x10ff   : > { %v2209_v36 = vadd.f32 1e-05, %v2208_v32 }
0x1101   : > { %3839 = vrsqrt.f32 %v2209_v36  ;;  %vm2216_vm15 = vweird.f32 %v2209_v36 }
0x1107   : > { %v3840_v45 = vpop.eup %3839 }
0x1108   : > { %v2211_v48 = vmul.f32 %v3840_v45, %v2209_v36  ;;  %vm2217_vm14 = vweird.f32 %v3840_v45  ;;  %v2463_v36 = vld [vmem:[#allocation7 + $0x440] sm:$0xff] }
0x1109   : > { %vm2218_vm0 = vmor %vm2216_vm15, %vm2217_vm14  ;;  %2519 = vmatpush.msrb.mxu3 %v2463_v36 }
0x110a   : > { %v2212_v52 = vmul.f32 %v3840_v45, %v2211_v48  ;;  %v2451_v48 = vld [vmem:[#allocation7 + $0x3e0] sm:$0xff] }
0x110b   : > { %2520 = vmatpush.msrb.mxu3 %v2460_v39  ;;  %v2475_v39 = vld [vmem:[#allocation10 + $0x118] sm:$0xff] }
0x110c   : > { %v2213_v54 = vmul.f32 0.5, %v2212_v52  ;;  %v2448_v52 = vld [vmem:[#allocation7 + $0x3c8] sm:$0xff] }
0x110d   : > { %2521 = vmatpush.msrb.mxu3 %v2457_v42  ;;  %v2472_v42 = vld [vmem:[#allocation10 + $0x100] sm:$0xff] }
0x110e   : > { %v2214_v57 = vsub.f32 1.5, %v2213_v54  ;;  %v2445_v54 = vld [vmem:[#allocation7 + $0x3b0] sm:$0xff] }
0x1110   : > { %v2215_v61 = vmul.f32 %v3840_v45, %v2214_v57  ;;  %v2442_v57 = vld [vmem:[#allocation7 + $0x398] sm:$0xff] }
0x1112   : > { %v2219_v63 = vsel %vm2218_vm0, %v3840_v45, %v2215_v61  ;;  %v2454_v45 = vld [vmem:[#allocation7 + $0x3f8] sm:$0xff]  ;;  %v2439_v61 = vld [vmem:[#allocation7 + $0x380] sm:$0xff] }
0x1113   : > { %v2220_v0 = vmul.f32 %v2219_v63, %v4887_v35  ;;  %v2266_v35 = vperm.slane %v2263_v11, 1  ;;  %2522 = vmatpush.msrb.mxu3 %v2454_v45  ;;  %v2435_v63 = vld [vmem:[#allocation7 + $0x360] sm:$0xff]  ;;  %v2428_v11 = vld [vmem:[#allocation7 + $0x328] sm:$0xff] }
0x1114   : > { %2508 = vmatpush.msrb.mxu2 %v2435_v63 }
0x1115   : > { %v2224_v2 = vmul.f32 %v3790_v7, %v2220_v0  ;;  %2523 = vmatpush.msrb.mxu3 %v2451_v48  ;;  %v2440_v7 = vld [vmem:[#allocation7 + $0x388] sm:$0xff] }
0x1116   : > { %2547 = vmatpush.msra.mxu0 %v2440_v7  ;;  %v2436_v0 = vld [vmem:[#allocation7 + $0x368] sm:$0xff] }
0x1117   : > { %v2228_v3 = vadd.f32 %v3791_v1, %v2224_v2  ;;  %2524 = vmatpush.msrb.mxu3 %v2448_v52  ;;  %v2437_v1 = vld [vmem:[#allocation7 + $0x370] sm:$0xff]  ;;  %v2432_v2 = vld [vmem:[#allocation7 + $0x348] sm:$0xff] }
0x1118   : > { %2548 = vmatpush.msra.mxu0 %v2437_v1  ;;  %2509 = vmatpush.msrb.mxu2 %v2432_v2 }
0x1119   : > { %2285 = vmatmul.f32.vlgmr.msra.gmra.mxu2 %v2228_v3  ;;  %2305 = vmatmul.f32.vlgmr.msra.gmra.mxu3 %v2228_v3 }
0x111a   : > { %2525 = vmatpush.msrb.mxu3 %v2445_v54  ;;  %2549 = vmatpush.msra.mxu0 %v2434_v4 }
0x111b   : > { %2510 = vmatpush.msrb.mxu2 %v2429_v5 }
0x111c   : > { %2526 = vmatpush.msrb.mxu3 %v2442_v57  ;;  %2550 = vmatpush.msra.mxu0 %v2431_v8 }
0x111d   : > { %2511 = vmatpush.msrb.mxu2 %v2426_v9 }
0x111e   : > { %2527 = vmatpush.msrb.mxu3 %v2439_v61  ;;  %2551 = vmatpush.msra.mxu0 %v2428_v11 }
0x1120   : > { %2528 = vmatpush.msrb.mxu3 %v2436_v0 }
0x119c   : > { %v2286_v62 = vpop.f32.mrf.mxu2  ;;  %v2306_v14 = vpop.f32.mrf.mxu3 }
0x119d   : > { %v2287_v16 = vadd.f32 %v2286_v62, %v2265_v12  ;;  %v2307_v17 = vadd.f32 %v2306_v14, %v2266_v35  ;;  %v2423_v12 = vld [vmem:[#allocation7 + $0x300] sm:$0xff]  ;;  %v2424_v35 = vld [vmem:[#allocation7 + $0x308] sm:$0xff]  ;;  %v2425_v62 = vld [vmem:[#allocation7 + $0x310] sm:$0xff] }
0x119e   : > { %2512 = vmatpush.msrb.mxu2 %v2423_v12  ;;  %2552 = vmatpush.msra.mxu0 %v2425_v62 }
0x119f   : > { %v2309_v18 = vmax.f32 %v2287_v16, 0.0  ;;  %v2310_v19 = vmax.f32 %v2307_v17, 0.0 }
0x11a1   : > { %2365 = vmatmul.f32.vlgmr.msrb.gmra.mxu0 %v2309_v18  ;;  %2385 = vmatmul.f32.vlgmr.msra.gmra.mxu1 %v2310_v19 }
0x121e   : > { %v2366_v21 = vpop.f32.mrf.mxu0  ;;  %v2386_v23 = vpop.f32.mrf.mxu1 }
0x121f   : > { %v2367_v22 = vadd.f32 %v3792_v20, %v2366_v21 }
0x1221   : > { %v2387_v24 = vadd.f32 %v2386_v23, %v2367_v22 }
0x1223   : > { %v2389_v25 = vadd.f32 %v2387_v24, %v2228_v3  ;;  %v2433_v3 = vld [vmem:[#allocation7 + $0x350] sm:$0xff]  ;;  %v3793_v24 = vld [vmem:[#allocation22 + $0x1] ss:$0 sm:$0xff] }
0x1224   : > { %2529 = vmatpush.msrb.mxu3 %v2433_v3 }
0x1225   : > { %2394 = vadd.xlane.f32.xlu2 %v2389_v25 }
0x1226   : > { %2530 = vmatpush.msrb.mxu3 %v2430_v6 }
0x1228   : > { %2531 = vmatpush.msrb.mxu3 %v2427_v10 }
0x122a   : > { %2532 = vmatpush.msrb.mxu3 %v2424_v35 }
0x122c   : > { %2749 = vmatpush.msra.mxu3 %v2475_v39 }
0x122e   : > { %2750 = vmatpush.msra.mxu3 %v2474_v40 }
0x1230   : > { %2751 = vmatpush.msra.mxu3 %v2473_v41 }
0x1232   : > { %2752 = vmatpush.msra.mxu3 %v2472_v42 }
0x1298   : > { %v2395_v31 = vpop.xlane.xlu2 %2394 }
0x1299   : > { %v2396_v15 = vmul.f32 %v2395_v31, %v4818_v13  ;;  %v2493_v31 = vperm.slane %v2489_v29, 2 }
0x129b   : > { %v4894_v32 = vsub.f32 %v2389_v25, %v2396_v15 }
0x129d   : > { %v2398_v33 = vmul.f32 %v4894_v32, %v4894_v32 }
0x129f   : > { %2399 = vadd.xlane.f32.xlu0 %v2398_v33  ;;  %v2491_v33 = vperm.slane %v2489_v29, 0 }
0x1312   : > { %v2400_v14 = vpop.xlane.xlu0 %2399 }
0x1313   : > { %v2401_v16 = vmul.f32 %v2400_v14, %v4818_v13 }
0x1315   : > { %v2402_v17 = vadd.f32 1e-05, %v2401_v16 }
0x1317   : > { %3841 = vrsqrt.f32 %v2402_v17  ;;  %vm2409_vm4 = vweird.f32 %v2402_v17 }
0x131d   : > { %v3842_v18 = vpop.eup %3841 }
0x131e   : > { %v2404_v19 = vmul.f32 %v3842_v18, %v2402_v17  ;;  %vm2410_vm3 = vweird.f32 %v3842_v18 }
0x131f   : > { %vm2411_vm5 = vmor %vm2409_vm4, %vm2410_vm3 }
0x1320   : > { %v2405_v20 = vmul.f32 %v3842_v18, %v2404_v19 }
0x1322   : > { %v2406_v21 = vmul.f32 0.5, %v2405_v20 }
0x1324   : > { %v2407_v22 = vsub.f32 1.5, %v2406_v21 }
0x1326   : > { %v2408_v23 = vmul.f32 %v3842_v18, %v2407_v22 }
0x1328   : > { %v2412_v25 = vsel %vm2411_vm5, %v3842_v18, %v2408_v23 }
0x1329   : > { %v2413_v59 = vmul.f32 %v2412_v25, %v4894_v32 }
0x132b   : > { %v2417_v27 = vmul.f32 %v3793_v24, %v2413_v59 }
0x132d   : > { %v4900_v28 = vadd.f32 %v3794_v26, %v2417_v27 }
0x132f   : > { %2513 = vmatmul.f32.vlgmr.msrb.gmra.mxu2 %v4900_v28  ;;  %2533 = vmatmul.f32.vlgmr.msrb.gmra.mxu3 %v4900_v28 }
0x1330   : > { %2553 = vmatmul.f32.vlgmr.msra.gmra.mxu0 %v4900_v28 }
0x13ad   : > { %v2554_v15 = vpop.f32.mrf.mxu0 }
0x13ae   : > { %v4905_v38 = vadd.f32 %v2554_v15, %v2493_v31 }
0x13b2   : > { %v2534_v34 = vpop.f32.mrf.mxu3  ;;  %v2514_v36 = vpop.f32.mrf.mxu2 }
0x13b3   : > { %v2535_v37 = vadd.f32 %v2534_v34, %v2492_v30  ;;  %v2515_v32 = vadd.f32 %v2514_v36, %v2491_v33 }
0x13b5   : > { %2633 = vrot.lane.b32.xlu0 %v2535_v37, %s4437_s2  ;;  %3558 = vmatpush.xpose.msk.msrb.mxu1 %vm1011_vm1, %v2535_v37 }
0x13b8   : > { %3559 = vmatmul.msk.f32.vlgmr.msrb.gmra.mxu1 %vm1011_vm1, %v2515_v32 }
0x13b9   : > { %2626 = vmatpush.msra.mxu1 %v4905_v38 }
0x13bd   : > { %2862 = vrot.lane.b32.xlu0 %v2535_v37, %s4439_s30 }
0x1427   : > { %v2634_v43 = vpop.permute.xlu0 %2633 }
0x1428   : > { %3561 = vmatpush.xpose.msk.msrb.mxu1 %vm1011_vm1, %v2634_v43 }
0x142f   : > { %v2863_v44 = vpop.permute.xlu0 %2862 }
0x1430   : > { %3570 = vmatpush.xpose.msk.msrb.mxu3 %vm1011_vm1, %v2863_v44 }
0x1435   : > { %v2580_v45 = vpop.f32.mrf.mxu1 }
0x1436   : > { %v2583_v46 = vmul.f32 0.17677669, %v2580_v45 }
0x1438   : > { %v2584_v47 = vsel %vm1039_vm2, %v2583_v46, -inf }
0x1439   : > { %2585 = vmax.xlane.f32.xlu1 %v2584_v47 }
0x1452   : > { %2631 = vrot.lane.b32.xlu1 %v2515_v32, %s4437_s2 }
0x145a   : > { %2757 = vrot.lane.b32.xlu1 %v2515_v32, %s4438_s6 }
0x14ac   : > { %v2586_v48 = vpop.xlane.xlu1 %2585 }
0x14ad   : > { %v2587_v49 = vsub.f32 %v2583_v46, %v2586_v48 }
0x14af   : > { %v2588_v50 = vmul.f32 1.442695, %v2587_v49 }
0x14b1   : > { %3843 = vpow2.f32 %v2588_v50 }
0x14b7   : > { %v3844_v52 = vpop.eup %3843 }
0x14b8   : > { %v2590_v51 = vsel %vm1039_vm2, %v3844_v52, 0.0 }
0x14b9   : > { %2591 = vadd.xlane.f32.xlu2 %v2590_v51 }
0x14c4   : > { %v2632_v54 = vpop.permute.xlu1 %2631 }
0x14cc   : > { %v2758_v60 = vpop.permute.xlu1 %2757 }
0x14d1   : > { %2759 = vrot.lane.b32.xlu2 %v2535_v37, %s4438_s6 }
0x14d9   : > { %2860 = vrot.lane.b32.xlu2 %v2515_v32, %s4439_s30 }
0x152c   : > { %v2592_v53 = vpop.xlane.xlu2 %2591 }
0x152d   : > { %3845 = vrcp.f32 %v2592_v53  ;;  %v2604_v61 = vand.u32 2147483648, %v2592_v53  ;;  %v2602_v63 = vand.u32 2147483647, %v2592_v53  ;;  %vm2598_vm7 = vweird.f32 %v2592_v53 }
0x152f   : > { %v2605_v1 = vor.u32 1.1754944e-38, %v2604_v61  ;;  %vm2603_vm9 = vcmp.eq.f32.partialorder %v2602_v63, 8.507059e+37  ;;  %v2479_v61 = vld [vmem:[#allocation10 + $0x138] sm:$0xff]  ;;  %v2477_v63 = vld [vmem:[#allocation10 + $0x128] sm:$0xff] }
0x1530   : > { %2726 = vmatpush.msra.mxu2 %v2479_v61  ;;  %v3011_v61 = vld [vmem:[#allocation16 + $0x240] sm:$0xff] }
0x1533   : > { %v3846_v55 = vpop.eup %3845 }
0x1534   : > { %v2594_v56 = vmul.f32 %v3846_v55, %v2592_v53  ;;  %v2760_v57 = vpop.permute.xlu2 %2759  ;;  %vm2599_vm6 = vweird.f32 %v3846_v55 }
0x1535   : > { %3566 = vmatpush.xpose.msk.msrb.mxu0 %vm1011_vm1, %v2760_v57  ;;  %vm2600_vm8 = vmor %vm2598_vm7, %vm2599_vm6 }
0x1536   : > { %v2595_v58 = vsub.f32 1.0, %v2594_v56 }
0x1538   : > { %v2596_v7 = vmul.f32 %v3846_v55, %v2595_v58  ;;  %3567 = vmatmul.msk.f32.vlgmr.msrb.gmra.mxu0 %vm1011_vm1, %v2758_v60 }
0x153a   : > { %v2597_v0 = vadd.f32 %v3846_v55, %v2596_v7  ;;  %v2478_v7 = vld [vmem:[#allocation10 + $0x130] sm:$0xff] }
0x153b   : > { %2727 = vmatpush.msra.mxu2 %v2478_v7  ;;  %v3012_v7 = vld [vmem:[#allocation16 + $0x248] sm:$0xff] }
0x153c   : > { %v2601_v2 = vsel %vm2600_vm8, %v3846_v55, %v2597_v0  ;;  %v2861_v10 = vpop.permute.xlu2 %2860  ;;  %v2476_v0 = vld [vmem:[#allocation10 + $0x120] sm:$0xff] }
0x153d   : > { %v2606_v3 = vsel %vm2603_vm9, %v2605_v1, %v2601_v2  ;;  %2728 = vmatpush.msra.mxu2 %v2477_v63  ;;  %v2483_v1 = vld [vmem:[#allocation10 + $0x158] sm:$0xff]  ;;  %v2482_v2 = vld [vmem:[#allocation10 + $0x150] sm:$0xff] }
0x153e   : > { %v2607_v4 = vmul.f32 %v3844_v52, %v2606_v3  ;;  %v2481_v3 = vld [vmem:[#allocation10 + $0x148] sm:$0xff]  ;;  %v3009_v63 = vld [vmem:[#allocation16 + $0x230] sm:$0xff] }
0x153f   : > { %2729 = vmatpush.msra.mxu2 %v2476_v0  ;;  %v3010_v0 = vld [vmem:[#allocation16 + $0x238] sm:$0xff] }
0x1540   : > { %3560 = vmatmul.msk.f32.vlgmr.msra.gmra.mxu1 %vm1039_vm2, %v2607_v4  ;;  %v2480_v4 = vld [vmem:[#allocation10 + $0x140] sm:$0xff] }
0x1541   : > { %2851 = vmatpush.msrb.mxu2 %v2483_v1  ;;  %v3007_v1 = vld [vmem:[#allocation16 + $0x220] sm:$0xff] }
0x1543   : > { %2852 = vmatpush.msrb.mxu2 %v2482_v2  ;;  %v3008_v2 = vld [vmem:[#allocation16 + $0x228] sm:$0xff] }
0x1545   : > { %2853 = vmatpush.msrb.mxu2 %v2481_v3  ;;  %v3005_v3 = vld [vmem:[#allocation16 + $0x210] sm:$0xff] }
0x1547   : > { %2854 = vmatpush.msrb.mxu2 %v2480_v4  ;;  %v3006_v4 = vld [vmem:[#allocation16 + $0x218] sm:$0xff] }
0x1548   : > { %3562 = vmatmul.msk.f32.vlgmr.msrb.gmra.mxu1 %vm1011_vm1, %v2632_v54 }
0x15b5   : > { %v2782_v5 = vpop.f32.mrf.mxu0 }
0x15b6   : > { %v2785_v6 = vmul.f32 0.17677669, %v2782_v5  ;;  %v2487_v5 = vld [vmem:[#allocation10 + $0x178] sm:$0xff] }
0x15b8   : > { %v2786_v8 = vsel %vm1039_vm2, %v2785_v6, -inf }
0x15b9   : > { %2787 = vmax.xlane.f32.xlu1 %v2786_v8 }
0x15bd   : > { %v2628_v9 = vpop.f32.mrf.mxu1 }
0x15be   : > { %3565 = vmatmul.msk.f32.vlgmr.msra.gmra.mxu3 %vm1011_vm1, %v2628_v9 }
0x15c5   : > { %v2656_v11 = vpop.f32.mrf.mxu1 }
0x15c6   : > { %v2659_v12 = vmul.f32 0.17677669, %v2656_v11  ;;  %3571 = vmatmul.msk.f32.vlgmr.msrb.gmra.mxu3 %vm1011_vm1, %v2861_v10 }
0x15c8   : > { %v2660_v35 = vsel %vm1039_vm2, %v2659_v12, -inf }
0x15c9   : > { %2661 = vmax.xlane.f32.xlu0 %v2660_v35 }
0x162c   : > { %v2788_v17 = vpop.xlane.xlu1 %2787 }
0x162d   : > { %v2789_v19 = vsub.f32 %v2785_v6, %v2788_v17 }
0x162f   : > { %v2790_v21 = vmul.f32 1.442695, %v2789_v19 }
0x163c   : > { %v2662_v62 = vpop.xlane.xlu0 %2661 }
0x163d   : > { %v2663_v14 = vsub.f32 %v2659_v12, %v2662_v62 }
0x163f   : > { %v2664_v16 = vmul.f32 1.442695, %v2663_v14 }
0x1641   : > { %3847 = vpow2.f32 %v2664_v16  ;;  %v4928_v18 = vpop.f32.mrf.mxu3 }
0x1642   : > { %3849 = vpow2.f32 %v2790_v21 }
0x1647   : > { %v3848_v20 = vpop.eup %3847 }
0x1648   : > { %v2666_v22 = vsel %vm1039_vm2, %v3848_v20, 0.0  ;;  %v3850_v59 = vpop.eup %3849 }
0x1649   : > { %v2885_v23 = vpop.f32.mrf.mxu3  ;;  %2667 = vadd.xlane.f32.xlu0 %v2666_v22  ;;  %v2792_v26 = vsel %vm1039_vm2, %v3850_v59, 0.0  ;;  %v2486_v22 = vld [vmem:[#allocation10 + $0x170] sm:$0xff] }
0x164a   : > { %v2888_v24 = vmul.f32 0.17677669, %v2885_v23  ;;  %v2485_v23 = vld [vmem:[#allocation10 + $0x168] sm:$0xff] }
0x164c   : > { %v2889_v25 = vsel %vm1039_vm2, %v2888_v24, -inf }
0x164d   : > { %2890 = vmax.xlane.f32.xlu2 %v2889_v25 }
0x1655   : > { %2793 = vadd.xlane.f32.xlu2 %v2792_v26 }
0x165d   : > { %2685 = vrot.lane.b32.xlu0 %v4905_v38, %s4437_s2 }
0x166d   : > { %2810 = vrot.lane.b32.xlu2 %v4905_v38, %s4438_s6 }
0x16bc   : > { %v2668_v27 = vpop.xlane.xlu0 %2667 }
0x16bd   : > { %3851 = vrcp.f32 %v2668_v27  ;;  %v2680_v36 = vand.u32 2147483648, %v2668_v27  ;;  %v2678_v32 = vand.u32 2147483647, %v2668_v27  ;;  %vm2674_vm11 = vweird.f32 %v2668_v27 }
0x16bf   : > { %v2681_v42 = vor.u32 1.1754944e-38, %v2680_v36  ;;  %vm2679_vm13 = vcmp.eq.f32.partialorder %v2678_v32, 8.507059e+37  ;;  %v3033_v36 = vld [vmem:[#allocation16 + $0x2f0] sm:$0xff]  ;;  %v3031_v32 = vld [vmem:[#allocation16 + $0x2e0] sm:$0xff] }
0x16c0   : > { %v2891_v29 = vpop.xlane.xlu2 %2890 }
0x16c1   : > { %v2892_v30 = vsub.f32 %v2888_v24, %v2891_v29  ;;  %v2484_v24 = vld [vmem:[#allocation10 + $0x160] sm:$0xff] }
0x16c3   : > { %v3852_v31 = vpop.eup %3851  ;;  %v2893_v15 = vmul.f32 1.442695, %v2892_v30  ;;  %v3795_v30 = vld [vmem:[#allocation12 + $0x2] ss:$0 sm:$0xff] }
0x16c4   : > { %v2670_v33 = vmul.f32 %v3852_v31, %v2668_v27  ;;  %vm2675_vm10 = vweird.f32 %v3852_v31 }
0x16c5   : > { %3853 = vpow2.f32 %v2893_v15  ;;  %vm2676_vm12 = vmor %vm2674_vm11, %vm2675_vm10 }
0x16c6   : > { %v2671_v34 = vsub.f32 1.0, %v2670_v33 }
0x16c8   : > { %v2672_v37 = vmul.f32 %v3852_v31, %v2671_v34  ;;  %v2794_v39 = vpop.xlane.xlu2 %2793 }
0x16c9   : > { %3855 = vrcp.f32 %v2794_v39  ;;  %v2806_v51 = vand.u32 2147483648, %v2794_v39  ;;  %v2804_v54 = vand.u32 2147483647, %v2794_v39  ;;  %vm2800_vm15 = vweird.f32 %v2794_v39 }
0x16ca   : > { %v2673_v40 = vadd.f32 %v3852_v31, %v2672_v37  ;;  %v3034_v37 = vld [vmem:[#allocation16 + $0x2f8] sm:$0xff] }
0x16cb   : > { %v4937_v41 = vpop.eup %3853  ;;  %v2807_v56 = vor.u32 1.1754944e-38, %v2806_v51  ;;  %vm2805_vm3 = vcmp.eq.f32.partialorder %v2804_v54, 8.507059e+37  ;;  %3062 = vmatpush.msra.mxu3 %v3034_v37  ;;  %v3019_v51 = vld [vmem:[#allocation16 + $0x280] sm:$0xff]  ;;  %v3017_v54 = vld [vmem:[#allocation16 + $0x270] sm:$0xff] }
0x16cc   : > { %v2677_v43 = vsel %vm2676_vm12, %v3852_v31, %v2673_v40  ;;  %v2895_v44 = vsel %vm1039_vm2, %v4937_v41, 0.0  ;;  %vm3274_vm12 = vcmask 130048  }
0x16cd   : > { %v2682_v45 = vsel %vm2679_vm13, %v2681_v42, %v2677_v43  ;;  %2896 = vadd.xlane.f32.xlu1 %v2895_v44  ;;  %v3029_v43 = vld [vmem:[#allocation16 + $0x2d0] sm:$0xff]  ;;  %v3027_v44 = vld [vmem:[#allocation16 + $0x2c0] sm:$0xff] }
0x16ce   : > { %v2683_v46 = vmul.f32 %v3848_v20, %v2682_v45  ;;  %v3028_v45 = vld [vmem:[#allocation16 + $0x2c8] sm:$0xff] }
0x16cf   : > { %v3856_v47 = vpop.eup %3855  ;;  %v2686_v48 = vpop.permute.xlu0 %2685 }
0x16d0   : > { %v2796_v49 = vmul.f32 %v3856_v47, %v2794_v39  ;;  %2706 = vmatpush.msra.mxu1 %v2686_v48  ;;  %v2811_v50 = vpop.permute.xlu2 %2810  ;;  %vm2801_vm14 = vweird.f32 %v3856_v47  ;;  %v3032_v39 = vld [vmem:[#allocation16 + $0x2e8] sm:$0xff]  ;;  %v3023_v48 = vld [vmem:[#allocation16 + $0x2a0] sm:$0xff] }
0x16d1   : > { %3563 = vmatmul.msk.f32.vlgmr.msra.gmra.mxu1 %vm1039_vm2, %v2683_v46  ;;  %vm2802_vm0 = vmor %vm2800_vm15, %vm2801_vm14  ;;  %3063 = vmatpush.msra.mxu3 %v3032_v39  ;;  %v3025_v46 = vld [vmem:[#allocation16 + $0x2b0] sm:$0xff]  ;;  %v3105_v39 = vld [vmem:[#allocation19 + $0x2a0] sm:$0xff] }
0x16d2   : > { %v2797_v52 = vsub.f32 1.0, %v2796_v49  ;;  %2831 = vmatpush.msrb.mxu1 %v2811_v50  ;;  %v3024_v49 = vld [vmem:[#allocation16 + $0x2a8] sm:$0xff]  ;;  %v3021_v50 = vld [vmem:[#allocation16 + $0x290] sm:$0xff] }
0x16d4   : > { %v2798_v53 = vmul.f32 %v3856_v47, %v2797_v52  ;;  %2954 = vmatpush.msra.mxu1 %v2487_v5  ;;  %v3022_v52 = vld [vmem:[#allocation16 + $0x298] sm:$0xff]  ;;  %v3003_v5 = vld [vmem:[#allocation16 + $0x200] sm:$0xff] }
0x16d6   : > { %v2799_v55 = vadd.f32 %v3856_v47, %v2798_v53  ;;  %2955 = vmatpush.msra.mxu1 %v2486_v22  ;;  %v3020_v53 = vld [vmem:[#allocation16 + $0x288] sm:$0xff]  ;;  %v3111_v22 = vld [vmem:[#allocation19 + $0x2d0] sm:$0xff] }
0x16d8   : > { %v2803_v57 = vsel %vm2802_vm0, %v3856_v47, %v2799_v55  ;;  %2956 = vmatpush.msra.mxu1 %v2485_v23  ;;  %v3026_v47 = vld [vmem:[#allocation16 + $0x2b8] sm:$0xff]  ;;  %v3094_v23 = vld [vmem:[#allocation19 + $0x248] sm:$0xff] }
0x16d9   : > { %v2808_v58 = vsel %vm2805_vm3, %v2807_v56, %v2803_v57  ;;  %v3018_v55 = vld [vmem:[#allocation16 + $0x278] sm:$0xff]  ;;  %v3015_v56 = vld [vmem:[#allocation16 + $0x260] sm:$0xff]  ;;  %v3016_v57 = vld [vmem:[#allocation16 + $0x268] sm:$0xff] }
0x16da   : > { %v2809_v60 = vmul.f32 %v3850_v59, %v2808_v58  ;;  %2957 = vmatpush.msra.mxu1 %v2484_v24  ;;  %v3013_v58 = vld [vmem:[#allocation16 + $0x250] sm:$0xff] }
0x16db   : > { %v3110_v24 = vld [vmem:[#allocation19 + $0x2c8] sm:$0xff] }
0x16dc   : > { %3568 = vmatmul.msk.f32.vlgmr.msrb.gmra.mxu1 %vm1039_vm2, %v2809_v60  ;;  %v3014_v60 = vld [vmem:[#allocation16 + $0x258] sm:$0xff] }
0x16e6   : > { %2913 = vrot.lane.b32.xlu1 %v4905_v38, %s4439_s30 }
0x1740   : > { %v2897_v6 = vpop.xlane.xlu1 %2896 }
0x1741   : > { %3857 = vrcp.f32 %v2897_v6  ;;  %v2909_v35 = vand.u32 2147483648, %v2897_v6  ;;  %vm2903_vm5 = vweird.f32 %v2897_v6  ;;  %v2907_v62 = vand.u32 2147483647, %v2897_v6 }
0x1743   : > { %v2910_v16 = vor.u32 1.1754944e-38, %v2909_v35  ;;  %vm2908_vm7 = vcmp.eq.f32.partialorder %v2907_v62, 8.507059e+37 }
0x1747   : > { %v3858_v38 = vpop.eup %3857 }
0x1748   : > { %v2899_v8 = vmul.f32 %v3858_v38, %v2897_v6  ;;  %vm2904_vm4 = vweird.f32 %v3858_v38  ;;  %v3004_v6 = vld [vmem:[#allocation16 + $0x208] sm:$0xff] }
0x1749   : > { %vm2905_vm6 = vmor %vm2903_vm5, %vm2904_vm4 }
0x174a   : > { %v2900_v9 = vsub.f32 1.0, %v2899_v8  ;;  %v3116_v8 = vld [vmem:[#allocation19 + $0x2f8] sm:$0xff] }
0x174b   : > { %3142 = vmatpush.msrb.mxu1 %v3116_v8  ;;  %v3223_v8 = vld [vmem:[%s5137_s18 + $0xe0] sm:$0xff] }
0x174c   : > { %v2901_v10 = vmul.f32 %v3858_v38, %v2900_v9  ;;  %v3099_v9 = vld [vmem:[#allocation19 + $0x270] sm:$0xff] }
0x174e   : > { %v2902_v11 = vadd.f32 %v3858_v38, %v2901_v10  ;;  %v2708_v12 = vpop.f32.mrf.mxu1  ;;  %v3115_v10 = vld [vmem:[#allocation19 + $0x2f0] sm:$0xff] }
0x174f   : > { %3564 = vmatmul.msk.f32.vlgmr.msra.gmra.mxu2 %vm1011_vm1, %v2708_v12  ;;  %v3114_v12 = vld [vmem:[#allocation19 + $0x2e8] sm:$0xff]  ;;  %3143 = vmatpush.msrb.mxu1 %v3115_v10 }
0x1750   : > { %v2906_v14 = vsel %vm2905_vm6, %v3858_v38, %v2902_v11  ;;  %3042 = vmatpush.msra.mxu2 %v3033_v36  ;;  %v3100_v38 = vld [vmem:[#allocation19 + $0x278] sm:$0xff]  ;;  %v3098_v11 = vld [vmem:[#allocation19 + $0x268] sm:$0xff] }
0x1751   : > { %v2911_v17 = vsel %vm2908_vm7, %v2910_v16, %v2906_v14  ;;  %v3097_v14 = vld [vmem:[#allocation19 + $0x260] sm:$0xff]  ;;  %3144 = vmatpush.msrb.mxu1 %v3114_v12  ;;  %v3106_v36 = vld [vmem:[#allocation19 + $0x2a8] sm:$0xff] }
0x1752   : > { %v2912_v20 = vmul.f32 %v4937_v41, %v2911_v17  ;;  %3043 = vmatpush.msra.mxu2 %v3031_v32  ;;  %v3113_v16 = vld [vmem:[#allocation19 + $0x2e0] sm:$0xff] }
0x1753   : > { %3145 = vmatpush.msrb.mxu1 %v3113_v16  ;;  %v3089_v32 = vld [vmem:[#allocation19 + $0x220] sm:$0xff]  ;;  %v3219_v16 = vld [vmem:[%s5137_s18 + $0xc0] sm:$0xff] }
0x1754   : > { %3044 = vmatpush.msra.mxu2 %v3029_v43 }
0x1756   : > { %3045 = vmatpush.msra.mxu2 %v3027_v44 }
0x1758   : > { %v2914_v19 = vpop.permute.xlu1 %2913  ;;  %3046 = vmatpush.msra.mxu2 %v3025_v46  ;;  %v3797_v46 = vld [vmem:[#allocation15 + $0x2] ss:$0 sm:$0xff] }
0x1759   : > { %v2833_v21 = vpop.f32.mrf.mxu1  ;;  %2934 = vmatpush.msra.mxu0 %v2914_v19  ;;  %v3096_v19 = vld [vmem:[#allocation19 + $0x258] sm:$0xff] }
0x175a   : > { %3569 = vmatmul.msk.f32.vlgmr.msrb.gmra.mxu2 %vm1011_vm1, %v2833_v21  ;;  %3572 = vmatmul.msk.f32.vlgmr.msra.gmra.mxu0 %vm1039_vm2, %v2912_v20  ;;  %v3112_v20 = vld [vmem:[#allocation19 + $0x2d8] sm:$0xff]  ;;  %v3095_v21 = vld [vmem:[#allocation19 + $0x250] sm:$0xff] }
0x175b   : > { %3047 = vmatpush.msra.mxu2 %v3023_v48  ;;  %3122 = vmatpush.msrb.mxu0 %v3100_v38  ;;  %v3226_v38 = vld [vmem:[%s5137_s18 + $0xf8] sm:$0xff] }
0x175c   : > { %3146 = vmatpush.msrb.mxu1 %v3112_v20  ;;  %v3218_v20 = vld [vmem:[%s5137_s18 + $0xb8] sm:$0xff] }
0x175d   : > { %3048 = vmatpush.msra.mxu2 %v3021_v50  ;;  %3123 = vmatpush.msrb.mxu0 %v3099_v9  ;;  %v3103_v50 = vld [vmem:[#allocation19 + $0x290] sm:$0xff]  ;;  %v3224_v9 = vld [vmem:[%s5137_s18 + $0xe8] sm:$0xff] }
0x175e   : > { %3147 = vmatpush.msrb.mxu1 %v3111_v22  ;;  %v3216_v22 = vld [vmem:[%s5137_s18 + $0xa8] sm:$0xff] }
0x175f   : > { %3049 = vmatpush.msra.mxu2 %v3019_v51  ;;  %3124 = vmatpush.msrb.mxu0 %v3098_v11  ;;  %v3102_v51 = vld [vmem:[#allocation19 + $0x288] sm:$0xff] }
0x1760   : > { %3148 = vmatpush.msrb.mxu1 %v3110_v24  ;;  %v3214_v24 = vld [vmem:[%s5137_s18 + $0x98] sm:$0xff] }
0x1761   : > { %3050 = vmatpush.msra.mxu2 %v3017_v54  ;;  %3125 = vmatpush.msrb.mxu0 %v3097_v14  ;;  %v3101_v54 = vld [vmem:[#allocation19 + $0x280] sm:$0xff]  ;;  %v3222_v14 = vld [vmem:[%s5137_s18 + $0xd8] sm:$0xff] }
0x1763   : > { %3051 = vmatpush.msra.mxu2 %v3015_v56  ;;  %3126 = vmatpush.msrb.mxu0 %v3096_v19  ;;  %v3217_v19 = vld [vmem:[%s5137_s18 + $0xb0] sm:$0xff] }
0x1765   : > { %3052 = vmatpush.msra.mxu2 %v3013_v58  ;;  %3127 = vmatpush.msrb.mxu0 %v3095_v21  ;;  %v3215_v21 = vld [vmem:[%s5137_s18 + $0xa0] sm:$0xff] }
0x1767   : > { %3053 = vmatpush.msra.mxu2 %v3011_v61  ;;  %3128 = vmatpush.msrb.mxu0 %v3094_v23  ;;  %v3213_v23 = vld [vmem:[%s5137_s18 + $0x90] sm:$0xff] }
0x1769   : > { %3054 = vmatpush.msra.mxu2 %v3009_v63 }
0x176b   : > { %3055 = vmatpush.msra.mxu2 %v3007_v1 }
0x176d   : > { %3056 = vmatpush.msra.mxu2 %v3005_v3 }
0x176f   : > { %3057 = vmatpush.msra.mxu2 %v3003_v5 }
0x17d2   : > { %v2731_v59 = vpop.f32.mrf.mxu2 }
0x17d3   : > { %v2755_v27 = vadd.f32 %v4928_v18, %v2731_v59  ;;  %v3109_v59 = vld [vmem:[#allocation19 + $0x2c0] sm:$0xff] }
0x17d4   : > { %3149 = vmatpush.msrb.mxu1 %v3109_v59  ;;  %v3212_v59 = vld [vmem:[%s5137_s18 + $0x88] sm:$0xff] }
0x17d7   : > { %v2936_v25 = vpop.f32.mrf.mxu0 }
0x17d8   : > { %3573 = vmatmul.msk.f32.vlgmr.msra.gmra.mxu1 %vm1011_vm1, %v2936_v25  ;;  %v3093_v25 = vld [vmem:[#allocation19 + $0x240] sm:$0xff] }
0x17d9   : > { %3129 = vmatpush.msrb.mxu0 %v3093_v25  ;;  %v3211_v25 = vld [vmem:[%s5137_s18 + $0x80] sm:$0xff] }
0x17dd   : > { %v2856_v26 = vpop.f32.mrf.mxu2 }
0x17de   : > { %v2859_v29 = vadd.f32 %v2856_v26, %v2755_v27  ;;  %v3092_v27 = vld [vmem:[#allocation19 + $0x238] sm:$0xff] }
0x17df   : > { %3130 = vmatpush.msrb.mxu0 %v3092_v27  ;;  %v3210_v27 = vld [vmem:[%s5137_s18 + $0x78] sm:$0xff] }
0x1855   : > { %v2959_v31 = vpop.f32.mrf.mxu1 }
0x1856   : > { %v2962_v15 = vadd.f32 %v2959_v31, %v2859_v29  ;;  %v3108_v29 = vld [vmem:[#allocation19 + $0x2b8] sm:$0xff]  ;;  %v3091_v31 = vld [vmem:[#allocation19 + $0x230] sm:$0xff] }
0x1857   : > { %3150 = vmatpush.msrb.mxu1 %v3108_v29  ;;  %3131 = vmatpush.msrb.mxu0 %v3091_v31  ;;  %v3207_v29 = vld [vmem:[%s5137_s18 + $0x60] sm:$0xff]  ;;  %v3205_v31 = vld [vmem:[%s5137_s18 + $0x50] sm:$0xff] }
0x1858   : > { %v2968_v33 = vadd.f32 %v3795_v30, %v2962_v15  ;;  %v3107_v15 = vld [vmem:[#allocation19 + $0x2b0] sm:$0xff] }
0x1859   : > { %3151 = vmatpush.msrb.mxu1 %v3107_v15  ;;  %v3206_v15 = vld [vmem:[%s5137_s18 + $0x58] sm:$0xff] }
0x185a   : > { %v2969_v34 = vadd.f32 %v2968_v33, %v4900_v28  ;;  %v3030_v28 = vld [vmem:[#allocation16 + $0x2d8] sm:$0xff] }
0x185b   : > { %3064 = vmatpush.msra.mxu3 %v3030_v28  ;;  %3152 = vmatpush.msrb.mxu1 %v3106_v36  ;;  %v3796_v28 = vld [vmem:[#allocation13 + $0x2] ss:$0 sm:$0xff]  ;;  %v3201_v36 = vld [vmem:[%s5137_s18 + $0x30] sm:$0xff] }
0x185c   : > { %2974 = vadd.xlane.f32.xlu0 %v2969_v34 }
0x185d   : > { %3065 = vmatpush.msra.mxu3 %v3028_v45  ;;  %3153 = vmatpush.msrb.mxu1 %v3105_v39  ;;  %v3200_v39 = vld [vmem:[%s5137_s18 + $0x28] sm:$0xff] }
0x185f   : > { %3066 = vmatpush.msra.mxu3 %v3026_v47 }
0x1861   : > { %3067 = vmatpush.msra.mxu3 %v3024_v49  ;;  %v3087_v49 = vld [vmem:[#allocation19 + $0x210] sm:$0xff] }
0x1863   : > { %3068 = vmatpush.msra.mxu3 %v3022_v52  ;;  %v3086_v52 = vld [vmem:[#allocation19 + $0x208] sm:$0xff] }
0x1865   : > { %3069 = vmatpush.msra.mxu3 %v3020_v53  ;;  %v3085_v53 = vld [vmem:[#allocation19 + $0x200] sm:$0xff] }
0x1867   : > { %3070 = vmatpush.msra.mxu3 %v3018_v55  ;;  %v3036_v55 = vld [vmem:[#allocation18 + $0x4] sm:$0x3] }
0x1868   : > { %v3038_v56 = vperm.slane %v3036_v55, 0 }
0x1869   : > { %3071 = vmatpush.msra.mxu3 %v3016_v57 }
0x186b   : > { %3072 = vmatpush.msra.mxu3 %v3014_v60 }
0x186d   : > { %3073 = vmatpush.msra.mxu3 %v3012_v7 }
0x186f   : > { %3074 = vmatpush.msra.mxu3 %v3010_v0  ;;  %v3798_v0 = vld [vmem:[#allocation21 + $0x2] ss:$0 sm:$0xff] }
0x1871   : > { %3075 = vmatpush.msra.mxu3 %v3008_v2 }
0x1873   : > { %3076 = vmatpush.msra.mxu3 %v3006_v4 }
0x1875   : > { %3077 = vmatpush.msra.mxu3 %v3004_v6  ;;  %v3225_v6 = vld [vmem:[%s5136_s27 + $0xf0] sm:$0xff] }
0x1876   : > { %3233 = vmatpush.msrb.mxu2 %v3225_v6 }
0x1877   : > { %3253 = vmatpush.msrb.mxu3 %v3226_v38 }
0x1878   : > { %3234 = vmatpush.msrb.mxu2 %v3223_v8 }
0x1879   : > { %3254 = vmatpush.msrb.mxu3 %v3224_v9 }
0x187b   : > { %3255 = vmatpush.msrb.mxu3 %v3222_v14 }
0x18cf   : > { %v2975_v40 = vpop.xlane.xlu0 %2974 }
0x18d0   : > { %v2976_v41 = vmul.f32 %v2975_v40, %v4818_v13 }
0x18d2   : > { %v4953_v18 = vsub.f32 %v2969_v34, %v2976_v41  ;;  %v3090_v34 = vld [vmem:[#allocation19 + $0x228] sm:$0xff]  ;;  %v3088_v41 = vld [vmem:[#allocation19 + $0x218] sm:$0xff] }
0x18d3   : > { %3132 = vmatpush.msrb.mxu0 %v3090_v34  ;;  %v3204_v34 = vld [vmem:[%s5137_s18 + $0x48] sm:$0xff] }
0x18d4   : > { %v2978_v42 = vmul.f32 %v4953_v18, %v4953_v18 }
0x18d5   : > { %3133 = vmatpush.msrb.mxu0 %v3089_v32  ;;  %v3199_v32 = vld [vmem:[%s5137_s18 + $0x20] sm:$0xff] }
0x18d6   : > { %2979 = vadd.xlane.f32.xlu2 %v2978_v42  ;;  %v3104_v42 = vld [vmem:[#allocation19 + $0x298] sm:$0xff] }
0x18d7   : > { %3134 = vmatpush.msrb.mxu0 %v3088_v41  ;;  %3154 = vmatpush.msrb.mxu1 %v3104_v42  ;;  %v3198_v41 = vld [vmem:[%s5137_s18 + $0x18] sm:$0xff]  ;;  %v3195_v42 = vld [vmem:[%s5137_s18] sm:$0xff] }
0x18d9   : > { %3135 = vmatpush.msrb.mxu0 %v3087_v49  ;;  %3155 = vmatpush.msrb.mxu1 %v3103_v50 }
0x18db   : > { %3136 = vmatpush.msrb.mxu0 %v3086_v52  ;;  %3156 = vmatpush.msrb.mxu1 %v3102_v51  ;;  %v3799_v51 = vld [vmem:[#allocation22 + $0x2] ss:$0 sm:$0xff] }
0x18dd   : > { %3137 = vmatpush.msrb.mxu0 %v3085_v53  ;;  %3157 = vmatpush.msrb.mxu1 %v3101_v54 }
0x1949   : > { %v2980_v35 = vpop.xlane.xlu2 %2979 }
0x194a   : > { %v2981_v62 = vmul.f32 %v2980_v35, %v4818_v13 }
0x194c   : > { %v2982_v17 = vadd.f32 1e-05, %v2981_v62  ;;  %v3221_v62 = vld [vmem:[%s5137_s18 + $0xd0] sm:$0xff] }
0x194d   : > { %3235 = vmatpush.msrb.mxu2 %v3221_v62 }
0x194e   : > { %3859 = vrsqrt.f32 %v2982_v17  ;;  %vm2989_vm2 = vweird.f32 %v2982_v17 }
0x194f   : > { %3236 = vmatpush.msrb.mxu2 %v3219_v16 }
0x1951   : > { %3237 = vmatpush.msrb.mxu2 %v3217_v19 }
0x1953   : > { %3238 = vmatpush.msrb.mxu2 %v3215_v21 }
0x1954   : > { %v3860_v26 = vpop.eup %3859 }
0x1955   : > { %v2984_v30 = vmul.f32 %v3860_v26, %v2982_v17  ;;  %vm2990_vm1 = vweird.f32 %v3860_v26  ;;  %v3220_v17 = vld [vmem:[%s5137_s18 + $0xc8] sm:$0xff]  ;;  %3239 = vmatpush.msrb.mxu2 %v3213_v23 }
0x1956   : > { %vm2991_vm8 = vmor %vm2989_vm2, %vm2990_vm1  ;;  %3256 = vmatpush.msrb.mxu3 %v3220_v17 }
0x1957   : > { %v2985_v33 = vmul.f32 %v3860_v26, %v2984_v30  ;;  %3240 = vmatpush.msrb.mxu2 %v3211_v25  ;;  %v3208_v30 = vld [vmem:[%s5137_s18 + $0x68] sm:$0xff] }
0x1958   : > { %3257 = vmatpush.msrb.mxu3 %v3218_v20 }
0x1959   : > { %v2986_v37 = vmul.f32 0.5, %v2985_v33  ;;  %v3203_v33 = vld [vmem:[%s5137_s18 + $0x40] sm:$0xff] }
0x195a   : > { %3258 = vmatpush.msrb.mxu3 %v3216_v22 }
0x195b   : > { %v2987_v40 = vsub.f32 1.5, %v2986_v37  ;;  %v3202_v37 = vld [vmem:[%s5137_s18 + $0x38] sm:$0xff] }
0x195c   : > { %3259 = vmatpush.msrb.mxu3 %v3214_v24 }
0x195d   : > { %v2988_v43 = vmul.f32 %v3860_v26, %v2987_v40  ;;  %v3197_v40 = vld [vmem:[%s5137_s18 + $0x10] sm:$0xff] }
0x195e   : > { %3260 = vmatpush.msrb.mxu3 %v3212_v59 }
0x195f   : > { %v2992_v44 = vsel %vm2991_vm8, %v3860_v26, %v2988_v43  ;;  %v3209_v26 = vld [vmem:[%s5137_s18 + $0x70] sm:$0xff]  ;;  %v3196_v43 = vld [vmem:[%s5137_s18 + $0x8] sm:$0xff] }
0x1960   : > { %v2993_v45 = vmul.f32 %v2992_v44, %v4953_v18  ;;  %v3039_v18 = vperm.slane %v3036_v55, 1  ;;  %3241 = vmatpush.msrb.mxu2 %v3209_v26  ;;  %3261 = vmatpush.msrb.mxu3 %v3210_v27  ;;  %v3800_v55 = vld [vmem:[#allocation24 + $0x2] ss:$0 sm:$0xff] }
0x1962   : > { %v2997_v47 = vmul.f32 %v3796_v28, %v2993_v45  ;;  %3242 = vmatpush.msrb.mxu2 %v3207_v29  ;;  %3262 = vmatpush.msrb.mxu3 %v3208_v30 }
0x1964   : > { %v3001_v48 = vadd.f32 %v3797_v46, %v2997_v47  ;;  %3243 = vmatpush.msrb.mxu2 %v3205_v31  ;;  %3263 = vmatpush.msrb.mxu3 %v3206_v15 }
0x1966   : > { %3058 = vmatmul.f32.vlgmr.msra.gmra.mxu2 %v3001_v48  ;;  %3078 = vmatmul.f32.vlgmr.msra.gmra.mxu3 %v3001_v48 }
0x1967   : > { %3244 = vmatpush.msrb.mxu2 %v3203_v33  ;;  %3264 = vmatpush.msrb.mxu3 %v3204_v34 }
0x1969   : > { %3245 = vmatpush.msrb.mxu2 %v3201_v36  ;;  %3265 = vmatpush.msrb.mxu3 %v3202_v37 }
0x196b   : > { %3246 = vmatpush.msrb.mxu2 %v3199_v32  ;;  %3266 = vmatpush.msrb.mxu3 %v3200_v39 }
0x196d   : > { %3247 = vmatpush.msrb.mxu2 %v3197_v40  ;;  %3267 = vmatpush.msrb.mxu3 %v3198_v41 }
0x196f   : > { %3248 = vmatpush.msrb.mxu2 %v3195_v42  ;;  %3268 = vmatpush.msrb.mxu3 %v3196_v43 }
0x19e9   : > { %v3059_v57 = vpop.f32.mrf.mxu2  ;;  %v3079_v58 = vpop.f32.mrf.mxu3 }
0x19ea   : > { %v3060_v60 = vadd.f32 %v3059_v57, %v3038_v56  ;;  %v3080_v61 = vadd.f32 %v3079_v58, %v3039_v18  ;;  %v3227_v18 = vld [vmem:[#allocation25] sm:$0x3] }
0x19eb   : > { %v3229_v57 = vperm.slane %v3227_v18, 0  ;;  %v3230_v58 = vperm.slane %v3227_v18, 1 }
0x19ec   : > { %v3082_v7 = vmax.f32 %v3060_v60, 0.0  ;;  %v3083_v63 = vmax.f32 %v3080_v61, 0.0 }
0x19ee   : > { %3138 = vmatmul.f32.vlgmr.msrb.gmra.mxu0 %v3082_v7  ;;  %3158 = vmatmul.f32.vlgmr.msrb.gmra.mxu1 %v3083_v63 }
0x1a6b   : > { %v3139_v1 = vpop.f32.mrf.mxu0  ;;  %v3159_v3 = vpop.f32.mrf.mxu1 }
0x1a6c   : > { %v3140_v2 = vadd.f32 %v3798_v0, %v3139_v1 }
0x1a6e   : > { %v3160_v4 = vadd.f32 %v3159_v3, %v3140_v2 }
0x1a70   : > { %v3162_v5 = vadd.f32 %v3160_v4, %v3001_v48 }
0x1a72   : > { %3167 = vadd.xlane.f32.xlu1 %v3162_v5 }
0x1ae5   : > { %v3168_v10 = vpop.xlane.xlu1 %3167 }
0x1ae6   : > { %v3169_v11 = vmul.f32 %v3168_v10, %v4818_v13 }
0x1ae8   : > { %v4972_v12 = vsub.f32 %v3162_v5, %v3169_v11 }
0x1aea   : > { %v3171_v35 = vmul.f32 %v4972_v12, %v4972_v12 }
0x1aec   : > { %3172 = vadd.xlane.f32.xlu0 %v3171_v35 }
0x1b5f   : > { %v3173_v28 = vpop.xlane.xlu0 %3172 }
0x1b60   : > { %v3174_v44 = vmul.f32 %v3173_v28, %v4818_v13 }
0x1b62   : > { %v3175_v45 = vadd.f32 1e-05, %v3174_v44 }
0x1b64   : > { %3861 = vrsqrt.f32 %v3175_v45  ;;  %vm3182_vm10 = vweird.f32 %v3175_v45 }
0x1b6a   : > { %v3862_v46 = vpop.eup %3861 }
0x1b6b   : > { %v3177_v47 = vmul.f32 %v3862_v46, %v3175_v45  ;;  %vm3183_vm9 = vweird.f32 %v3862_v46 }
0x1b6c   : > { %vm3184_vm11 = vmor %vm3182_vm10, %vm3183_vm9 }
0x1b6d   : > { %v3178_v48 = vmul.f32 %v3862_v46, %v3177_v47 }
0x1b6f   : > { %v3179_v49 = vmul.f32 0.5, %v3178_v48 }
0x1b71   : > { %v3180_v50 = vsub.f32 1.5, %v3179_v49 }
0x1b73   : > { %v3181_v52 = vmul.f32 %v3862_v46, %v3180_v50 }
0x1b75   : > { %v3185_v53 = vsel %vm3184_vm11, %v3862_v46, %v3181_v52 }
0x1b76   : > { %v3186_v54 = vmul.f32 %v3185_v53, %v4972_v12 }
0x1b78   : > { %v3190_v56 = vmul.f32 %v3799_v51, %v3186_v54 }
0x1b7a   : > { %v3194_v13 = vadd.f32 %v3800_v55, %v3190_v56 }
0x1b7c   : > { %3249 = vmatmul.f32.vlgmr.msrb.gmra.mxu2 %v3194_v13  ;;  %3269 = vmatmul.f32.vlgmr.msrb.gmra.mxu3 %v3194_v13 }
0x1bff   : > { %v3250_v60 = vpop.f32.mrf.mxu2  ;;  %v3270_v61 = vpop.f32.mrf.mxu3 }
0x1c00   : > { %v3251_v7 = vadd.f32 %v3250_v60, %v3229_v57  ;;  %v3271_v63 = vadd.f32 %v3270_v61, %v3230_v58 }
0x1c02   : > { %3273 = vst [vmem:[%s838_s23] sm:$0xff] %v3251_v7 }
0x1c03   : > { %3275 = vst.msk [vmem:[%s838_s23 + $0x8] sm:$0xff] %vm3274_vm12, %v3271_v63 }
0x1c04 PF: > { %p36_p3 = scmp.ge.s32.totalorder %s4678_s16, 4   ;;  %s5139_s27 = smov %s4401_s28 }
0x1c05   : > { %s5140_s28 = smov %s4405_s29  ;;  %s5141_s29 = smov %s4689_s25 }
0x1c06   : > { %s5142_s30 = smov %s4678_s16  ;;  %38 = sbr.rel (!%p36_p3) target bundleno = 20 (0x14), region = 216 }
0x1c0b   :  { %3297 = vsyncpa [#allocation3], 1 }
0x1c0c   :  { %3299 = vsyncpa [#allocation3 + $0x1], 1 }
0x1c0d   :  { %3300 = vsyncpa [#allocation5], 1 }
0x1c0e   :  { %3301 = vsyncpa [#allocation8], 1 }
0x1c0f   :  { %3302 = vsyncpa [#allocation11], 1 }
0x1c10   :  { %3303 = vsyncpa [#allocation14], 1 }
0x1c11   :  { %3304 = vsyncpa [#allocation17], 1 }
0x1c12   :  { %3305 = vsyncpa [#allocation20], 1 }
0x1c13   :  { %3306 = vsyncpa [#allocation23], 1 }
0x1c14   :  { %3307 = vsyncpa [#allocation26], 1 }

</bundles_post_ra>
